<compile_context>
chip_gen: v7x
topology: tpu7x:2x2x1
jax: 0.10.0
libtpu: 0.0.40
codegen_flags: <defaults>
</compile_context>

<pallas_src>
import functools

import jax
import jax.numpy as jnp
from jax.experimental import pallas as pl
from jax.experimental.pallas import tpu as pltpu


def _round_up(n, m=128):
    return ((n + m - 1) // m) * m


def _pad_to(x, shape):
    return jnp.pad(x, [(0, t - s) for s, t in zip(x.shape, shape)])


def _fold_bn(gamma, beta, mean, var, eps=1e-5):
    scale = gamma * jax.lax.rsqrt(var + eps)
    bias = beta - mean * scale
    return scale, bias


# -----------------------------------------------------------------------------
# in-kernel im2col: gather the KHxKW taps and concatenate along the lane axis
# (each tap is a full multiple-of-128 channel block -> layout-trivial concat),
# producing a single (Hout*Wout, KH*KW*Cin) operand for one MXU matmul.
# -----------------------------------------------------------------------------
def _im2col(x_ref, KH, KW, stride, Hout, Wout):
    Cin = x_ref.shape[-1]
    taps = []
    for kh in range(KH):
        for kw in range(KW):
            if stride == 1:
                patch = x_ref[0, pl.ds(kh, Hout), pl.ds(kw, Wout), :]
            else:
                # TODO(synk): strided sublane loads; de-stride at the wrapper
                # for a layout-friendlier path if stride-2 blocks become hot.
                patch = x_ref[0, pl.ds(kh, Hout, stride),
                              pl.ds(kw, Wout, stride), :]
            taps.append(patch.reshape(Hout * Wout, Cin))
    if len(taps) == 1:
        return taps[0]
    return jnp.concatenate(taps, axis=-1)


# -----------------------------------------------------------------------------
# Kernel 1: KxK conv (pre-padded input) + folded BN (+ optional ReLU).
# One batch image per grid step; K = KH*KW*Cin single matmul, f32 accumulate.
# -----------------------------------------------------------------------------
def _make_conv_bn_kernel(KH, KW, stride, Hout, Wout, apply_relu):
    def kernel(x_ref, w_ref, scale_ref, bias_ref, o_ref):
        Cout = w_ref.shape[-1]
        patches = _im2col(x_ref, KH, KW, stride, Hout, Wout)
        acc = jnp.dot(patches, w_ref[...], preferred_element_type=jnp.float32)
        out = acc * scale_ref[...] + bias_ref[...]          # f32 epilogue
        if apply_relu:
            out = jnp.maximum(out, 0.0)
        o_ref[0] = out.reshape(Hout, Wout, Cout).astype(o_ref.dtype)
    return kernel


def conv_bn(x, w, bn_scale, bn_bias, *, stride=1, pad=1, relu=False,
            out_dtype=None):
    """x: (B,H,W,Cin) NHWC with lane-dense Cin; w: (KH,KW,Cin,Cout)."""
    B, H, W, Cin = x.shape
    KH, KW, _, Cout = w.shape
    Hout = (H + 2 * pad - KH) // stride + 1
    Wout = (W + 2 * pad - KW) // stride + 1
    if pad:
        x = jnp.pad(x, ((0, 0), (pad, pad), (pad, pad), (0, 0)))
    Hp, Wp = H + 2 * pad, W + 2 * pad
    w_r = w.reshape(KH * KW * Cin, Cout)
    scale2 = bn_scale.reshape(1, Cout).astype(jnp.float32)
    bias2 = bn_bias.reshape(1, Cout).astype(jnp.float32)
    out_dtype = out_dtype or x.dtype

    kernel = _make_conv_bn_kernel(KH, KW, stride, Hout, Wout, relu)
    return pl.pallas_call(
        kernel,
        out_shape=jax.ShapeDtypeStruct((B, Hout, Wout, Cout), out_dtype),
        grid=(B,),
        in_specs=[
            pl.BlockSpec((1, Hp, Wp, Cin), lambda b: (b, 0, 0, 0)),
            pl.BlockSpec((KH * KW * Cin, Cout), lambda b: (0, 0)),
            pl.BlockSpec((1, Cout), lambda b: (0, 0)),
            pl.BlockSpec((1, Cout), lambda b: (0, 0)),
        ],
        out_specs=pl.BlockSpec((1, Hout, Wout, Cout), lambda b: (b, 0, 0, 0)),
        compiler_params=pltpu.CompilerParams(dimension_semantics=("parallel",)),
    )(x, w_r, scale2, bias2)


# -----------------------------------------------------------------------------
# Kernel 2: fused conv2(3x3, s=1) + BN2 + SE + residual add + final ReLU.
# conv2's output stays in VMEM; SE pool/FCs run on it in-place (per image,
# since the squeeze is a per-image global average pool).
# -----------------------------------------------------------------------------
def _make_conv2_se_res_kernel(Hout, Wout):
    def kernel(x_ref, sc_ref, w_ref, scale_ref, bias_ref,
               w1_ref, b1_ref, w2_ref, b2_ref, o_ref):
        Cout = w_ref.shape[-1]
        patches = _im2col(x_ref, 3, 3, 1, Hout, Wout)
        o = jnp.dot(patches, w_ref[...], preferred_element_type=jnp.float32)
        o = o * scale_ref[...] + bias_ref[...]            # conv2 + bn2 (HW, C)

        # --- SE block (f32 epilogue; FCs are tiny) ---------------------------
        y = jnp.mean(o, axis=0, keepdims=True)            # (1, C) global pool
        h = jnp.dot(y, w1_ref[...], preferred_element_type=jnp.float32)
        h = jnp.maximum(h + b1_ref[...], 0.0)             # (1, Cr)
        s = jnp.dot(h, w2_ref[...], preferred_element_type=jnp.float32)
        s = jax.nn.sigmoid(s + b2_ref[...])               # (1, C)

        # --- excite, residual add, final ReLU --------------------------------
        sc = sc_ref[0].astype(jnp.float32).reshape(Hout * Wout, Cout)
        res = jnp.maximum(o * s + sc, 0.0)
        o_ref[0] = res.reshape(Hout, Wout, Cout).astype(o_ref.dtype)
    return kernel


def conv2_se_residual(out1, shortcut, w, bn_scale, bn_bias,
                      fc1_w, fc1_b, fc2_w, fc2_b, *, out_dtype=jnp.float32):
    """out1, shortcut: (B,H,W,C) with lane-dense C; w: (3,3,C,C)."""
    B, H, W, C = out1.shape
    Crp = fc1_w.shape[1]
    x = jnp.pad(out1, ((0, 0), (1, 1), (1, 1), (0, 0)))
    Hp, Wp = H + 2, W + 2
    w_r = w.reshape(9 * C, C)

    kernel = _make_conv2_se_res_kernel(H, W)
    return pl.pallas_call(
        kernel,
        out_shape=jax.ShapeDtypeStruct((B, H, W, C), out_dtype),
        grid=(B,),
        in_specs=[
            pl.BlockSpec((1, Hp, Wp, C), lambda b: (b, 0, 0, 0)),
            pl.BlockSpec((1, H, W, C), lambda b: (b, 0, 0, 0)),
            pl.BlockSpec((9 * C, C), lambda b: (0, 0)),
            pl.BlockSpec((1, C), lambda b: (0, 0)),
            pl.BlockSpec((1, C), lambda b: (0, 0)),
            pl.BlockSpec((C, Crp), lambda b: (0, 0)),
            pl.BlockSpec((1, Crp), lambda b: (0, 0)),
            pl.BlockSpec((Crp, C), lambda b: (0, 0)),
            pl.BlockSpec((1, C), lambda b: (0, 0)),
        ],
        out_specs=pl.BlockSpec((1, H, W, C), lambda b: (b, 0, 0, 0)),
        compiler_params=pltpu.CompilerParams(dimension_semantics=("parallel",)),
    )(x, shortcut, w_r,
      bn_scale.reshape(1, C).astype(jnp.float32),
      bn_bias.reshape(1, C).astype(jnp.float32),
      fc1_w.astype(jnp.float32), fc1_b.reshape(1, Crp).astype(jnp.float32),
      fc2_w.astype(jnp.float32), fc2_b.reshape(1, C).astype(jnp.float32))


# -----------------------------------------------------------------------------
# Parameters (PyTorch-equivalent) + kernel-side preparation (fold BN, pad
# channels to lane-dense multiples of 128, cast matmul weights to compute dtype)
# -----------------------------------------------------------------------------
def make_params(key, in_channels, out_channels, reduction=16, stride=1):
    c_red = max(1, out_channels // reduction)
    ks = jax.random.split(key, 8)

    def bn_raw(c, k):
        g = 1.0 + 0.1 * jax.random.normal(k, (c,), jnp.float32)
        b = 0.1 * jax.random.normal(jax.random.fold_in(k, 1), (c,), jnp.float32)
        m = 0.05 * jax.random.normal(jax.random.fold_in(k, 2), (c,), jnp.float32)
        v = 1.0 + 0.1 * jax.random.uniform(jax.random.fold_in(k, 3), (c,), jnp.float32)
        return (g, b, m, v)

    p = {
        "conv1_w": 0.1 * jax.random.normal(ks[0], (3, 3, in_channels, out_channels), jnp.float32),
        "conv2_w": 0.1 * jax.random.normal(ks[1], (3, 3, out_channels, out_channels), jnp.float32),
        "bn1": bn_raw(out_channels, ks[3]),
        "bn2": bn_raw(out_channels, ks[4]),
        "fc1_w": 0.2 * jax.random.normal(ks[6], (out_channels, c_red), jnp.float32),
        "fc1_b": 0.05 * jax.random.normal(jax.random.fold_in(ks[6], 1), (c_red,), jnp.float32),
        "fc2_w": 0.2 * jax.random.normal(ks[7], (c_red, out_channels), jnp.float32),
        "fc2_b": 0.05 * jax.random.normal(jax.random.fold_in(ks[7], 1), (out_channels,), jnp.float32),
    }
    if stride != 1 or in_channels != out_channels:
        p["sc_w"] = 0.1 * jax.random.normal(ks[2], (1, 1, in_channels, out_channels), jnp.float32)
        p["bn_sc"] = bn_raw(out_channels, ks[5])
    return p


def prepare_params(p, compute_dtype=jnp.float32):
    Cin = p["conv1_w"].shape[2]
    Cout = p["conv1_w"].shape[3]
    c_red = p["fc1_w"].shape[1]
    Cpi, Cpo, Crp = _round_up(Cin), _round_up(Cout), _round_up(c_red)

    def fold_pad(raw):
        s, b = _fold_bn(*raw)
        return (_pad_to(s, (Cpo,)), _pad_to(b, (Cpo,)))

    q = {
        "conv1_w": _pad_to(p["conv1_w"], (3, 3, Cpi, Cpo)).astype(compute_dtype),
        "conv2_w": _pad_to(p["conv2_w"], (3, 3, Cpo, Cpo)).astype(compute_dtype),
        "bn1": fold_pad(p["bn1"]),
        "bn2": fold_pad(p["bn2"]),
        "fc1_w": _pad_to(p["fc1_w"], (Cpo, Crp)),
        "fc1_b": _pad_to(p["fc1_b"], (Crp,)),
        "fc2_w": _pad_to(p["fc2_w"], (Crp, Cpo)),
        "fc2_b": _pad_to(p["fc2_b"], (Cpo,)),
    }
    if "sc_w" in p:
        q["sc_w"] = _pad_to(p["sc_w"], (1, 1, Cpi, Cpo)).astype(compute_dtype)
        q["bn_sc"] = fold_pad(p["bn_sc"])
    return q


@functools.partial(jax.jit, static_argnames=("out_channels", "stride"))
def se_residual_block(x_nchw, kp, *, out_channels, stride=1):
    """Forward pass of SEResidualBlock. x_nchw: (B, Cin, H, W) float32."""
    x = jnp.transpose(x_nchw, (0, 2, 3, 1))            # NCHW -> NHWC
    B, H, W, Cin = x.shape
    Cpi = kp["conv1_w"].shape[2]
    cd = kp["conv1_w"].dtype                            # compute dtype (f32/bf16)
    x_p = _pad_to(x, (B, H, W, Cpi)).astype(cd)         # lane-dense channels

    s1, b1 = kp["bn1"]
    s2, b2 = kp["bn2"]
    out1 = conv_bn(x_p, kp["conv1_w"], s1, b1,
                   stride=stride, pad=1, relu=True, out_dtype=cd)

    if "sc_w" in kp:
        ssc, bsc = kp["bn_sc"]
        shortcut = conv_bn(x_p, kp["sc_w"], ssc, bsc,
                           stride=stride, pad=0, relu=False, out_dtype=cd)
    else:
        shortcut = x_p                                  # identity shortcut

    out = conv2_se_residual(out1, shortcut, kp["conv2_w"], s2, b2,
                            kp["fc1_w"], kp["fc1_b"], kp["fc2_w"], kp["fc2_b"],
                            out_dtype=jnp.float32)
    out = out[..., :out_channels]                       # drop channel padding
    return jnp.transpose(out, (0, 3, 1, 2))             # NHWC -> NCHW


# -----------------------------------------------------------------------------
# Pure-JAX reference (glue only, used for the correctness check)
# -----------------------------------------------------------------------------
def _ref_forward(x_nchw, params, stride=1):
    x = jnp.transpose(x_nchw, (0, 2, 3, 1))
    dn = ("NHWC", "HWIO", "NHWC")

    def conv(x, w, s, pad):
        return jax.lax.conv_general_dilated(x, w, (s, s), [(pad, pad), (pad, pad)],
                                            dimension_numbers=dn)

    def bn(x, raw):
        s, b = _fold_bn(*raw)
        return x * s + b

    out = jax.nn.relu(bn(conv(x, params["conv1_w"], stride, 1), params["bn1"]))
    out = bn(conv(out, params["conv2_w"], 1, 1), params["bn2"])
    y = jnp.mean(out, axis=(1, 2))
    h = jax.nn.relu(y @ params["fc1_w"] + params["fc1_b"])
    s = jax.nn.sigmoid(h @ params["fc2_w"] + params["fc2_b"])
    out = out * s[:, None, None, :]
    if "sc_w" in params:
        sc = bn(conv(x, params["sc_w"], stride, 0), params["bn_sc"])
    else:
        sc = x
    out = jax.nn.relu(out + sc)
    return jnp.transpose(out, (0, 3, 1, 2))


if __name__ == "__main__":
    B, Cin, Cout, H, W = 2, 16, 32, 16, 16          # out_channels >= reduction
    stride = 1
    key = jax.random.PRNGKey(0)
    kx, kp_key = jax.random.split(key)
    x = jax.random.normal(kx, (B, Cin, H, W), jnp.float32)   # PyTorch NCHW input
    params = make_params(kp_key, Cin, Cout, reduction=16, stride=stride)

    ref = _ref_forward(x, params, stride=stride)

    # f32 compute path (strict check; also the v5e-friendly path).
    kp_f32 = prepare_params(params, compute_dtype=jnp.float32)
    out = se_residual_block(x, kp_f32, out_channels=Cout, stride=stride)
    out = jax.block_until_ready(out)
    assert out.shape == (B, Cout, H, W), out.shape
    assert jnp.allclose(out, ref, rtol=1e-4, atol=1e-4), \
        float(jnp.max(jnp.abs(out - ref)))

    # bf16 compute path (v6e/v7x MXU rate): bf16 matmul inputs, f32 accumulate
    # and f32 BN/SE epilogue; loose tolerance for the bf16 rounding.
    kp_bf16 = prepare_params(params, compute_dtype=jnp.bfloat16)
    out_bf = se_residual_block(x, kp_bf16, out_channels=Cout, stride=stride)
    out_bf = jax.block_until_ready(out_bf)
    assert out_bf.shape == (B, Cout, H, W), out_bf.shape
    assert jnp.allclose(out_bf, ref, rtol=1e-1, atol=1e-1), \
        float(jnp.max(jnp.abs(out_bf - ref)))

    print("KERNEL_OK")
</pallas_src>

<mosaic_0001>
module attributes {stable_mosaic.version = 11 : i64} {
  func.func @kernel(%arg0: i32, %arg1: memref<1x16x16x128xf32, #tpu.memory_space<vmem>>, %arg2: memref<128x128xf32, #tpu.memory_space<vmem>>, %arg3: memref<1x128xf32, #tpu.memory_space<vmem>>, %arg4: memref<1x128xf32, #tpu.memory_space<vmem>>, %arg5: memref<1x16x16x128xf32, #tpu.memory_space<vmem>>) attributes {dimension_semantics = [#tpu.dimension_semantics<parallel>], iteration_bounds = array<i64: 2>, scalar_prefetch = 0 : i64, scratch_operands = 0 : i64, tpu.core_type = #tpu.core_type<tc>, window_params = [{transform_indices = @transform_0, window_bounds = array<i64: 1, 16, 16, 128>}, {pipeline_mode = #tpu.pipeline_mode<synchronous>, transform_indices = @transform_1, window_bounds = array<i64: 128, 128>}, {pipeline_mode = #tpu.pipeline_mode<synchronous>, transform_indices = @transform_2, window_bounds = array<i64: 1, 128>}, {pipeline_mode = #tpu.pipeline_mode<synchronous>, transform_indices = @transform_3, window_bounds = array<i64: 1, 128>}, {transform_indices = @transform_4, window_bounds = array<i64: 1, 16, 16, 128>}]} {
    %c0 = arith.constant 0 : index
    %c0_0 = arith.constant 0 : index
    %c0_1 = arith.constant 0 : index
    %c0_2 = arith.constant 0 : index
    %0 = vector.load %arg1[%c0, %c0_0, %c0_1, %c0_2] : memref<1x16x16x128xf32, #tpu.memory_space<vmem>>, vector<1x16x16x128xf32>
    %1 = vector.shape_cast %0 : vector<1x16x16x128xf32> to vector<16x16x128xf32>
    %2 = vector.shape_cast %1 : vector<16x16x128xf32> to vector<256x128xf32>
    %c0_3 = arith.constant 0 : index
    %c0_4 = arith.constant 0 : index
    %3 = vector.load %arg2[%c0_3, %c0_4] : memref<128x128xf32, #tpu.memory_space<vmem>>, vector<128x128xf32>
    %cst = arith.constant dense<0.000000e+00> : vector<256x128xf32>
    %4 = tpu.matmul %2, %3, %cst {dimension_numbers = #tpu.dot_dimension_numbers<[1], [0], [0], [1], [0, 0, 1, 1], [], []>} : vector<256x128xf32>, vector<128x128xf32>, vector<256x128xf32> -> vector<256x128xf32>
    %c0_5 = arith.constant 0 : index
    %c0_6 = arith.constant 0 : index
    %5 = vector.load %arg3[%c0_5, %c0_6] : memref<1x128xf32, #tpu.memory_space<vmem>>, vector<1x128xf32>
    %6 = vector.broadcast %5 : vector<1x128xf32> to vector<256x128xf32>
    %7 = arith.mulf %4, %6 : vector<256x128xf32>
    %c0_7 = arith.constant 0 : index
    %c0_8 = arith.constant 0 : index
    %8 = vector.load %arg4[%c0_7, %c0_8] : memref<1x128xf32, #tpu.memory_space<vmem>>, vector<1x128xf32>
    %9 = vector.broadcast %8 : vector<1x128xf32> to vector<256x128xf32>
    %10 = arith.addf %7, %9 : vector<256x128xf32>
    %11 = vector.shape_cast %10 : vector<256x128xf32> to vector<16x16x128xf32>
    %c0_9 = arith.constant 0 : index
    %c0_10 = arith.constant 0 : index
    %c0_11 = arith.constant 0 : index
    %c0_12 = arith.constant 0 : index
    %12 = vector.load %arg5[%c0_9, %c0_10, %c0_11, %c0_12] : memref<1x16x16x128xf32, #tpu.memory_space<vmem>>, vector<1x16x16x128xf32>
    %13 = vector.shape_cast %12 : vector<1x16x16x128xf32> to vector<16x16x128xf32>
    %14 = vector.shape_cast %11 : vector<16x16x128xf32> to vector<1x16x16x128xf32>
    tpu.vector_store %arg5[%c0_9, %c0_10, %c0_11, %c0_12], %14 {strides = array<i32>} : memref<1x16x16x128xf32, #tpu.memory_space<vmem>>, vector<1x16x16x128xf32>,
    return
  }
  func.func @transform_0(%arg0: i32) -> (i32, i32, i32, i32) {
    %c0_i32 = arith.constant 0 : i32
    %c0_i32_0 = arith.constant 0 : i32
    %c0_i32_1 = arith.constant 0 : i32
    %c0_i32_2 = arith.constant 0 : i32
    return %arg0, %c0_i32, %c0_i32_0, %c0_i32_1 : i32, i32, i32, i32
  }
  func.func @transform_1(%arg0: i32) -> (i32, i32) {
    %c0_i32 = arith.constant 0 : i32
    %c0_i32_0 = arith.constant 0 : i32
    %c0_i32_1 = arith.constant 0 : i32
    return %c0_i32, %c0_i32_0 : i32, i32
  }
  func.func @transform_2(%arg0: i32) -> (i32, i32) {
    %c0_i32 = arith.constant 0 : i32
    %c0_i32_0 = arith.constant 0 : i32
    %c0_i32_1 = arith.constant 0 : i32
    return %c0_i32, %c0_i32_0 : i32, i32
  }
  func.func @transform_3(%arg0: i32) -> (i32, i32) {
    %c0_i32 = arith.constant 0 : i32
    %c0_i32_0 = arith.constant 0 : i32
    %c0_i32_1 = arith.constant 0 : i32
    return %c0_i32, %c0_i32_0 : i32, i32
  }
  func.func @transform_4(%arg0: i32) -> (i32, i32, i32, i32) {
    %c0_i32 = arith.constant 0 : i32
    %c0_i32_0 = arith.constant 0 : i32
    %c0_i32_1 = arith.constant 0 : i32
    %c0_i32_2 = arith.constant 0 : i32
    return %arg0, %c0_i32, %c0_i32_0, %c0_i32_1 : i32, i32, i32, i32
  }
}

module attributes {stable_mosaic.version = 11 : i64} {
  func.func @kernel(%arg0: i32, %arg1: memref<1x18x18x128xf32, #tpu.memory_space<vmem>>, %arg2: memref<1x16x16x128xf32, #tpu.memory_space<vmem>>, %arg3: memref<1152x128xf32, #tpu.memory_space<vmem>>, %arg4: memref<1x128xf32, #tpu.memory_space<vmem>>, %arg5: memref<1x128xf32, #tpu.memory_space<vmem>>, %arg6: memref<128x128xf32, #tpu.memory_space<vmem>>, %arg7: memref<1x128xf32, #tpu.memory_space<vmem>>, %arg8: memref<128x128xf32, #tpu.memory_space<vmem>>, %arg9: memref<1x128xf32, #tpu.memory_space<vmem>>, %arg10: memref<1x16x16x128xf32, #tpu.memory_space<vmem>>) attributes {dimension_semantics = [#tpu.dimension_semantics<parallel>], iteration_bounds = array<i64: 2>, scalar_prefetch = 0 : i64, scratch_operands = 0 : i64, tpu.core_type = #tpu.core_type<tc>, window_params = [{transform_indices = @transform_0, window_bounds = array<i64: 1, 18, 18, 128>}, {transform_indices = @transform_1, window_bounds = array<i64: 1, 16, 16, 128>}, {pipeline_mode = #tpu.pipeline_mode<synchronous>, transform_indices = @transform_2, window_bounds = array<i64: 1152, 128>}, {pipeline_mode = #tpu.pipeline_mode<synchronous>, transform_indices = @transform_3, window_bounds = array<i64: 1, 128>}, {pipeline_mode = #tpu.pipeline_mode<synchronous>, transform_indices = @transform_4, window_bounds = array<i64: 1, 128>}, {pipeline_mode = #tpu.pipeline_mode<synchronous>, transform_indices = @transform_5, window_bounds = array<i64: 128, 128>}, {pipeline_mode = #tpu.pipeline_mode<synchronous>, transform_indices = @transform_6, window_bounds = array<i64: 1, 128>}, {pipeline_mode = #tpu.pipeline_mode<synchronous>, transform_indices = @transform_7, window_bounds = array<i64: 128, 128>}, {pipeline_mode = #tpu.pipeline_mode<synchronous>, transform_indices = @transform_8, window_bounds = array<i64: 1, 128>}, {transform_indices = @transform_9, window_bounds = array<i64: 1, 16, 16, 128>}]} {
    %c0 = arith.constant 0 : index
    %c0_0 = arith.constant 0 : index
    %c0_1 = arith.constant 0 : index
    %c0_2 = arith.constant 0 : index
    %0 = vector.load %arg1[%c0, %c0_0, %c0_1, %c0_2] : memref<1x18x18x128xf32, #tpu.memory_space<vmem>>, vector<1x16x16x128xf32>
    %1 = vector.shape_cast %0 : vector<1x16x16x128xf32> to vector<16x16x128xf32>
    %2 = vector.shape_cast %1 : vector<16x16x128xf32> to vector<256x128xf32>
    %c0_3 = arith.constant 0 : index
    %c0_4 = arith.constant 0 : index
    %c1 = arith.constant 1 : index
    %c0_5 = arith.constant 0 : index
    %3 = vector.load %arg1[%c0_3, %c0_4, %c1, %c0_5] : memref<1x18x18x128xf32, #tpu.memory_space<vmem>>, vector<1x16x16x128xf32>
    %4 = vector.shape_cast %3 : vector<1x16x16x128xf32> to vector<16x16x128xf32>
    %5 = vector.shape_cast %4 : vector<16x16x128xf32> to vector<256x128xf32>
    %c0_6 = arith.constant 0 : index
    %c0_7 = arith.constant 0 : index
    %c2 = arith.constant 2 : index
    %c0_8 = arith.constant 0 : index
    %6 = vector.load %arg1[%c0_6, %c0_7, %c2, %c0_8] : memref<1x18x18x128xf32, #tpu.memory_space<vmem>>, vector<1x16x16x128xf32>
    %7 = vector.shape_cast %6 : vector<1x16x16x128xf32> to vector<16x16x128xf32>
    %8 = vector.shape_cast %7 : vector<16x16x128xf32> to vector<256x128xf32>
    %c0_9 = arith.constant 0 : index
    %c1_10 = arith.constant 1 : index
    %c0_11 = arith.constant 0 : index
    %c0_12 = arith.constant 0 : index
    %9 = vector.load %arg1[%c0_9, %c1_10, %c0_11, %c0_12] : memref<1x18x18x128xf32, #tpu.memory_space<vmem>>, vector<1x16x16x128xf32>
    %10 = vector.shape_cast %9 : vector<1x16x16x128xf32> to vector<16x16x128xf32>
    %11 = vector.shape_cast %10 : vector<16x16x128xf32> to vector<256x128xf32>
    %c0_13 = arith.constant 0 : index
    %c1_14 = arith.constant 1 : index
    %c1_15 = arith.constant 1 : index
    %c0_16 = arith.constant 0 : index
    %12 = vector.load %arg1[%c0_13, %c1_14, %c1_15, %c0_16] : memref<1x18x18x128xf32, #tpu.memory_space<vmem>>, vector<1x16x16x128xf32>
    %13 = vector.shape_cast %12 : vector<1x16x16x128xf32> to vector<16x16x128xf32>
    %14 = vector.shape_cast %13 : vector<16x16x128xf32> to vector<256x128xf32>
    %c0_17 = arith.constant 0 : index
    %c1_18 = arith.constant 1 : index
    %c2_19 = arith.constant 2 : index
    %c0_20 = arith.constant 0 : index
    %15 = vector.load %arg1[%c0_17, %c1_18, %c2_19, %c0_20] : memref<1x18x18x128xf32, #tpu.memory_space<vmem>>, vector<1x16x16x128xf32>
    %16 = vector.shape_cast %15 : vector<1x16x16x128xf32> to vector<16x16x128xf32>
    %17 = vector.shape_cast %16 : vector<16x16x128xf32> to vector<256x128xf32>
    %c0_21 = arith.constant 0 : index
    %c2_22 = arith.constant 2 : index
    %c0_23 = arith.constant 0 : index
    %c0_24 = arith.constant 0 : index
    %18 = vector.load %arg1[%c0_21, %c2_22, %c0_23, %c0_24] : memref<1x18x18x128xf32, #tpu.memory_space<vmem>>, vector<1x16x16x128xf32>
    %19 = vector.shape_cast %18 : vector<1x16x16x128xf32> to vector<16x16x128xf32>
    %20 = vector.shape_cast %19 : vector<16x16x128xf32> to vector<256x128xf32>
    %c0_25 = arith.constant 0 : index
    %c2_26 = arith.constant 2 : index
    %c1_27 = arith.constant 1 : index
    %c0_28 = arith.constant 0 : index
    %21 = vector.load %arg1[%c0_25, %c2_26, %c1_27, %c0_28] : memref<1x18x18x128xf32, #tpu.memory_space<vmem>>, vector<1x16x16x128xf32>
    %22 = vector.shape_cast %21 : vector<1x16x16x128xf32> to vector<16x16x128xf32>
    %23 = vector.shape_cast %22 : vector<16x16x128xf32> to vector<256x128xf32>
    %c0_29 = arith.constant 0 : index
    %c2_30 = arith.constant 2 : index
    %c2_31 = arith.constant 2 : index
    %c0_32 = arith.constant 0 : index
    %24 = vector.load %arg1[%c0_29, %c2_30, %c2_31, %c0_32] : memref<1x18x18x128xf32, #tpu.memory_space<vmem>>, vector<1x16x16x128xf32>
    %25 = vector.shape_cast %24 : vector<1x16x16x128xf32> to vector<16x16x128xf32>
    %26 = vector.shape_cast %25 : vector<16x16x128xf32> to vector<256x128xf32>
    %27 = tpu.concatenate %2, %5, %8, %11, %14, %17, %20, %23, %26 in 1 : vector<256x128xf32>, vector<256x128xf32>, vector<256x128xf32>, vector<256x128xf32>, vector<256x128xf32>, vector<256x128xf32>, vector<256x128xf32>, vector<256x128xf32>, vector<256x128xf32> -> vector<256x1152xf32>
    %c0_33 = arith.constant 0 : index
    %c0_34 = arith.constant 0 : index
    %28 = vector.load %arg3[%c0_33, %c0_34] : memref<1152x128xf32, #tpu.memory_space<vmem>>, vector<1152x128xf32>
    %cst = arith.constant dense<0.000000e+00> : vector<256x128xf32>
    %29 = tpu.matmul %27, %28, %cst {dimension_numbers = #tpu.dot_dimension_numbers<[1], [0], [0], [1], [0, 0, 1, 1], [], []>} : vector<256x1152xf32>, vector<1152x128xf32>, vector<256x128xf32> -> vector<256x128xf32>
    %c0_35 = arith.constant 0 : index
    %c0_36 = arith.constant 0 : index
    %30 = vector.load %arg4[%c0_35, %c0_36] : memref<1x128xf32, #tpu.memory_space<vmem>>, vector<1x128xf32>
    %31 = vector.broadcast %30 : vector<1x128xf32> to vector<256x128xf32>
    %32 = arith.mulf %29, %31 : vector<256x128xf32>
    %c0_37 = arith.constant 0 : index
    %c0_38 = arith.constant 0 : index
    %33 = vector.load %arg5[%c0_37, %c0_38] : memref<1x128xf32, #tpu.memory_space<vmem>>, vector<1x128xf32>
    %34 = vector.broadcast %33 : vector<1x128xf32> to vector<256x128xf32>
    %35 = arith.addf %32, %34 : vector<256x128xf32>
    %cst_39 = arith.constant dense<0.000000e+00> : vector<128xf32>
    %36 = vector.multi_reduction <add>, %35, %cst_39 [0] : vector<256x128xf32> to vector<128xf32>
    %37 = vector.shape_cast %36 : vector<128xf32> to vector<1x128xf32>
    %cst_40 = arith.constant 2.560000e+02 : f32
    %38 = vector.broadcast %cst_40 : f32 to vector<1x128xf32>
    %39 = arith.divf %37, %38 : vector<1x128xf32>
    %c0_41 = arith.constant 0 : index
    %c0_42 = arith.constant 0 : index
    %40 = vector.load %arg6[%c0_41, %c0_42] : memref<128x128xf32, #tpu.memory_space<vmem>>, vector<128x128xf32>
    %cst_43 = arith.constant dense<0.000000e+00> : vector<1x128xf32>
    %41 = tpu.matmul %39, %40, %cst_43 {dimension_numbers = #tpu.dot_dimension_numbers<[1], [0], [0], [1], [0, 0, 1, 1], [], []>} : vector<1x128xf32>, vector<128x128xf32>, vector<1x128xf32> -> vector<1x128xf32>
    %c0_44 = arith.constant 0 : index
    %c0_45 = arith.constant 0 : index
    %42 = vector.load %arg7[%c0_44, %c0_45] : memref<1x128xf32, #tpu.memory_space<vmem>>, vector<1x128xf32>
    %43 = arith.addf %41, %42 : vector<1x128xf32>
    %cst_46 = arith.constant 0.000000e+00 : f32
    %44 = vector.broadcast %cst_46 : f32 to vector<1x128xf32>
    %45 = arith.maximumf %43, %44 : vector<1x128xf32>
    %c0_47 = arith.constant 0 : index
    %c0_48 = arith.constant 0 : index
    %46 = vector.load %arg8[%c0_47, %c0_48] : memref<128x128xf32, #tpu.memory_space<vmem>>, vector<128x128xf32>
    %cst_49 = arith.constant dense<0.000000e+00> : vector<1x128xf32>
    %47 = tpu.matmul %45, %46, %cst_49 {dimension_numbers = #tpu.dot_dimension_numbers<[1], [0], [0], [1], [0, 0, 1, 1], [], []>} : vector<1x128xf32>, vector<128x128xf32>, vector<1x128xf32> -> vector<1x128xf32>
    %c0_50 = arith.constant 0 : index
    %c0_51 = arith.constant 0 : index
    %48 = vector.load %arg9[%c0_50, %c0_51] : memref<1x128xf32, #tpu.memory_space<vmem>>, vector<1x128xf32>
    %49 = arith.addf %47, %48 : vector<1x128xf32>
    %50 = arith.negf %49 : vector<1x128xf32>
    %51 = math.exp %50 : vector<1x128xf32>
    %cst_52 = arith.constant 1.000000e+00 : f32
    %52 = vector.broadcast %cst_52 : f32 to vector<1x128xf32>
    %53 = arith.addf %52, %51 : vector<1x128xf32>
    %54 = arith.divf %52, %53 : vector<1x128xf32>
    %c0_53 = arith.constant 0 : index
    %c0_54 = arith.constant 0 : index
    %c0_55 = arith.constant 0 : index
    %c0_56 = arith.constant 0 : index
    %55 = vector.load %arg2[%c0_53, %c0_54, %c0_55, %c0_56] : memref<1x16x16x128xf32, #tpu.memory_space<vmem>>, vector<1x16x16x128xf32>
    %56 = vector.shape_cast %55 : vector<1x16x16x128xf32> to vector<16x16x128xf32>
    %57 = vector.shape_cast %56 : vector<16x16x128xf32> to vector<256x128xf32>
    %58 = vector.broadcast %54 : vector<1x128xf32> to vector<256x128xf32>
    %59 = arith.mulf %35, %58 : vector<256x128xf32>
    %60 = arith.addf %59, %57 : vector<256x128xf32>
    %cst_57 = arith.constant 0.000000e+00 : f32
    %61 = vector.broadcast %cst_57 : f32 to vector<256x128xf32>
    %62 = arith.maximumf %60, %61 : vector<256x128xf32>
    %63 = vector.shape_cast %62 : vector<256x128xf32> to vector<16x16x128xf32>
    %c0_58 = arith.constant 0 : index
    %c0_59 = arith.constant 0 : index
    %c0_60 = arith.constant 0 : index
    %c0_61 = arith.constant 0 : index
    %64 = vector.load %arg10[%c0_58, %c0_59, %c0_60, %c0_61] : memref<1x16x16x128xf32, #tpu.memory_space<vmem>>, vector<1x16x16x128xf32>
    %65 = vector.shape_cast %64 : vector<1x16x16x128xf32> to vector<16x16x128xf32>
    %66 = vector.shape_cast %63 : vector<16x16x128xf32> to vector<1x16x16x128xf32>
    tpu.vector_store %arg10[%c0_58, %c0_59, %c0_60, %c0_61], %66 {strides = array<i32>} : memref<1x16x16x128xf32, #tpu.memory_space<vmem>>, vector<1x16x16x128xf32>,
    return
  }
  func.func @transform_0(%arg0: i32) -> (i32, i32, i32, i32) {
    %c0_i32 = arith.constant 0 : i32
    %c0_i32_0 = arith.constant 0 : i32
    %c0_i32_1 = arith.constant 0 : i32
    %c0_i32_2 = arith.constant 0 : i32
    return %arg0, %c0_i32, %c0_i32_0, %c0_i32_1 : i32, i32, i32, i32
  }
  func.func @transform_1(%arg0: i32) -> (i32, i32, i32, i32) {
    %c0_i32 = arith.constant 0 : i32
    %c0_i32_0 = arith.constant 0 : i32
    %c0_i32_1 = arith.constant 0 : i32
    %c0_i32_2 = arith.constant 0 : i32
    return %arg0, %c0_i32, %c0_i32_0, %c0_i32_1 : i32, i32, i32, i32
  }
  func.func @transform_2(%arg0: i32) -> (i32, i32) {
    %c0_i32 = arith.constant 0 : i32
    %c0_i32_0 = arith.constant 0 : i32
    %c0_i32_1 = arith.constant 0 : i32
    return %c0_i32, %c0_i32_0 : i32, i32
  }
  func.func @transform_3(%arg0: i32) -> (i32, i32) {
    %c0_i32 = arith.constant 0 : i32
    %c0_i32_0 = arith.constant 0 : i32
    %c0_i32_1 = arith.constant 0 : i32
    return %c0_i32, %c0_i32_0 : i32, i32
  }
  func.func @transform_4(%arg0: i32) -> (i32, i32) {
    %c0_i32 = arith.constant 0 : i32
    %c0_i32_0 = arith.constant 0 : i32
    %c0_i32_1 = arith.constant 0 : i32
    return %c0_i32, %c0_i32_0 : i32, i32
  }
  func.func @transform_5(%arg0: i32) -> (i32, i32) {
    %c0_i32 = arith.constant 0 : i32
    %c0_i32_0 = arith.constant 0 : i32
    %c0_i32_1 = arith.constant 0 : i32
    return %c0_i32, %c0_i32_0 : i32, i32
  }
  func.func @transform_6(%arg0: i32) -> (i32, i32) {
    %c0_i32 = arith.constant 0 : i32
    %c0_i32_0 = arith.constant 0 : i32
    %c0_i32_1 = arith.constant 0 : i32
    return %c0_i32, %c0_i32_0 : i32, i32
  }
  func.func @transform_7(%arg0: i32) -> (i32, i32) {
    %c0_i32 = arith.constant 0 : i32
    %c0_i32_0 = arith.constant 0 : i32
    %c0_i32_1 = arith.constant 0 : i32
    return %c0_i32, %c0_i32_0 : i32, i32
  }
  func.func @transform_8(%arg0: i32) -> (i32, i32) {
    %c0_i32 = arith.constant 0 : i32
    %c0_i32_0 = arith.constant 0 : i32
    %c0_i32_1 = arith.constant 0 : i32
    return %c0_i32, %c0_i32_0 : i32, i32
  }
  func.func @transform_9(%arg0: i32) -> (i32, i32, i32, i32) {
    %c0_i32 = arith.constant 0 : i32
    %c0_i32_0 = arith.constant 0 : i32
    %c0_i32_1 = arith.constant 0 : i32
    %c0_i32_2 = arith.constant 0 : i32
    return %arg0, %c0_i32, %c0_i32_0, %c0_i32_1 : i32, i32, i32, i32
  }
}

module attributes {stable_mosaic.version = 11 : i64} {
  func.func @kernel(%arg0: i32, %arg1: memref<1x18x18x128xf32, #tpu.memory_space<vmem>>, %arg2: memref<1152x128xf32, #tpu.memory_space<vmem>>, %arg3: memref<1x128xf32, #tpu.memory_space<vmem>>, %arg4: memref<1x128xf32, #tpu.memory_space<vmem>>, %arg5: memref<1x16x16x128xf32, #tpu.memory_space<vmem>>) attributes {dimension_semantics = [#tpu.dimension_semantics<parallel>], iteration_bounds = array<i64: 2>, scalar_prefetch = 0 : i64, scratch_operands = 0 : i64, tpu.core_type = #tpu.core_type<tc>, window_params = [{transform_indices = @transform_0, window_bounds = array<i64: 1, 18, 18, 128>}, {pipeline_mode = #tpu.pipeline_mode<synchronous>, transform_indices = @transform_1, window_bounds = array<i64: 1152, 128>}, {pipeline_mode = #tpu.pipeline_mode<synchronous>, transform_indices = @transform_2, window_bounds = array<i64: 1, 128>}, {pipeline_mode = #tpu.pipeline_mode<synchronous>, transform_indices = @transform_3, window_bounds = array<i64: 1, 128>}, {transform_indices = @transform_4, window_bounds = array<i64: 1, 16, 16, 128>}]} {
    %c0 = arith.constant 0 : index
    %c0_0 = arith.constant 0 : index
    %c0_1 = arith.constant 0 : index
    %c0_2 = arith.constant 0 : index
    %0 = vector.load %arg1[%c0, %c0_0, %c0_1, %c0_2] : memref<1x18x18x128xf32, #tpu.memory_space<vmem>>, vector<1x16x16x128xf32>
    %1 = vector.shape_cast %0 : vector<1x16x16x128xf32> to vector<16x16x128xf32>
    %2 = vector.shape_cast %1 : vector<16x16x128xf32> to vector<256x128xf32>
    %c0_3 = arith.constant 0 : index
    %c0_4 = arith.constant 0 : index
    %c1 = arith.constant 1 : index
    %c0_5 = arith.constant 0 : index
    %3 = vector.load %arg1[%c0_3, %c0_4, %c1, %c0_5] : memref<1x18x18x128xf32, #tpu.memory_space<vmem>>, vector<1x16x16x128xf32>
    %4 = vector.shape_cast %3 : vector<1x16x16x128xf32> to vector<16x16x128xf32>
    %5 = vector.shape_cast %4 : vector<16x16x128xf32> to vector<256x128xf32>
    %c0_6 = arith.constant 0 : index
    %c0_7 = arith.constant 0 : index
    %c2 = arith.constant 2 : index
    %c0_8 = arith.constant 0 : index
    %6 = vector.load %arg1[%c0_6, %c0_7, %c2, %c0_8] : memref<1x18x18x128xf32, #tpu.memory_space<vmem>>, vector<1x16x16x128xf32>
    %7 = vector.shape_cast %6 : vector<1x16x16x128xf32> to vector<16x16x128xf32>
    %8 = vector.shape_cast %7 : vector<16x16x128xf32> to vector<256x128xf32>
    %c0_9 = arith.constant 0 : index
    %c1_10 = arith.constant 1 : index
    %c0_11 = arith.constant 0 : index
    %c0_12 = arith.constant 0 : index
    %9 = vector.load %arg1[%c0_9, %c1_10, %c0_11, %c0_12] : memref<1x18x18x128xf32, #tpu.memory_space<vmem>>, vector<1x16x16x128xf32>
    %10 = vector.shape_cast %9 : vector<1x16x16x128xf32> to vector<16x16x128xf32>
    %11 = vector.shape_cast %10 : vector<16x16x128xf32> to vector<256x128xf32>
    %c0_13 = arith.constant 0 : index
    %c1_14 = arith.constant 1 : index
    %c1_15 = arith.constant 1 : index
    %c0_16 = arith.constant 0 : index
    %12 = vector.load %arg1[%c0_13, %c1_14, %c1_15, %c0_16] : memref<1x18x18x128xf32, #tpu.memory_space<vmem>>, vector<1x16x16x128xf32>
    %13 = vector.shape_cast %12 : vector<1x16x16x128xf32> to vector<16x16x128xf32>
    %14 = vector.shape_cast %13 : vector<16x16x128xf32> to vector<256x128xf32>
    %c0_17 = arith.constant 0 : index
    %c1_18 = arith.constant 1 : index
    %c2_19 = arith.constant 2 : index
    %c0_20 = arith.constant 0 : index
    %15 = vector.load %arg1[%c0_17, %c1_18, %c2_19, %c0_20] : memref<1x18x18x128xf32, #tpu.memory_space<vmem>>, vector<1x16x16x128xf32>
    %16 = vector.shape_cast %15 : vector<1x16x16x128xf32> to vector<16x16x128xf32>
    %17 = vector.shape_cast %16 : vector<16x16x128xf32> to vector<256x128xf32>
    %c0_21 = arith.constant 0 : index
    %c2_22 = arith.constant 2 : index
    %c0_23 = arith.constant 0 : index
    %c0_24 = arith.constant 0 : index
    %18 = vector.load %arg1[%c0_21, %c2_22, %c0_23, %c0_24] : memref<1x18x18x128xf32, #tpu.memory_space<vmem>>, vector<1x16x16x128xf32>
    %19 = vector.shape_cast %18 : vector<1x16x16x128xf32> to vector<16x16x128xf32>
    %20 = vector.shape_cast %19 : vector<16x16x128xf32> to vector<256x128xf32>
    %c0_25 = arith.constant 0 : index
    %c2_26 = arith.constant 2 : index
    %c1_27 = arith.constant 1 : index
    %c0_28 = arith.constant 0 : index
    %21 = vector.load %arg1[%c0_25, %c2_26, %c1_27, %c0_28] : memref<1x18x18x128xf32, #tpu.memory_space<vmem>>, vector<1x16x16x128xf32>
    %22 = vector.shape_cast %21 : vector<1x16x16x128xf32> to vector<16x16x128xf32>
    %23 = vector.shape_cast %22 : vector<16x16x128xf32> to vector<256x128xf32>
    %c0_29 = arith.constant 0 : index
    %c2_30 = arith.constant 2 : index
    %c2_31 = arith.constant 2 : index
    %c0_32 = arith.constant 0 : index
    %24 = vector.load %arg1[%c0_29, %c2_30, %c2_31, %c0_32] : memref<1x18x18x128xf32, #tpu.memory_space<vmem>>, vector<1x16x16x128xf32>
    %25 = vector.shape_cast %24 : vector<1x16x16x128xf32> to vector<16x16x128xf32>
    %26 = vector.shape_cast %25 : vector<16x16x128xf32> to vector<256x128xf32>
    %27 = tpu.concatenate %2, %5, %8, %11, %14, %17, %20, %23, %26 in 1 : vector<256x128xf32>, vector<256x128xf32>, vector<256x128xf32>, vector<256x128xf32>, vector<256x128xf32>, vector<256x128xf32>, vector<256x128xf32>, vector<256x128xf32>, vector<256x128xf32> -> vector<256x1152xf32>
    %c0_33 = arith.constant 0 : index
    %c0_34 = arith.constant 0 : index
    %28 = vector.load %arg2[%c0_33, %c0_34] : memref<1152x128xf32, #tpu.memory_space<vmem>>, vector<1152x128xf32>
    %cst = arith.constant dense<0.000000e+00> : vector<256x128xf32>
    %29 = tpu.matmul %27, %28, %cst {dimension_numbers = #tpu.dot_dimension_numbers<[1], [0], [0], [1], [0, 0, 1, 1], [], []>} : vector<256x1152xf32>, vector<1152x128xf32>, vector<256x128xf32> -> vector<256x128xf32>
    %c0_35 = arith.constant 0 : index
    %c0_36 = arith.constant 0 : index
    %30 = vector.load %arg3[%c0_35, %c0_36] : memref<1x128xf32, #tpu.memory_space<vmem>>, vector<1x128xf32>
    %31 = vector.broadcast %30 : vector<1x128xf32> to vector<256x128xf32>
    %32 = arith.mulf %29, %31 : vector<256x128xf32>
    %c0_37 = arith.constant 0 : index
    %c0_38 = arith.constant 0 : index
    %33 = vector.load %arg4[%c0_37, %c0_38] : memref<1x128xf32, #tpu.memory_space<vmem>>, vector<1x128xf32>
    %34 = vector.broadcast %33 : vector<1x128xf32> to vector<256x128xf32>
    %35 = arith.addf %32, %34 : vector<256x128xf32>
    %cst_39 = arith.constant 0.000000e+00 : f32
    %36 = vector.broadcast %cst_39 : f32 to vector<256x128xf32>
    %37 = arith.maximumf %35, %36 : vector<256x128xf32>
    %38 = vector.shape_cast %37 : vector<256x128xf32> to vector<16x16x128xf32>
    %c0_40 = arith.constant 0 : index
    %c0_41 = arith.constant 0 : index
    %c0_42 = arith.constant 0 : index
    %c0_43 = arith.constant 0 : index
    %39 = vector.load %arg5[%c0_40, %c0_41, %c0_42, %c0_43] : memref<1x16x16x128xf32, #tpu.memory_space<vmem>>, vector<1x16x16x128xf32>
    %40 = vector.shape_cast %39 : vector<1x16x16x128xf32> to vector<16x16x128xf32>
    %41 = vector.shape_cast %38 : vector<16x16x128xf32> to vector<1x16x16x128xf32>
    tpu.vector_store %arg5[%c0_40, %c0_41, %c0_42, %c0_43], %41 {strides = array<i32>} : memref<1x16x16x128xf32, #tpu.memory_space<vmem>>, vector<1x16x16x128xf32>,
    return
  }
  func.func @transform_0(%arg0: i32) -> (i32, i32, i32, i32) {
    %c0_i32 = arith.constant 0 : i32
    %c0_i32_0 = arith.constant 0 : i32
    %c0_i32_1 = arith.constant 0 : i32
    %c0_i32_2 = arith.constant 0 : i32
    return %arg0, %c0_i32, %c0_i32_0, %c0_i32_1 : i32, i32, i32, i32
  }
  func.func @transform_1(%arg0: i32) -> (i32, i32) {
    %c0_i32 = arith.constant 0 : i32
    %c0_i32_0 = arith.constant 0 : i32
    %c0_i32_1 = arith.constant 0 : i32
    return %c0_i32, %c0_i32_0 : i32, i32
  }
  func.func @transform_2(%arg0: i32) -> (i32, i32) {
    %c0_i32 = arith.constant 0 : i32
    %c0_i32_0 = arith.constant 0 : i32
    %c0_i32_1 = arith.constant 0 : i32
    return %c0_i32, %c0_i32_0 : i32, i32
  }
  func.func @transform_3(%arg0: i32) -> (i32, i32) {
    %c0_i32 = arith.constant 0 : i32
    %c0_i32_0 = arith.constant 0 : i32
    %c0_i32_1 = arith.constant 0 : i32
    return %c0_i32, %c0_i32_0 : i32, i32
  }
  func.func @transform_4(%arg0: i32) -> (i32, i32, i32, i32) {
    %c0_i32 = arith.constant 0 : i32
    %c0_i32_0 = arith.constant 0 : i32
    %c0_i32_1 = arith.constant 0 : i32
    %c0_i32_2 = arith.constant 0 : i32
    return %arg0, %c0_i32, %c0_i32_0, %c0_i32_1 : i32, i32, i32, i32
  }
}

</mosaic_0001>

<bundles_post_ra>
// kernel: se_residual_block.4
= control target key start
LH: loop header
LB: loop body
LE: loop exit
PB: predicated region body
PF: predicated region fallthrough
CT: control target
= control target key end

     0   :  { %s868_s15 = smov 0   ;;  %s1082_s0 = inlined_call_operand.vmem [shape: f32[2,16,16,128], index: 0, kind: input, shape index: {}]   ;;  %s1083_s1 = inlined_call_operand.vmem [shape: f32[128,128], index: 1, kind: input, shape index: {}]   ;;  %s1084_s2 = inlined_call_operand.vmem [shape: f32[1,128], index: 2, kind: input, shape index: {}]   ;;  %s1085_s3 = inlined_call_operand.vmem [shape: f32[1,128], index: 3, kind: input, shape index: {}]   ;;  %s1086_s4 = inlined_call_operand.vmem [shape: f32[2,16,16,128], index: 4, kind: output, shape index: {}]  }
   0x1 LB: > { %s636_s16 = sadd.s32 4294967295, %s841_s15   ;;  %p640_p0 = scmp.ge.s32.totalorder %s841_s15, 1  ;;  %s841_s15 = sphi %s868_s15, %s14_s15  }
   0x2   : > { %p162_p1 = scmp.lt.s32.totalorder %s841_s15, 3 }
   0x4   : > { %p163_p2 = pnand %p640_p0, %p162_p1 }
   0x5   : > { %v230_v0 = vld [vmem:[%s1083_s1] sm:$0xff] (!%p163_p2)  ;;  %v231_v1 = vld [vmem:[%s1083_s1 + $0x8] sm:$0xff] (!%p163_p2)  ;;  %v232_v2 = vld [vmem:[%s1083_s1 + $0x10] sm:$0xff] (!%p163_p2)  ;;  %p188_p3 = scmp.lt.s32.totalorder (!%p163_p2), %s636_s16, 1 }
   0x6   : > { %166 = sbr.rel (%p163_p2) target bundleno = 287 (0x11f), region = 36  ;;  %v779_v3 = vpack.c.bf16 (!%p163_p2), %v231_v1, %v230_v0  ;;  %v233_v4 = vld [vmem:[%s1083_s1 + $0x18] sm:$0xff] (!%p163_p2)  ;;  %v234_v6 = vld [vmem:[%s1083_s1 + $0x20] sm:$0xff] (!%p163_p2)  ;;  %v235_v7 = vld [vmem:[%s1083_s1 + $0x28] sm:$0xff] (!%p163_p2) }
   0x7   : > { %v783_v5 = vpack.c.bf16 (!%p163_p2), %v233_v4, %v232_v2  ;;  %v787_v8 = vpack.c.bf16 (!%p163_p2), %v235_v7, %v234_v6  ;;  %v236_v9 = vld [vmem:[%s1083_s1 + $0x30] sm:$0xff] (!%p163_p2)  ;;  %v237_v10 = vld [vmem:[%s1083_s1 + $0x38] sm:$0xff] (!%p163_p2)  ;;  %v238_v14 = vld [vmem:[%s1083_s1 + $0x40] sm:$0xff] (!%p163_p2) }
   0x8   : > { %780 = vmatprep.subr.bf16.mxu0 (!%p163_p2), %v779_v3  ;;  %811 = vmatprep.subr.bf16.mxu1 (!%p163_p2), %v779_v3  ;;  %v791_v13 = vpack.c.bf16 (!%p163_p2), %v237_v10, %v236_v9  ;;  %v239_v15 = vld [vmem:[%s1083_s1 + $0x48] sm:$0xff] (!%p163_p2)  ;;  %v240_v17 = vld [vmem:[%s1083_s1 + $0x50] sm:$0xff] (!%p163_p2)  ;;  %v241_v18 = vld [vmem:[%s1083_s1 + $0x58] sm:$0xff] (!%p163_p2) }
   0x9   : > { %782 = vmatpush3.bf16.msra.mxu0 (!%p163_p2), %v779_v3  ;;  %819 = vmatpush3.bf16.msra.mxu1 (!%p163_p2), %v779_v3  ;;  %v795_v16 = vpack.c.bf16 (!%p163_p2), %v239_v15, %v238_v14  ;;  %v799_v19 = vpack.c.bf16 (!%p163_p2), %v241_v18, %v240_v17  ;;  %v242_v20 = vld [vmem:[%s1083_s1 + $0x60] sm:$0xff] (!%p163_p2)  ;;  %v243_v21 = vld [vmem:[%s1083_s1 + $0x68] sm:$0xff] (!%p163_p2)  ;;  %v244_v23 = vld [vmem:[%s1083_s1 + $0x70] sm:$0xff] (!%p163_p2) }
   0xa   : > { %784 = vmatprep.subr.bf16.mxu0 (!%p163_p2), %v783_v5  ;;  %812 = vmatprep.subr.bf16.mxu1 (!%p163_p2), %v783_v5  ;;  %v803_v22 = vpack.c.bf16 (!%p163_p2), %v243_v21, %v242_v20  ;;  %v245_v24 = vld [vmem:[%s1083_s1 + $0x78] sm:$0xff] (!%p163_p2)  ;;  %v969_v56 = vld [vmem:[%s1084_s2] ss:$0 sm:$0xff] (!%p163_p2) }
   0xb   : > { %v807_v25 = vpack.c.bf16 (!%p163_p2), %v245_v24, %v244_v23  ;;  %v974_v58 = vld [vmem:[%s1085_s3] ss:$0 sm:$0xff] (!%p163_p2) }
   0xd   : > { %s1088_s16 = smov (!%p188_p3, %s636_s16), 1  ;;  %786 = vmatpush3.bf16.msra.mxu0 %v783_v5  ;;  %820 = vmatpush3.bf16.msra.mxu1 %v783_v5 }
   0xe   : > { %s649_s29 = sshll.u32 %s1088_s16, 8  ;;  %788 = vmatprep.subr.bf16.mxu0 %v787_v8  ;;  %813 = vmatprep.subr.bf16.mxu1 %v787_v8 }
   0xf   : > { %s905_s8 = scalar_lea.vmem %s1082_s0, %s649_s29  ;;  %s983_s10 = scalar_lea.vmem %s1086_s4, %s649_s29 }
  0x10   : > { %v198_v11 = vld [vmem:[%s905_s8] sm:$0xff]  ;;  %v199_v26 = vld [vmem:[%s905_s8 + $0x8] sm:$0xff]  ;;  %v200_v28 = vld [vmem:[%s905_s8 + $0x10] sm:$0xff] }
  0x11   : > { %v214_v12 = vld [vmem:[%s905_s8 + $0x80] sm:$0xff]  ;;  %731 = vmatprep.mubr.f32.mxu0 %v198_v11  ;;  %790 = vmatpush3.bf16.msra.mxu0 %v787_v8  ;;  %v215_v27 = vld [vmem:[%s905_s8 + $0x88] sm:$0xff]  ;;  %v216_v29 = vld [vmem:[%s905_s8 + $0x90] sm:$0xff] }
  0x12   : > { %755 = vmatprep.mubr.f32.mxu1 %v214_v12  ;;  %821 = vmatpush3.bf16.msra.mxu1 %v787_v8  ;;  %v201_v30 = vld [vmem:[%s905_s8 + $0x18] sm:$0xff]  ;;  %v202_v32 = vld [vmem:[%s905_s8 + $0x20] sm:$0xff]  ;;  %v203_v34 = vld [vmem:[%s905_s8 + $0x28] sm:$0xff] }
  0x13   : > { %792 = vmatprep.subr.bf16.mxu0 %v791_v13  ;;  %814 = vmatprep.subr.bf16.mxu1 %v791_v13  ;;  %v217_v31 = vld [vmem:[%s905_s8 + $0x98] sm:$0xff]  ;;  %v218_v33 = vld [vmem:[%s905_s8 + $0xa0] sm:$0xff]  ;;  %v219_v35 = vld [vmem:[%s905_s8 + $0xa8] sm:$0xff] }
  0x14   : > { %v204_v36 = vld [vmem:[%s905_s8 + $0x30] sm:$0xff]  ;;  %v205_v38 = vld [vmem:[%s905_s8 + $0x38] sm:$0xff]  ;;  %v206_v40 = vld [vmem:[%s905_s8 + $0x40] sm:$0xff] }
  0x15   : > { %794 = vmatpush3.bf16.msra.mxu0 %v791_v13  ;;  %v220_v37 = vld [vmem:[%s905_s8 + $0xb0] sm:$0xff]  ;;  %v221_v39 = vld [vmem:[%s905_s8 + $0xb8] sm:$0xff]  ;;  %v222_v41 = vld [vmem:[%s905_s8 + $0xc0] sm:$0xff] }
  0x16   : > { %822 = vmatpush3.bf16.msra.mxu1 %v791_v13  ;;  %796 = vmatprep.subr.bf16.mxu0 %v795_v16  ;;  %v207_v42 = vld [vmem:[%s905_s8 + $0x48] sm:$0xff]  ;;  %v208_v44 = vld [vmem:[%s905_s8 + $0x50] sm:$0xff]  ;;  %v209_v46 = vld [vmem:[%s905_s8 + $0x58] sm:$0xff] }
  0x17   : > { %815 = vmatprep.subr.bf16.mxu1 %v795_v16  ;;  %v223_v43 = vld [vmem:[%s905_s8 + $0xc8] sm:$0xff]  ;;  %v224_v45 = vld [vmem:[%s905_s8 + $0xd0] sm:$0xff]  ;;  %v225_v47 = vld [vmem:[%s905_s8 + $0xd8] sm:$0xff] }
  0x18   : > { %v210_v48 = vld [vmem:[%s905_s8 + $0x60] sm:$0xff]  ;;  %v211_v50 = vld [vmem:[%s905_s8 + $0x68] sm:$0xff]  ;;  %v212_v52 = vld [vmem:[%s905_s8 + $0x70] sm:$0xff] }
  0x19   : > { %798 = vmatpush3.bf16.msra.mxu0 %v795_v16  ;;  %v226_v49 = vld [vmem:[%s905_s8 + $0xe0] sm:$0xff]  ;;  %v227_v51 = vld [vmem:[%s905_s8 + $0xe8] sm:$0xff]  ;;  %v228_v53 = vld [vmem:[%s905_s8 + $0xf0] sm:$0xff] }
  0x1a   : > { %823 = vmatpush3.bf16.msra.mxu1 %v795_v16  ;;  %800 = vmatprep.subr.bf16.mxu0 %v799_v19  ;;  %v213_v54 = vld [vmem:[%s905_s8 + $0x78] sm:$0xff] }
  0x1b   : > { %816 = vmatprep.subr.bf16.mxu1 %v799_v19  ;;  %v229_v55 = vld [vmem:[%s905_s8 + $0xf8] sm:$0xff] }
  0x1d   : > { %802 = vmatpush3.bf16.msra.mxu0 %v799_v19 }
  0x1e   : > { %824 = vmatpush3.bf16.msra.mxu1 %v799_v19  ;;  %804 = vmatprep.subr.bf16.mxu0 %v803_v22 }
  0x1f   : > { %817 = vmatprep.subr.bf16.mxu1 %v803_v22 }
  0x21   : > { %806 = vmatpush3.bf16.msra.mxu0 %v803_v22 }
  0x22   : > { %825 = vmatpush3.bf16.msra.mxu1 %v803_v22  ;;  %808 = vmatprep.subr.bf16.mxu0 %v807_v25 }
  0x23   : > { %818 = vmatprep.subr.bf16.mxu1 %v807_v25 }
  0x25   : > { %810 = vmatpush3.bf16.msra.mxu0 %v807_v25 }
  0x26   : > { %826 = vmatpush3.bf16.msra.mxu1 %v807_v25 }
  0x28   : > { %732 = vmatmul.mubr.f32.vlgmr.msra.gmra.mrb[0].mxu0 %v199_v26 }
  0x29   : > { %756 = vmatmul.mubr.f32.vlgmr.msra.gmra.mrb[0].mxu1 %v215_v27  ;;  %734 = vmatprep.mubr.f32.mxu0 %v200_v28 }
  0x2a   : > { %758 = vmatprep.mubr.f32.mxu1 %v216_v29 }
  0x2c   : > { %735 = vmatmul.mubr.f32.gmra.mrb[2].mxu0 %v201_v30 }
  0x2d   : > { %759 = vmatmul.mubr.f32.gmra.mrb[2].mxu1 %v217_v31  ;;  %737 = vmatprep.mubr.f32.mxu0 %v202_v32 }
  0x2e   : > { %761 = vmatprep.mubr.f32.mxu1 %v218_v33 }
  0x30   : > { %738 = vmatmul.mubr.f32.gmra.mrb[4].mxu0 %v203_v34 }
  0x31   : > { %762 = vmatmul.mubr.f32.gmra.mrb[4].mxu1 %v219_v35  ;;  %740 = vmatprep.mubr.f32.mxu0 %v204_v36 }
  0x32   : > { %764 = vmatprep.mubr.f32.mxu1 %v220_v37 }
  0x34   : > { %741 = vmatmul.mubr.f32.gmra.mrb[6].mxu0 %v205_v38 }
  0x35   : > { %765 = vmatmul.mubr.f32.gmra.mrb[6].mxu1 %v221_v39  ;;  %743 = vmatprep.mubr.f32.mxu0 %v206_v40 }
  0x36   : > { %767 = vmatprep.mubr.f32.mxu1 %v222_v41 }
  0x38   : > { %744 = vmatmul.mubr.f32.gmra.mrb[8].mxu0 %v207_v42 }
  0x39   : > { %768 = vmatmul.mubr.f32.gmra.mrb[8].mxu1 %v223_v43  ;;  %746 = vmatprep.mubr.f32.mxu0 %v208_v44 }
  0x3a   : > { %770 = vmatprep.mubr.f32.mxu1 %v224_v45 }
  0x3c   : > { %747 = vmatmul.mubr.f32.gmra.mrb[10].mxu0 %v209_v46 }
  0x3d   : > { %771 = vmatmul.mubr.f32.gmra.mrb[10].mxu1 %v225_v47  ;;  %749 = vmatprep.mubr.f32.mxu0 %v210_v48 }
  0x3e   : > { %773 = vmatprep.mubr.f32.mxu1 %v226_v49 }
  0x40   : > { %750 = vmatmul.mubr.f32.gmra.mrb[12].mxu0 %v211_v50 }
  0x41   : > { %774 = vmatmul.mubr.f32.gmra.mrb[12].mxu1 %v227_v51  ;;  %752 = vmatprep.mubr.f32.mxu0 %v212_v52 }
  0x42   : > { %776 = vmatprep.mubr.f32.mxu1 %v228_v53 }
  0x44   : > { %753 = vmatmul.mubr.f32.gmra.mrb[14].mxu0 %v213_v54 }
  0x45   : > { %777 = vmatmul.mubr.f32.gmra.mrb[14].mxu1 %v229_v55 }
  0xfb   : > { %v733_v57 = vpop.f32.mrb[0].mxu0 }
  0xfc   : > { %v757_v59 = vpop.f32.mrb[0].mxu1  ;;  %v479_v60 = vmul.f32 %v733_v57, %v969_v56  ;;  %v312_v62 = vpop.f32.mrb[1].mxu0 }
  0xfd   : > { %v495_v61 = vmul.f32 %v757_v59, %v969_v56  ;;  %v392_v63 = vpop.f32.mrb[1].mxu1  ;;  %v478_v0 = vmul.f32 %v969_v56, %v312_v62 }
  0xfe   : > { %v494_v1 = vmul.f32 %v969_v56, %v392_v63  ;;  %v518_v2 = vadd.f32 %v974_v58, %v479_v60 }
  0xff   : > { %v534_v3 = vadd.f32 %v974_v58, %v495_v61  ;;  %v517_v4 = vadd.f32 %v974_v58, %v478_v0  ;;  %v736_v6 = vpop.f32.mrb[2].mxu0 }
 0x100   : > { %v533_v5 = vadd.f32 %v974_v58, %v494_v1  ;;  %v760_v7 = vpop.f32.mrb[2].mxu1  ;;  %550 = vst [vmem:[%s983_s10 + $0x8] sm:$0xff] %v518_v2  ;;  %v481_v8 = vmul.f32 %v736_v6, %v969_v56  ;;  %v322_v10 = vpop.f32.mrb[3].mxu0 }
 0x101   : > { %566 = vst [vmem:[%s983_s10 + $0x88] sm:$0xff] %v534_v3  ;;  %v497_v9 = vmul.f32 %v760_v7, %v969_v56  ;;  %v402_v11 = vpop.f32.mrb[3].mxu1  ;;  %549 = vst [vmem:[%s983_s10] sm:$0xff] %v517_v4  ;;  %v480_v12 = vmul.f32 %v969_v56, %v322_v10 }
 0x102   : > { %565 = vst [vmem:[%s983_s10 + $0x80] sm:$0xff] %v533_v5  ;;  %v496_v13 = vmul.f32 %v969_v56, %v402_v11  ;;  %v520_v14 = vadd.f32 %v974_v58, %v481_v8 }
 0x103   : > { %v536_v15 = vadd.f32 %v974_v58, %v497_v9  ;;  %v519_v16 = vadd.f32 %v974_v58, %v480_v12  ;;  %v739_v18 = vpop.f32.mrb[4].mxu0 }
 0x104   : > { %v535_v17 = vadd.f32 %v974_v58, %v496_v13  ;;  %v763_v19 = vpop.f32.mrb[4].mxu1  ;;  %552 = vst [vmem:[%s983_s10 + $0x18] sm:$0xff] %v520_v14  ;;  %v483_v20 = vmul.f32 %v739_v18, %v969_v56  ;;  %v332_v22 = vpop.f32.mrb[5].mxu0 }
 0x105   : > { %568 = vst [vmem:[%s983_s10 + $0x98] sm:$0xff] %v536_v15  ;;  %v499_v21 = vmul.f32 %v763_v19, %v969_v56  ;;  %v412_v23 = vpop.f32.mrb[5].mxu1  ;;  %551 = vst [vmem:[%s983_s10 + $0x10] sm:$0xff] %v519_v16  ;;  %v482_v24 = vmul.f32 %v969_v56, %v332_v22 }
 0x106   : > { %567 = vst [vmem:[%s983_s10 + $0x90] sm:$0xff] %v535_v17  ;;  %v498_v25 = vmul.f32 %v969_v56, %v412_v23  ;;  %v522_v26 = vadd.f32 %v974_v58, %v483_v20 }
 0x107   : > { %v538_v27 = vadd.f32 %v974_v58, %v499_v21  ;;  %v521_v28 = vadd.f32 %v974_v58, %v482_v24  ;;  %v742_v30 = vpop.f32.mrb[6].mxu0 }
 0x108   : > { %v537_v29 = vadd.f32 %v974_v58, %v498_v25  ;;  %v766_v31 = vpop.f32.mrb[6].mxu1  ;;  %554 = vst [vmem:[%s983_s10 + $0x28] sm:$0xff] %v522_v26  ;;  %v485_v32 = vmul.f32 %v742_v30, %v969_v56  ;;  %v342_v34 = vpop.f32.mrb[7].mxu0 }
 0x109   : > { %570 = vst [vmem:[%s983_s10 + $0xa8] sm:$0xff] %v538_v27  ;;  %v501_v33 = vmul.f32 %v766_v31, %v969_v56  ;;  %v422_v35 = vpop.f32.mrb[7].mxu1  ;;  %553 = vst [vmem:[%s983_s10 + $0x20] sm:$0xff] %v521_v28  ;;  %v484_v36 = vmul.f32 %v969_v56, %v342_v34 }
 0x10a   : > { %569 = vst [vmem:[%s983_s10 + $0xa0] sm:$0xff] %v537_v29  ;;  %v500_v37 = vmul.f32 %v969_v56, %v422_v35  ;;  %v524_v38 = vadd.f32 %v974_v58, %v485_v32 }
 0x10b   : > { %v540_v39 = vadd.f32 %v974_v58, %v501_v33  ;;  %v523_v40 = vadd.f32 %v974_v58, %v484_v36  ;;  %v745_v42 = vpop.f32.mrb[8].mxu0 }
 0x10c   : > { %v539_v41 = vadd.f32 %v974_v58, %v500_v37  ;;  %v769_v43 = vpop.f32.mrb[8].mxu1  ;;  %556 = vst [vmem:[%s983_s10 + $0x38] sm:$0xff] %v524_v38  ;;  %v487_v44 = vmul.f32 %v745_v42, %v969_v56  ;;  %v352_v46 = vpop.f32.mrb[9].mxu0 }
 0x10d   : > { %572 = vst [vmem:[%s983_s10 + $0xb8] sm:$0xff] %v540_v39  ;;  %v503_v45 = vmul.f32 %v769_v43, %v969_v56  ;;  %v432_v47 = vpop.f32.mrb[9].mxu1  ;;  %555 = vst [vmem:[%s983_s10 + $0x30] sm:$0xff] %v523_v40  ;;  %v486_v48 = vmul.f32 %v969_v56, %v352_v46 }
 0x10e   : > { %571 = vst [vmem:[%s983_s10 + $0xb0] sm:$0xff] %v539_v41  ;;  %v502_v49 = vmul.f32 %v969_v56, %v432_v47  ;;  %v526_v50 = vadd.f32 %v974_v58, %v487_v44 }
 0x10f   : > { %v542_v51 = vadd.f32 %v974_v58, %v503_v45  ;;  %v525_v52 = vadd.f32 %v974_v58, %v486_v48  ;;  %v748_v54 = vpop.f32.mrb[10].mxu0 }
 0x110   : > { %v541_v53 = vadd.f32 %v974_v58, %v502_v49  ;;  %v772_v55 = vpop.f32.mrb[10].mxu1  ;;  %558 = vst [vmem:[%s983_s10 + $0x48] sm:$0xff] %v526_v50  ;;  %v489_v57 = vmul.f32 %v748_v54, %v969_v56  ;;  %v362_v60 = vpop.f32.mrb[11].mxu0 }
 0x111   : > { %574 = vst [vmem:[%s983_s10 + $0xc8] sm:$0xff] %v542_v51  ;;  %v505_v59 = vmul.f32 %v772_v55, %v969_v56  ;;  %v442_v61 = vpop.f32.mrb[11].mxu1  ;;  %557 = vst [vmem:[%s983_s10 + $0x40] sm:$0xff] %v525_v52  ;;  %v488_v62 = vmul.f32 %v969_v56, %v362_v60 }
 0x112   : > { %573 = vst [vmem:[%s983_s10 + $0xc0] sm:$0xff] %v541_v53  ;;  %v504_v63 = vmul.f32 %v969_v56, %v442_v61  ;;  %v528_v0 = vadd.f32 %v974_v58, %v489_v57 }
 0x113   : > { %v544_v1 = vadd.f32 %v974_v58, %v505_v59  ;;  %v527_v2 = vadd.f32 %v974_v58, %v488_v62  ;;  %v751_v4 = vpop.f32.mrb[12].mxu0 }
 0x114   : > { %v543_v3 = vadd.f32 %v974_v58, %v504_v63  ;;  %v775_v5 = vpop.f32.mrb[12].mxu1  ;;  %560 = vst [vmem:[%s983_s10 + $0x58] sm:$0xff] %v528_v0  ;;  %v491_v6 = vmul.f32 %v751_v4, %v969_v56  ;;  %v372_v8 = vpop.f32.mrb[13].mxu0 }
 0x115   : > { %576 = vst [vmem:[%s983_s10 + $0xd8] sm:$0xff] %v544_v1  ;;  %v507_v7 = vmul.f32 %v775_v5, %v969_v56  ;;  %v452_v9 = vpop.f32.mrb[13].mxu1  ;;  %559 = vst [vmem:[%s983_s10 + $0x50] sm:$0xff] %v527_v2  ;;  %v490_v10 = vmul.f32 %v969_v56, %v372_v8 }
 0x116   : > { %575 = vst [vmem:[%s983_s10 + $0xd0] sm:$0xff] %v543_v3  ;;  %v506_v11 = vmul.f32 %v969_v56, %v452_v9  ;;  %v530_v12 = vadd.f32 %v974_v58, %v491_v6 }
 0x117   : > { %v546_v13 = vadd.f32 %v974_v58, %v507_v7  ;;  %v529_v14 = vadd.f32 %v974_v58, %v490_v10  ;;  %v754_v16 = vpop.f32.mrb[14].mxu0 }
 0x118   : > { %v545_v15 = vadd.f32 %v974_v58, %v506_v11  ;;  %v778_v17 = vpop.f32.mrb[14].mxu1  ;;  %562 = vst [vmem:[%s983_s10 + $0x68] sm:$0xff] %v530_v12  ;;  %v493_v18 = vmul.f32 %v754_v16, %v969_v56  ;;  %v382_v20 = vpop.f32.mrb[15].mxu0 }
 0x119   : > { %578 = vst [vmem:[%s983_s10 + $0xe8] sm:$0xff] %v546_v13  ;;  %v509_v19 = vmul.f32 %v778_v17, %v969_v56  ;;  %v462_v21 = vpop.f32.mrb[15].mxu1  ;;  %561 = vst [vmem:[%s983_s10 + $0x60] sm:$0xff] %v529_v14  ;;  %v492_v22 = vmul.f32 %v969_v56, %v382_v20 }
 0x11a   : > { %577 = vst [vmem:[%s983_s10 + $0xe0] sm:$0xff] %v545_v15  ;;  %v508_v23 = vmul.f32 %v969_v56, %v462_v21  ;;  %v532_v24 = vadd.f32 %v974_v58, %v493_v18 }
 0x11b   : > { %v548_v25 = vadd.f32 %v974_v58, %v509_v19  ;;  %v531_v26 = vadd.f32 %v974_v58, %v492_v22 }
 0x11c   : > { %v547_v27 = vadd.f32 %v974_v58, %v508_v23  ;;  %564 = vst [vmem:[%s983_s10 + $0x78] sm:$0xff] %v532_v24 }
 0x11d   : > { %580 = vst [vmem:[%s983_s10 + $0xf8] sm:$0xff] %v548_v25  ;;  %563 = vst [vmem:[%s983_s10 + $0x70] sm:$0xff] %v531_v26 }
 0x11e   : > { %579 = vst [vmem:[%s983_s10 + $0xf0] sm:$0xff] %v547_v27 }
 0x11f PF: > { %s14_s15 = sadd.s32 1, %s841_s15  }
 0x120   : > { %p11_p4 = scmp.ge.s32.totalorder %s14_s15, 4  }
 0x122   :  { %13 = sbr.rel (!%p11_p4) target bundleno = 1 (0x1), region = 66 }

// kernel: se_residual_block.3
= control target key start
LH: loop header
LB: loop body
LE: loop exit
PB: predicated region body
PF: predicated region fallthrough
CT: control target
= control target key end

     0   :  { %s2723_s15 = smov 0   ;;  %s4179_s0 = inlined_call_operand.vmem [shape: f32[2,18,18,128], index: 0, kind: input, shape index: {}]   ;;  %s4180_s1 = inlined_call_operand.vmem [shape: f32[1152,128], index: 1, kind: input, shape index: {}]   ;;  %s4181_s2 = inlined_call_operand.vmem [shape: f32[1,128], index: 2, kind: input, shape index: {}]   ;;  %s4182_s3 = inlined_call_operand.vmem [shape: f32[1,128], index: 3, kind: input, shape index: {}]   ;;  %s4183_s4 = inlined_call_operand.vmem [shape: f32[2,16,16,128], index: 4, kind: output, shape index: {}]  }
   0x1 LB: > { %s1954_s16 = sadd.s32 4294967295, %s2695_s15   ;;  %p1958_p0 = scmp.ge.s32.totalorder %s2695_s15, 1  ;;  %s2695_s15 = sphi %s2723_s15, %s14_s15  }
   0x2   : > { %p162_p1 = scmp.lt.s32.totalorder %s2695_s15, 3 }
   0x4   : > { %p163_p2 = pnand %p1958_p0, %p162_p1 }
   0x6   : > { %166 = sbr.rel (%p163_p2) target bundleno = 587 (0x24b), region = 36 }
   0xd   : > { %v488_v0 = vld [vmem:[%s4180_s1] sm:$0xff]  ;;  %v489_v1 = vld [vmem:[%s4180_s1 + $0x8] sm:$0xff]  ;;  %v4184_v3 = vmov 0.0|0.0   ;;  %v490_v6 = vld [vmem:[%s4180_s1 + $0x10] sm:$0xff]  ;;  %p188_p3 = scmp.lt.s32.totalorder %s1954_s16, 1 }
   0xe   : > { %v520_v2 = vld [vmem:[%s4180_s1 + $0x100] sm:$0xff]  ;;  %2287 = vmatprep.subr.bf16.mxu1 %v4184_v3  ;;  %2335 = vmatprep.subr.bf16.mxu0 %v4184_v3  ;;  %v2288_v4 = vpack.c.bf16 %v489_v1, %v488_v0  ;;  %v521_v5 = vld [vmem:[%s4180_s1 + $0x108] sm:$0xff]  ;;  %v491_v7 = vld [vmem:[%s4180_s1 + $0x18] sm:$0xff] }
   0xf   : > { %v2336_v8 = vpack.c.bf16 %v521_v5, %v520_v2  ;;  %v522_v9 = vld [vmem:[%s4180_s1 + $0x110] sm:$0xff]  ;;  %v523_v10 = vld [vmem:[%s4180_s1 + $0x118] sm:$0xff]  ;;  %v2291_v11 = vpack.c.bf16 %v491_v7, %v490_v6  ;;  %v492_v13 = vld [vmem:[%s4180_s1 + $0x20] sm:$0xff]  ;;  %s4327_s16 = smov (!%p188_p3, %s1954_s16), 1 }
  0x10   : > { %2289 = vmatpush1.bf16.msra.mxu1 %v2288_v4  ;;  %v2339_v12 = vpack.c.bf16 %v523_v10, %v522_v9  ;;  %v493_v14 = vld [vmem:[%s4180_s1 + $0x28] sm:$0xff]  ;;  %v524_v15 = vld [vmem:[%s4180_s1 + $0x120] sm:$0xff]  ;;  %v494_v19 = vld [vmem:[%s4180_s1 + $0x30] sm:$0xff]  ;;  %s2679_s7 = smul.u32 432, %s4327_s16  ;;  %s2158_s8 = sshll.u32 %s4327_s16, 8 }
  0x11   : > { %2337 = vmatpush1.bf16.msra.mxu0 %v2336_v8  ;;  %2290 = vmatprep.subr.bf16.mxu1 %v4184_v3  ;;  %v525_v16 = vld [vmem:[%s4180_s1 + $0x128] sm:$0xff]  ;;  %v2294_v17 = vpack.c.bf16 %v493_v14, %v492_v13  ;;  %v495_v20 = vld [vmem:[%s4180_s1 + $0x38] sm:$0xff]  ;;  %v526_v21 = vld [vmem:[%s4180_s1 + $0x130] sm:$0xff]  ;;  %s4032_s11 = scalar_lea.vmem %s4183_s4, %s2158_s8 }
  0x12   : > { %2338 = vmatprep.subr.bf16.mxu0 %v4184_v3  ;;  %v2342_v18 = vpack.c.bf16 %v525_v16, %v524_v15  ;;  %v527_v22 = vld [vmem:[%s4180_s1 + $0x138] sm:$0xff]  ;;  %v2297_v23 = vpack.c.bf16 %v495_v20, %v494_v19  ;;  %v496_v25 = vld [vmem:[%s4180_s1 + $0x40] sm:$0xff]  ;;  %v497_v26 = vld [vmem:[%s4180_s1 + $0x48] sm:$0xff]  ;;  %s2823_s20 = scalar_lea.vmem %s4179_s0, %s2679_s7 }
  0x13   : > { %v2345_v24 = vpack.c.bf16 %v527_v22, %v526_v21  ;;  %v528_v27 = vld [vmem:[%s4180_s1 + $0x140] sm:$0xff]  ;;  %v529_v28 = vld [vmem:[%s4180_s1 + $0x148] sm:$0xff]  ;;  %v2300_v29 = vpack.c.bf16 %v497_v26, %v496_v25  ;;  %v498_v31 = vld [vmem:[%s4180_s1 + $0x50] sm:$0xff] }
  0x14   : > { %2292 = vmatpush1.bf16.msra.mxu1 %v2291_v11  ;;  %v2348_v30 = vpack.c.bf16 %v529_v28, %v528_v27  ;;  %v499_v32 = vld [vmem:[%s4180_s1 + $0x58] sm:$0xff]  ;;  %v530_v33 = vld [vmem:[%s4180_s1 + $0x150] sm:$0xff]  ;;  %v500_v37 = vld [vmem:[%s4180_s1 + $0x60] sm:$0xff] }
  0x15   : > { %2340 = vmatpush1.bf16.msra.mxu0 %v2339_v12  ;;  %2293 = vmatprep.subr.bf16.mxu1 %v4184_v3  ;;  %v531_v34 = vld [vmem:[%s4180_s1 + $0x158] sm:$0xff]  ;;  %v2303_v35 = vpack.c.bf16 %v499_v32, %v498_v31  ;;  %v501_v38 = vld [vmem:[%s4180_s1 + $0x68] sm:$0xff]  ;;  %v532_v39 = vld [vmem:[%s4180_s1 + $0x160] sm:$0xff] }
  0x16   : > { %2341 = vmatprep.subr.bf16.mxu0 %v4184_v3  ;;  %v2351_v36 = vpack.c.bf16 %v531_v34, %v530_v33  ;;  %v533_v40 = vld [vmem:[%s4180_s1 + $0x168] sm:$0xff]  ;;  %v2841_v42 = vld [vmem:[%s2823_s20 + $0x18] sm:$0xff]  ;;  %v2306_v43 = vpack.c.bf16 %v501_v38, %v500_v37  ;;  %v502_v45 = vld [vmem:[%s4180_s1 + $0x70] sm:$0xff] }
  0x17   : > { %v230_v41 = vld [vmem:[%s2823_s20 + $0x1] sm:$0xff]  ;;  %921 = vmatprep.mubr.f32.mxu0 %v2841_v42  ;;  %v2354_v44 = vpack.c.bf16 %v533_v40, %v532_v39  ;;  %v503_v46 = vld [vmem:[%s4180_s1 + $0x78] sm:$0xff]  ;;  %v534_v47 = vld [vmem:[%s4180_s1 + $0x170] sm:$0xff] }
  0x18   : > { %2295 = vmatpush1.bf16.msra.mxu1 %v2294_v17  ;;  %696 = vmatprep.mubr.f32.mxu1 %v230_v41  ;;  %v535_v48 = vld [vmem:[%s4180_s1 + $0x178] sm:$0xff]  ;;  %v2309_v49 = vpack.c.bf16 %v503_v46, %v502_v45  ;;  %v504_v51 = vld [vmem:[%s4180_s1 + $0x80] sm:$0xff]  ;;  %v505_v52 = vld [vmem:[%s4180_s1 + $0x88] sm:$0xff] }
  0x19   : > { %2343 = vmatpush1.bf16.msra.mxu0 %v2342_v18  ;;  %2296 = vmatprep.subr.bf16.mxu1 %v4184_v3  ;;  %v2357_v50 = vpack.c.bf16 %v535_v48, %v534_v47  ;;  %v536_v53 = vld [vmem:[%s4180_s1 + $0x180] sm:$0xff]  ;;  %v537_v54 = vld [vmem:[%s4180_s1 + $0x188] sm:$0xff]  ;;  %v2312_v55 = vpack.c.bf16 %v505_v52, %v504_v51  ;;  %v506_v57 = vld [vmem:[%s4180_s1 + $0x90] sm:$0xff] }
  0x1a   : > { %2344 = vmatprep.subr.bf16.mxu0 %v4184_v3  ;;  %v2360_v56 = vpack.c.bf16 %v537_v54, %v536_v53  ;;  %v507_v58 = vld [vmem:[%s4180_s1 + $0x98] sm:$0xff]  ;;  %v538_v59 = vld [vmem:[%s4180_s1 + $0x190] sm:$0xff]  ;;  %v508_v63 = vld [vmem:[%s4180_s1 + $0xa0] sm:$0xff] }
  0x1b   : > { %v539_v60 = vld [vmem:[%s4180_s1 + $0x198] sm:$0xff]  ;;  %v2315_v61 = vpack.c.bf16 %v507_v58, %v506_v57  ;;  %v509_v0 = vld [vmem:[%s4180_s1 + $0xa8] sm:$0xff]  ;;  %v540_v1 = vld [vmem:[%s4180_s1 + $0x1a0] sm:$0xff] }
  0x1c   : > { %2298 = vmatpush1.bf16.msra.mxu1 %v2297_v23  ;;  %v2363_v62 = vpack.c.bf16 %v539_v60, %v538_v59  ;;  %v541_v2 = vld [vmem:[%s4180_s1 + $0x1a8] sm:$0xff]  ;;  %v2318_v4 = vpack.c.bf16 %v509_v0, %v508_v63  ;;  %v510_v6 = vld [vmem:[%s4180_s1 + $0xb0] sm:$0xff]  ;;  %v511_v7 = vld [vmem:[%s4180_s1 + $0xb8] sm:$0xff] }
  0x1d   : > { %2346 = vmatpush1.bf16.msra.mxu0 %v2345_v24  ;;  %2299 = vmatprep.subr.bf16.mxu1 %v4184_v3  ;;  %v2366_v5 = vpack.c.bf16 %v541_v2, %v540_v1  ;;  %v542_v8 = vld [vmem:[%s4180_s1 + $0x1b0] sm:$0xff]  ;;  %v543_v9 = vld [vmem:[%s4180_s1 + $0x1b8] sm:$0xff]  ;;  %v2321_v10 = vpack.c.bf16 %v511_v7, %v510_v6  ;;  %v512_v12 = vld [vmem:[%s4180_s1 + $0xc0] sm:$0xff] }
  0x1e   : > { %2347 = vmatprep.subr.bf16.mxu0 %v4184_v3  ;;  %v2369_v11 = vpack.c.bf16 %v543_v9, %v542_v8  ;;  %v513_v13 = vld [vmem:[%s4180_s1 + $0xc8] sm:$0xff]  ;;  %v544_v14 = vld [vmem:[%s4180_s1 + $0x1c0] sm:$0xff]  ;;  %v514_v18 = vld [vmem:[%s4180_s1 + $0xd0] sm:$0xff] }
  0x1f   : > { %v545_v15 = vld [vmem:[%s4180_s1 + $0x1c8] sm:$0xff]  ;;  %v2324_v16 = vpack.c.bf16 %v513_v13, %v512_v12  ;;  %v515_v19 = vld [vmem:[%s4180_s1 + $0xd8] sm:$0xff]  ;;  %v546_v20 = vld [vmem:[%s4180_s1 + $0x1d0] sm:$0xff] }
  0x20   : > { %2301 = vmatpush1.bf16.msra.mxu1 %v2300_v29  ;;  %v2372_v17 = vpack.c.bf16 %v545_v15, %v544_v14  ;;  %v547_v21 = vld [vmem:[%s4180_s1 + $0x1d8] sm:$0xff]  ;;  %v2327_v22 = vpack.c.bf16 %v515_v19, %v514_v18  ;;  %v516_v24 = vld [vmem:[%s4180_s1 + $0xe0] sm:$0xff]  ;;  %v517_v25 = vld [vmem:[%s4180_s1 + $0xe8] sm:$0xff] }
  0x21   : > { %2349 = vmatpush1.bf16.msra.mxu0 %v2348_v30  ;;  %2302 = vmatprep.subr.bf16.mxu1 %v4184_v3  ;;  %v2375_v23 = vpack.c.bf16 %v547_v21, %v546_v20  ;;  %v548_v26 = vld [vmem:[%s4180_s1 + $0x1e0] sm:$0xff]  ;;  %v549_v27 = vld [vmem:[%s4180_s1 + $0x1e8] sm:$0xff]  ;;  %v2330_v28 = vpack.c.bf16 %v517_v25, %v516_v24  ;;  %v518_v30 = vld [vmem:[%s4180_s1 + $0xf0] sm:$0xff] }
  0x22   : > { %2350 = vmatprep.subr.bf16.mxu0 %v4184_v3  ;;  %v2378_v29 = vpack.c.bf16 %v549_v27, %v548_v26  ;;  %v519_v31 = vld [vmem:[%s4180_s1 + $0xf8] sm:$0xff]  ;;  %v550_v32 = vld [vmem:[%s4180_s1 + $0x1f0] sm:$0xff]  ;;  %v585_v37 = vld [vmem:[%s4180_s1 + $0x308] sm:$0xff] }
  0x23   : > { %v551_v33 = vld [vmem:[%s4180_s1 + $0x1f8] sm:$0xff]  ;;  %v2333_v34 = vpack.c.bf16 %v519_v31, %v518_v30  ;;  %v552_v38 = vld [vmem:[%s4180_s1 + $0x200] sm:$0xff]  ;;  %v553_v39 = vld [vmem:[%s4180_s1 + $0x208] sm:$0xff] }
  0x24   : > { %2304 = vmatpush1.bf16.msra.mxu1 %v2303_v35  ;;  %v2381_v35 = vpack.c.bf16 %v551_v33, %v550_v32  ;;  %v198_v40 = vld [vmem:[%s2823_s20] sm:$0xff]  ;;  %v231_v45 = vld [vmem:[%s2823_s20 + $0x9] sm:$0xff]  ;;  %v555_v47 = vld [vmem:[%s4180_s1 + $0x218] sm:$0xff] }
  0x25   : > { %2352 = vmatpush1.bf16.msra.mxu0 %v2351_v36  ;;  %2305 = vmatprep.subr.bf16.mxu1 %v4184_v3  ;;  %v584_v36 = vld [vmem:[%s4180_s1 + $0x300] sm:$0xff]  ;;  %v554_v46 = vld [vmem:[%s4180_s1 + $0x210] sm:$0xff]  ;;  %v199_v51 = vld [vmem:[%s2823_s20 + $0x8] sm:$0xff] }
  0x26   : > { %2353 = vmatprep.subr.bf16.mxu0 %v4184_v3  ;;  %v2985_v41 = vpack.c.bf16 %v585_v37, %v584_v36  ;;  %v1963_v48 = vld [vmem:[%s2823_s20 + $0x20] sm:$0xff]  ;;  %v263_v52 = vld [vmem:[%s2823_s20 + $0xa] sm:$0xff]  ;;  %v2387_v54 = vpack.c.bf16 %v555_v47, %v554_v46  ;;  %v1965_v0 = vld [vmem:[%s2823_s20 + $0x38] sm:$0xff] }
  0x27   : > { %v3008_v53 = vld [vmem:[%s2823_s20 + $0x19] sm:$0xff]  ;;  %v557_v58 = vld [vmem:[%s4180_s1 + $0x228] sm:$0xff]  ;;  %v558_v2 = vld [vmem:[%s4180_s1 + $0x230] sm:$0xff] }
  0x28   : > { %2307 = vmatpush1.bf16.msra.mxu1 %v2306_v43  ;;  %v262_v43 = vld [vmem:[%s2823_s20 + $0x2] sm:$0xff]  ;;  %v591_v6 = vld [vmem:[%s4180_s1 + $0x338] sm:$0xff]  ;;  %v1967_v18 = vld [vmem:[%s2823_s20 + $0x50] sm:$0xff] }
  0x29   : > { %2355 = vmatpush1.bf16.msra.mxu0 %v2354_v44  ;;  %2308 = vmatprep.subr.bf16.mxu1 %v4184_v3  ;;  %v2384_v44 = vpack.c.bf16 %v553_v39, %v552_v38  ;;  %v556_v57 = vld [vmem:[%s4180_s1 + $0x220] sm:$0xff]  ;;  %v589_v60 = vld [vmem:[%s4180_s1 + $0x328] sm:$0xff]  ;;  %v3059_v8 = vld [vmem:[%s2823_s20 + $0x31] sm:$0xff] }
  0x2a   : > { %2356 = vmatprep.subr.bf16.mxu0 %v4184_v3  ;;  %v588_v59 = vld [vmem:[%s4180_s1 + $0x320] sm:$0xff]  ;;  %v2390_v63 = vpack.c.bf16 %v557_v58, %v556_v57  ;;  %v1966_v9 = vld [vmem:[%s2823_s20 + $0x48] sm:$0xff]  ;;  %v3082_v15 = vld [vmem:[%s2823_s20 + $0x32] sm:$0xff] }
  0x2b   : > { %v3037_v1 = vpack.c.bf16 %v589_v60, %v588_v59  ;;  %v3056_v7 = vld [vmem:[%s2823_s20 + $0x22] sm:$0xff]  ;;  %v562_v20 = vld [vmem:[%s4180_s1 + $0x250] sm:$0xff]  ;;  %v563_v21 = vld [vmem:[%s4180_s1 + $0x258] sm:$0xff] }
  0x2c   : > { %2310 = vmatpush1.bf16.msra.mxu1 %v2309_v49  ;;  %v586_v49 = vld [vmem:[%s4180_s1 + $0x310] sm:$0xff]  ;;  %v561_v12 = vld [vmem:[%s4180_s1 + $0x248] sm:$0xff]  ;;  %v592_v13 = vld [vmem:[%s4180_s1 + $0x340] sm:$0xff]  ;;  %v2399_v26 = vpack.c.bf16 %v563_v21, %v562_v20 }
  0x2d   : > { %2358 = vmatpush1.bf16.msra.mxu0 %v2357_v50  ;;  %2311 = vmatprep.subr.bf16.mxu1 %v4184_v3  ;;  %v587_v50 = vld [vmem:[%s4180_s1 + $0x318] sm:$0xff]  ;;  %v593_v14 = vld [vmem:[%s4180_s1 + $0x348] sm:$0xff]  ;;  %v1968_v27 = vld [vmem:[%s2823_s20 + $0x60] sm:$0xff] }
  0x2e   : > { %2359 = vmatprep.subr.bf16.mxu0 %v4184_v3  ;;  %v3090_v19 = vpack.c.bf16 %v593_v14, %v592_v13  ;;  %v3108_v24 = vld [vmem:[%s2823_s20 + $0x3a] sm:$0xff]  ;;  %v3111_v25 = vld [vmem:[%s2823_s20 + $0x49] sm:$0xff] }
  0x2f   : > { %v565_v30 = vld [vmem:[%s4180_s1 + $0x268] sm:$0xff]  ;;  %v596_v31 = vld [vmem:[%s4180_s1 + $0x360] sm:$0xff]  ;;  %v566_v38 = vld [vmem:[%s4180_s1 + $0x270] sm:$0xff] }
  0x30   : > { %2313 = vmatpush1.bf16.msra.mxu1 %v2312_v55  ;;  %v1964_v55 = vld [vmem:[%s2823_s20 + $0x30] sm:$0xff]  ;;  %v597_v32 = vld [vmem:[%s4180_s1 + $0x368] sm:$0xff]  ;;  %v567_v39 = vld [vmem:[%s4180_s1 + $0x278] sm:$0xff] }
  0x31   : > { %2361 = vmatpush1.bf16.msra.mxu0 %v2360_v56  ;;  %2314 = vmatprep.subr.bf16.mxu1 %v4184_v3  ;;  %v3012_v56 = vpack.c.bf16 %v587_v50, %v586_v49  ;;  %v3134_v33 = vld [vmem:[%s2823_s20 + $0x4a] sm:$0xff]  ;;  %v3142_v37 = vpack.c.bf16 %v597_v32, %v596_v31  ;;  %v2405_v46 = vpack.c.bf16 %v567_v39, %v566_v38  ;;  %v1970_v47 = vld [vmem:[%s2823_s20 + $0x78] sm:$0xff]  ;;  %v568_v49 = vld [vmem:[%s4180_s1 + $0x280] sm:$0xff] }
  0x32   : > { %2362 = vmatprep.subr.bf16.mxu0 %v4184_v3  ;;  %v1969_v36 = vld [vmem:[%s2823_s20 + $0x68] sm:$0xff]  ;;  %v1971_v58 = vld [vmem:[%s2823_s20 + $0x80] sm:$0xff]  ;;  %v570_v60 = vld [vmem:[%s4180_s1 + $0x290] sm:$0xff] }
  0x33   : > { %v569_v50 = vld [vmem:[%s4180_s1 + $0x288] sm:$0xff]  ;;  %v604_v13 = vld [vmem:[%s4180_s1 + $0x3a0] sm:$0xff]  ;;  %v3247_v21 = vld [vmem:[%s2823_s20 + $0x98] sm:$0xff] }
  0x34   : > { %2316 = vmatpush1.bf16.msra.mxu1 %v2315_v61  ;;  %v3029_v61 = vld [vmem:[%s2823_s20 + $0x1a] sm:$0xff]  ;;  %v2408_v57 = vpack.c.bf16 %v569_v50, %v568_v49  ;;  %v605_v14 = vld [vmem:[%s4180_s1 + $0x3a8] sm:$0xff]  ;;  %v3273_v31 = vld [vmem:[%s2823_s20 + $0x91] sm:$0xff] }
  0x35   : > { %2364 = vmatpush1.bf16.msra.mxu0 %v2363_v62  ;;  %2317 = vmatprep.subr.bf16.mxu1 %v4184_v3  ;;  %v3032_v62 = vld [vmem:[%s2823_s20 + $0x21] sm:$0xff]  ;;  %v3305_v50 = vld [vmem:[%s2823_s20 + $0xb0] sm:$0xff] }
  0x36   : > { %2365 = vmatprep.subr.bf16.mxu0 %v4184_v3  ;;  %v576_v38 = vld [vmem:[%s4180_s1 + $0x2c0] sm:$0xff]  ;;  %v577_v39 = vld [vmem:[%s4180_s1 + $0x2c8] sm:$0xff] }
  0x37   : > { %v2420_v49 = vpack.c.bf16 %v577_v39, %v576_v38  ;;  %v582_v38 = vld [vmem:[%s4180_s1 + $0x2f0] sm:$0xff]  ;;  %v583_v39 = vld [vmem:[%s4180_s1 + $0x2f8] sm:$0xff] }
  0x38   : > { %2319 = vmatpush1.bf16.msra.mxu1 %v2318_v4  ;;  %v559_v4 = vld [vmem:[%s4180_s1 + $0x238] sm:$0xff] }
  0x39   : > { %2367 = vmatpush1.bf16.msra.mxu0 %v2366_v5  ;;  %2320 = vmatprep.subr.bf16.mxu1 %v4184_v3  ;;  %v590_v5 = vld [vmem:[%s4180_s1 + $0x330] sm:$0xff] }
  0x3a   : > { %2368 = vmatprep.subr.bf16.mxu0 %v4184_v3 }
  0x3c   : > { %2322 = vmatpush1.bf16.msra.mxu1 %v2321_v10  ;;  %v3064_v10 = vpack.c.bf16 %v591_v6, %v590_v5  ;;  %v3215_v5 = vld [vmem:[%s2823_s20 + $0x79] sm:$0xff] }
  0x3d   : > { %2370 = vmatpush1.bf16.msra.mxu0 %v2369_v11  ;;  %2323 = vmatprep.subr.bf16.mxu1 %v4184_v3  ;;  %v560_v11 = vld [vmem:[%s4180_s1 + $0x240] sm:$0xff] }
  0x3e   : > { %2371 = vmatprep.subr.bf16.mxu0 %v4184_v3 }
  0x40   : > { %2325 = vmatpush1.bf16.msra.mxu1 %v2324_v16  ;;  %v3085_v16 = vld [vmem:[%s2823_s20 + $0x39] sm:$0xff] }
  0x41   : > { %2373 = vmatpush1.bf16.msra.mxu0 %v2372_v17  ;;  %2326 = vmatprep.subr.bf16.mxu1 %v4184_v3  ;;  %v2396_v17 = vpack.c.bf16 %v561_v12, %v560_v11  ;;  %v572_v11 = vld [vmem:[%s4180_s1 + $0x2a0] sm:$0xff]  ;;  %v573_v12 = vld [vmem:[%s4180_s1 + $0x2a8] sm:$0xff] }
  0x42   : > { %2374 = vmatprep.subr.bf16.mxu0 %v4184_v3  ;;  %v2414_v20 = vpack.c.bf16 %v573_v12, %v572_v11  ;;  %v580_v12 = vld [vmem:[%s4180_s1 + $0x2e0] sm:$0xff] }
  0x44   : > { %2328 = vmatpush1.bf16.msra.mxu1 %v2327_v22  ;;  %v594_v22 = vld [vmem:[%s4180_s1 + $0x350] sm:$0xff] }
  0x45   : > { %2376 = vmatpush1.bf16.msra.mxu0 %v2375_v23  ;;  %2329 = vmatprep.subr.bf16.mxu1 %v4184_v3  ;;  %v595_v23 = vld [vmem:[%s4180_s1 + $0x358] sm:$0xff] }
  0x46   : > { %2377 = vmatprep.subr.bf16.mxu0 %v4184_v3 }
  0x48   : > { %2331 = vmatpush1.bf16.msra.mxu1 %v2330_v28  ;;  %v3116_v28 = vpack.c.bf16 %v595_v23, %v594_v22  ;;  %v3251_v22 = vpack.c.bf16 %v605_v14, %v604_v13  ;;  %v574_v23 = vld [vmem:[%s4180_s1 + $0x2b0] sm:$0xff]  ;;  %v581_v13 = vld [vmem:[%s4180_s1 + $0x2e8] sm:$0xff]  ;;  %v612_v14 = vld [vmem:[%s4180_s1 + $0x3e0] sm:$0xff] }
  0x49   : > { %2379 = vmatpush1.bf16.msra.mxu0 %v2378_v29  ;;  %2332 = vmatprep.subr.bf16.mxu1 %v4184_v3  ;;  %v564_v29 = vld [vmem:[%s4180_s1 + $0x260] sm:$0xff] }
  0x4a   : > { %2380 = vmatprep.subr.bf16.mxu0 %v4184_v3  ;;  %4245 = vst [vmem:[#allocation2_spill] sm:$0xff] %v3251_v22 }
  0x4c   : > { %2334 = vmatpush1.bf16.msra.mxu1 %v2333_v34  ;;  %v3137_v34 = vld [vmem:[%s2823_s20 + $0x51] sm:$0xff] }
  0x4d   : > { %2382 = vmatpush1.bf16.msra.mxu0 %v2381_v35  ;;  %2511 = vmatprep.subr.bf16.mxu1 %v4184_v3  ;;  %v2402_v35 = vpack.c.bf16 %v565_v30, %v564_v29  ;;  %v607_v29 = vld [vmem:[%s4180_s1 + $0x3b8] sm:$0xff]  ;;  %v3270_v30 = vld [vmem:[%s2823_s20 + $0x82] sm:$0xff] }
  0x4e   : > { %2383 = vmatprep.subr.bf16.mxu0 %v4184_v3 }
  0x4f   : > { %697 = vmatmul.mubr.f32.vlgmr.msra.gmra.mrb[0].mxu1 %v198_v40  ;;  %v598_v40 = vld [vmem:[%s4180_s1 + $0x370] sm:$0xff] }
  0x50   : > { %922 = vmatmul.mubr.f32.vlgmr.msra.gmra.mrb[0].mxu0 %v262_v43  ;;  %2527 = vmatpush1.bf16.msra.mxu1 %v2985_v41  ;;  %v599_v43 = vld [vmem:[%s4180_s1 + $0x378] sm:$0xff] }
  0x51   : > { %2385 = vmatpush1.bf16.msra.mxu0 %v2384_v44  ;;  %701 = vmatprep.mubr.f32.mxu1 %v231_v45  ;;  %v3160_v44 = vld [vmem:[%s2823_s20 + $0x52] sm:$0xff]  ;;  %v3163_v45 = vld [vmem:[%s2823_s20 + $0x61] sm:$0xff] }
  0x52   : > { %926 = vmatprep.mubr.f32.mxu0 %v1963_v48  ;;  %2386 = vmatprep.subr.bf16.mxu0 %v4184_v3 }
  0x53   : > { %702 = vmatmul.mubr.f32.gmra.mrb[2].mxu1 %v199_v51  ;;  %2512 = vmatprep.subr.bf16.mxu1 %v4184_v3  ;;  %v600_v51 = vld [vmem:[%s4180_s1 + $0x380] sm:$0xff] }
  0x54   : > { %927 = vmatmul.mubr.f32.gmra.mrb[2].mxu0 %v263_v52  ;;  %706 = vmatprep.mubr.f32.mxu1 %v3008_v53  ;;  %v601_v52 = vld [vmem:[%s4180_s1 + $0x388] sm:$0xff] }
  0x55   : > { %931 = vmatprep.mubr.f32.mxu0 %v1964_v55  ;;  %2388 = vmatpush1.bf16.msra.mxu0 %v2387_v54  ;;  %v3186_v54 = vld [vmem:[%s2823_s20 + $0x62] sm:$0xff]  ;;  %v3194_v59 = vpack.c.bf16 %v601_v52, %v600_v51  ;;  %v578_v52 = vld [vmem:[%s4180_s1 + $0x2d0] sm:$0xff] }
  0x56   : > { %2528 = vmatpush1.bf16.msra.mxu1 %v3012_v56  ;;  %2389 = vmatprep.subr.bf16.mxu0 %v4184_v3 }
  0x57   : > { %707 = vmatmul.mubr.f32.gmra.mrb[4].mxu1 %v2841_v42  ;;  %2513 = vmatprep.subr.bf16.mxu1 %v4184_v3  ;;  %v2393_v42 = vpack.c.bf16 %v559_v4, %v558_v2  ;;  %v603_v2 = vld [vmem:[%s4180_s1 + $0x398] sm:$0xff]  ;;  %v3212_v4 = vld [vmem:[%s2823_s20 + $0x6a] sm:$0xff] }
  0x58   : > { %932 = vmatmul.mubr.f32.gmra.mrb[4].mxu0 %v3029_v61  ;;  %711 = vmatprep.mubr.f32.mxu1 %v3032_v62 }
  0x59   : > { %936 = vmatprep.mubr.f32.mxu0 %v1965_v0  ;;  %2391 = vmatpush1.bf16.msra.mxu0 %v2390_v63  ;;  %v571_v63 = vld [vmem:[%s4180_s1 + $0x298] sm:$0xff] }
  0x5a   : > { %2529 = vmatpush1.bf16.msra.mxu1 %v3037_v1  ;;  %2392 = vmatprep.subr.bf16.mxu0 %v4184_v3  ;;  %v2411_v6 = vpack.c.bf16 %v571_v63, %v570_v60  ;;  %v611_v60 = vld [vmem:[%s4180_s1 + $0x3d8] sm:$0xff] }
  0x5b   : > { %712 = vmatmul.mubr.f32.gmra.mrb[6].mxu1 %v1963_v48  ;;  %2514 = vmatprep.subr.bf16.mxu1 %v4184_v3  ;;  %v3168_v48 = vpack.c.bf16 %v599_v43, %v598_v40  ;;  %v608_v40 = vld [vmem:[%s4180_s1 + $0x3c0] sm:$0xff]  ;;  %v609_v43 = vld [vmem:[%s4180_s1 + $0x3c8] sm:$0xff] }
  0x5c   : > { %937 = vmatmul.mubr.f32.gmra.mrb[6].mxu0 %v3056_v7  ;;  %716 = vmatprep.mubr.f32.mxu1 %v3059_v8  ;;  %v3309_v51 = vpack.c.bf16 %v609_v43, %v608_v40  ;;  %v3329_v63 = vld [vmem:[%s2823_s20 + $0x9a] sm:$0xff]  ;;  %v614_v40 = vld [vmem:[%s4180_s1 + $0x3f0] sm:$0xff] }
  0x5d   : > { %941 = vmatprep.mubr.f32.mxu0 %v1966_v9  ;;  %2394 = vmatpush1.bf16.msra.mxu0 %v2393_v42  ;;  %v3218_v42 = vld [vmem:[%s2823_s20 + $0x90] sm:$0xff]  ;;  %4248 = vst [vmem:[#allocation5_spill] sm:$0xff] %v3329_v63  ;;  %v615_v43 = vld [vmem:[%s4180_s1 + $0x3f8] sm:$0xff] }
  0x5e   : > { %2530 = vmatpush1.bf16.msra.mxu1 %v3064_v10  ;;  %2395 = vmatprep.subr.bf16.mxu0 %v4184_v3  ;;  %4247 = vst [vmem:[#allocation4_spill] sm:$0xff] %v3309_v51 }
  0x5f   : > { %717 = vmatmul.mubr.f32.gmra.mrb[8].mxu1 %v1964_v55  ;;  %2515 = vmatprep.subr.bf16.mxu1 %v4184_v3  ;;  %v3189_v55 = vld [vmem:[%s2823_s20 + $0x69] sm:$0xff] }
  0x60   : > { %942 = vmatmul.mubr.f32.gmra.mrb[8].mxu0 %v3082_v15  ;;  %721 = vmatprep.mubr.f32.mxu1 %v3085_v16 }
  0x61   : > { %946 = vmatprep.mubr.f32.mxu0 %v1967_v18  ;;  %2397 = vmatpush1.bf16.msra.mxu0 %v2396_v17  ;;  %v3241_v17 = vld [vmem:[%s2823_s20 + $0x7a] sm:$0xff] }
  0x62   : > { %2531 = vmatpush1.bf16.msra.mxu1 %v3090_v19  ;;  %2398 = vmatprep.subr.bf16.mxu0 %v4184_v3 }
  0x63   : > { %722 = vmatmul.mubr.f32.gmra.mrb[10].mxu1 %v1965_v0  ;;  %2516 = vmatprep.subr.bf16.mxu1 %v4184_v3  ;;  %v602_v0 = vld [vmem:[%s4180_s1 + $0x390] sm:$0xff] }
  0x64   : > { %947 = vmatmul.mubr.f32.gmra.mrb[10].mxu0 %v3108_v24  ;;  %726 = vmatprep.mubr.f32.mxu1 %v3111_v25 }
  0x65   : > { %951 = vmatprep.mubr.f32.mxu0 %v1968_v27  ;;  %2400 = vmatpush1.bf16.msra.mxu0 %v2399_v26  ;;  %v575_v26 = vld [vmem:[%s4180_s1 + $0x2b8] sm:$0xff] }
  0x66   : > { %2532 = vmatpush1.bf16.msra.mxu1 %v3116_v28  ;;  %2401 = vmatprep.subr.bf16.mxu0 %v4184_v3  ;;  %v2417_v32 = vpack.c.bf16 %v575_v26, %v574_v23  ;;  %v3359_v23 = vld [vmem:[%s2823_s20 + $0xaa] sm:$0xff] }
  0x67   : > { %727 = vmatmul.mubr.f32.gmra.mrb[12].mxu1 %v1966_v9  ;;  %2517 = vmatprep.subr.bf16.mxu1 %v4184_v3  ;;  %v3222_v9 = vpack.c.bf16 %v603_v2, %v602_v0  ;;  %v3332_v0 = vld [vmem:[%s2823_s20 + $0xa9] sm:$0xff]  ;;  %4250 = vst [vmem:[#allocation7_spill] sm:$0xff] %v3359_v23  ;;  %v3362_v26 = vld [vmem:[%s2823_s20 + $0xb1] sm:$0xff] }
  0x68   : > { %952 = vmatmul.mubr.f32.gmra.mrb[12].mxu0 %v3134_v33  ;;  %731 = vmatprep.mubr.f32.mxu1 %v3137_v34 }
  0x69   : > { %956 = vmatprep.mubr.f32.mxu0 %v1969_v36  ;;  %2403 = vmatpush1.bf16.msra.mxu0 %v2402_v35  ;;  %v3276_v35 = vld [vmem:[%s2823_s20 + $0xa8] sm:$0xff] }
  0x6a   : > { %2533 = vmatpush1.bf16.msra.mxu1 %v3142_v37  ;;  %2404 = vmatprep.subr.bf16.mxu0 %v4184_v3 }
  0x6b   : > { %732 = vmatmul.mubr.f32.gmra.mrb[14].mxu1 %v1967_v18  ;;  %2518 = vmatprep.subr.bf16.mxu1 %v4184_v3  ;;  %v3244_v18 = vld [vmem:[%s2823_s20 + $0x81] sm:$0xff] }
  0x6c   : > { %957 = vmatmul.mubr.f32.gmra.mrb[14].mxu0 %v3160_v44  ;;  %736 = vmatprep.mubr.f32.mxu1 %v3163_v45 }
  0x6d   : > { %961 = vmatprep.mubr.f32.mxu0 %v1970_v47  ;;  %2406 = vmatpush1.bf16.msra.mxu0 %v2405_v46  ;;  %v3299_v46 = vld [vmem:[%s2823_s20 + $0x92] sm:$0xff] }
  0x6e   : > { %2534 = vmatpush1.bf16.msra.mxu1 %v3168_v48  ;;  %2407 = vmatprep.subr.bf16.mxu0 %v4184_v3 }
  0x6f   : > { %737 = vmatmul.mubr.f32.gmra.mrb[16].mxu1 %v1968_v27  ;;  %2519 = vmatprep.subr.bf16.mxu1 %v4184_v3  ;;  %v606_v27 = vld [vmem:[%s4180_s1 + $0x3b0] sm:$0xff] }
  0x70   : > { %962 = vmatmul.mubr.f32.gmra.mrb[16].mxu0 %v3186_v54  ;;  %741 = vmatprep.mubr.f32.mxu1 %v3189_v55 }
  0x71   : > { %966 = vmatprep.mubr.f32.mxu0 %v1971_v58  ;;  %2409 = vmatpush1.bf16.msra.mxu0 %v2408_v57  ;;  %v579_v57 = vld [vmem:[%s4180_s1 + $0x2d8] sm:$0xff] }
  0x72   : > { %2535 = vmatpush1.bf16.msra.mxu1 %v3194_v59  ;;  %2410 = vmatprep.subr.bf16.mxu0 %v4184_v3  ;;  %v2423_v2 = vpack.c.bf16 %v579_v57, %v578_v52  ;;  %v617_v52 = vld [vmem:[%s4180_s1 + $0x408] sm:$0xff]  ;;  %v3395_v57 = vld [vmem:[%s2823_s20 + $0xb2] sm:$0xff] }
  0x73   : > { %742 = vmatmul.mubr.f32.gmra.mrb[18].mxu1 %v1969_v36  ;;  %2520 = vmatprep.subr.bf16.mxu1 %v4184_v3  ;;  %v3280_v36 = vpack.c.bf16 %v607_v29, %v606_v27  ;;  %v2426_v27 = vpack.c.bf16 %v581_v13, %v580_v12  ;;  %v3365_v29 = vld [vmem:[%s2823_s20 + $0xc8] sm:$0xff]  ;;  %4252 = vst [vmem:[#allocation9_spill] sm:$0xff] %v3395_v57 }
  0x74   : > { %967 = vmatmul.mubr.f32.gmra.mrb[18].mxu0 %v3212_v4  ;;  %746 = vmatprep.mubr.f32.mxu1 %v3215_v5  ;;  %v3405_v12 = vpack.c.bf16 %v615_v43, %v614_v40  ;;  %v3437_v40 = vld [vmem:[%s2823_s20 + $0xf0] sm:$0xff]  ;;  %v3444_v43 = vld [vmem:[%s2823_s20 + $0xda] sm:$0xff] }
  0x75   : > { %971 = vmatprep.mubr.f32.mxu0 %v3218_v42  ;;  %2412 = vmatpush1.bf16.msra.mxu0 %v2411_v6  ;;  %4246 = vst [vmem:[#allocation3_spill] sm:$0xff] %v3280_v36  ;;  %v3335_v6 = vld [vmem:[%s2823_s20 + $0xc0] sm:$0xff]  ;;  %4256 = vst [vmem:[#allocation13_spill] sm:$0xff] %v3444_v43 }
  0x76   : > { %2536 = vmatpush1.bf16.msra.mxu1 %v3222_v9  ;;  %2413 = vmatprep.subr.bf16.mxu0 %v4184_v3  ;;  %4253 = vst [vmem:[#allocation10_spill] sm:$0xff] %v3405_v12 }
  0x77   : > { %747 = vmatmul.mubr.f32.gmra.mrb[20].mxu1 %v1970_v47  ;;  %2521 = vmatprep.subr.bf16.mxu1 %v4184_v3  ;;  %v3302_v47 = vld [vmem:[%s2823_s20 + $0x99] sm:$0xff] }
  0x78   : > { %972 = vmatmul.mubr.f32.gmra.mrb[20].mxu0 %v3241_v17  ;;  %751 = vmatprep.mubr.f32.mxu1 %v3244_v18 }
  0x79   : > { %976 = vmatprep.mubr.f32.mxu0 %v3247_v21  ;;  %2415 = vmatpush1.bf16.msra.mxu0 %v2414_v20  ;;  %v613_v20 = vld [vmem:[%s4180_s1 + $0x3e8] sm:$0xff] }
  0x7a   : > { %2537 = vmatpush1.bf16.msra.mxu1 %v3251_v22  ;;  %2416 = vmatprep.subr.bf16.mxu0 %v4184_v3  ;;  %v3525_v22 = vld [vmem:[%s2823_s20 + $0x129] sm:$0xff] }
  0x7b   : > { %752 = vmatmul.mubr.f32.gmra.mrb[22].mxu1 %v1971_v58  ;;  %2522 = vmatprep.subr.bf16.mxu1 %v4184_v3  ;;  %v610_v58 = vld [vmem:[%s4180_s1 + $0x3d0] sm:$0xff]  ;;  %4268 = vst [vmem:[#allocation25_spill] sm:$0xff] %v3525_v22 }
  0x7c   : > { %977 = vmatmul.mubr.f32.gmra.mrb[22].mxu0 %v3270_v30  ;;  %756 = vmatprep.mubr.f32.mxu1 %v3273_v31  ;;  %v3339_v11 = vpack.c.bf16 %v611_v60, %v610_v58  ;;  %v3398_v58 = vld [vmem:[%s2823_s20 + $0xc1] sm:$0xff]  ;;  %v2429_v60 = vpack.c.bf16 %v583_v39, %v582_v38  ;;  %v3431_v38 = vld [vmem:[%s2823_s20 + $0xca] sm:$0xff]  ;;  %v3434_v39 = vld [vmem:[%s2823_s20 + $0xd9] sm:$0xff] }
  0x7d   : > { %981 = vmatprep.mubr.f32.mxu0 %v3276_v35  ;;  %2418 = vmatpush1.bf16.msra.mxu0 %v2417_v32  ;;  %v3369_v32 = vpack.c.bf16 %v613_v20, %v612_v14  ;;  %v3415_v14 = vld [vmem:[%s2823_s20 + $0xc2] sm:$0xff]  ;;  %4255 = vst [vmem:[#allocation12_spill] sm:$0xff] %v3431_v38 }
  0x7e   : > { %2538 = vmatpush1.bf16.msra.mxu1 %v3280_v36  ;;  %2419 = vmatprep.subr.bf16.mxu0 %v4184_v3  ;;  %4249 = vst [vmem:[#allocation6_spill] sm:$0xff] %v3339_v11  ;;  %4254 = vst [vmem:[#allocation11_spill] sm:$0xff] %v3415_v14  ;;  %v3418_v20 = vld [vmem:[%s2823_s20 + $0xc9] sm:$0xff]  ;;  %v3512_v36 = vld [vmem:[%s2823_s20 + $0x121] sm:$0xff] }
  0x7f   : > { %757 = vmatmul.mubr.f32.gmra.mrb[24].mxu1 %v3218_v42  ;;  %2523 = vmatprep.subr.bf16.mxu1 %v4184_v3  ;;  %4251 = vst [vmem:[#allocation8_spill] sm:$0xff] %v3369_v32  ;;  %4265 = vst [vmem:[#allocation22_spill] sm:$0xff] %v3512_v36 }
  0x80   : > { %982 = vmatmul.mubr.f32.gmra.mrb[24].mxu0 %v3299_v46  ;;  %761 = vmatprep.mubr.f32.mxu1 %v3302_v47 }
  0x81   : > { %986 = vmatprep.mubr.f32.mxu0 %v3305_v50  ;;  %2421 = vmatpush1.bf16.msra.mxu0 %v2420_v49  ;;  %v616_v49 = vld [vmem:[%s4180_s1 + $0x400] sm:$0xff] }
  0x82   : > { %2539 = vmatpush1.bf16.msra.mxu1 %v3309_v51  ;;  %2422 = vmatprep.subr.bf16.mxu0 %v4184_v3  ;;  %v3409_v13 = vpack.c.bf16 %v617_v52, %v616_v49  ;;  %v3447_v49 = vld [vmem:[%s2823_s20 + $0xe1] sm:$0xff]  ;;  %v3450_v52 = vld [vmem:[%s2823_s20 + $0xf8] sm:$0xff] }
  0x83   : > { %762 = vmatmul.mubr.f32.gmra.mrb[26].mxu1 %v3247_v21  ;;  %2524 = vmatprep.subr.bf16.mxu1 %v4184_v3  ;;  %v3499_v51 = vld [vmem:[%s2823_s20 + $0x111] sm:$0xff] }
  0x84   : > { %987 = vmatmul.mubr.f32.gmra.mrb[26].mxu0 %v3329_v63  ;;  %766 = vmatprep.mubr.f32.mxu1 %v3332_v0  ;;  %v3528_v63 = vld [vmem:[%s2823_s20 + $0x140] sm:$0xff] }
  0x85   : > { %991 = vmatprep.mubr.f32.mxu0 %v3335_v6  ;;  %2424 = vmatpush1.bf16.msra.mxu0 %v2423_v2  ;;  %v3401_v2 = vld [vmem:[%s2823_s20 + $0xd8] sm:$0xff]  ;;  %4269 = vst [vmem:[#allocation26_spill] sm:$0xff] %v3528_v63 }
  0x86   : > { %2540 = vmatpush1.bf16.msra.mxu1 %v3339_v11  ;;  %2425 = vmatprep.subr.bf16.mxu0 %v4184_v3  ;;  %v3486_v11 = vld [vmem:[%s2823_s20 + $0x109] sm:$0xff] }
  0x87   : > { %767 = vmatmul.mubr.f32.gmra.mrb[28].mxu1 %v3276_v35  ;;  %2525 = vmatprep.subr.bf16.mxu1 %v4184_v3 }
  0x88   : > { %992 = vmatmul.mubr.f32.gmra.mrb[28].mxu0 %v3359_v23  ;;  %771 = vmatprep.mubr.f32.mxu1 %v3362_v26  ;;  %v3515_v23 = vld [vmem:[%s2823_s20 + $0x138] sm:$0xff] }
  0x89   : > { %996 = vmatprep.mubr.f32.mxu0 %v3365_v29  ;;  %2427 = vmatpush1.bf16.msra.mxu0 %v2426_v27  ;;  %v3421_v27 = vld [vmem:[%s2823_s20 + $0xe0] sm:$0xff]  ;;  %4266 = vst [vmem:[#allocation23_spill] sm:$0xff] %v3515_v23 }
  0x8a   : > { %2541 = vmatpush1.bf16.msra.mxu1 %v3369_v32  ;;  %2428 = vmatprep.subr.bf16.mxu0 %v4184_v3  ;;  %v3473_v32 = vld [vmem:[%s2823_s20 + $0xf9] sm:$0xff] }
  0x8b   : > { %772 = vmatmul.mubr.f32.gmra.mrb[30].mxu1 %v3305_v50  ;;  %2526 = vmatprep.subr.bf16.mxu1 %v4184_v3 }
  0x8c   : > { %997 = vmatmul.mubr.f32.gmra.mrb[30].mxu0 %v3395_v57  ;;  %776 = vmatprep.mubr.f32.mxu1 %v3398_v58  ;;  %v3502_v57 = vld [vmem:[%s2823_s20 + $0x128] sm:$0xff] }
  0x8d   : > { %1001 = vmatprep.mubr.f32.mxu0 %v3401_v2  ;;  %2430 = vmatpush1.bf16.msra.mxu0 %v2429_v60  ;;  %v3457_v60 = vld [vmem:[%s2823_s20 + $0xe2] sm:$0xff]  ;;  %4263 = vst [vmem:[#allocation20_spill] sm:$0xff] %v3502_v57 }
  0x8e   : > { %2542 = vmatpush1.bf16.msra.mxu1 %v3405_v12  ;;  %2431 = vmatprep.subr.bf16.mxu0 %v4184_v3  ;;  %4257 = vst [vmem:[#allocation14_spill] sm:$0xff] %v3457_v60  ;;  %v3460_v3 = vld [vmem:[%s2823_s20 + $0xf1] sm:$0xff]  ;;  %v3463_v12 = vld [vmem:[%s2823_s20 + $0x108] sm:$0xff] }
  0x8f   : > { %777 = vmatmul.mubr.f32.gmra.mrb[32].mxu1 %v3335_v6  ;;  %2480 = vmatprep.subr.bf16.mxu1 %v3409_v13 }
  0x90   : > { %1002 = vmatmul.mubr.f32.gmra.mrb[32].mxu0 %v3415_v14  ;;  %781 = vmatprep.mubr.f32.mxu1 %v3418_v20  ;;  %v3489_v14 = vld [vmem:[%s2823_s20 + $0x120] sm:$0xff] }
  0x91   : > { %1006 = vmatprep.mubr.f32.mxu0 %v3421_v27  ;;  %4261 = vst [vmem:[#allocation18_spill] sm:$0xff] %v3489_v14 }
  0x93   : > { %782 = vmatmul.mubr.f32.gmra.mrb[34].mxu1 %v3365_v29 }
  0x94   : > { %1007 = vmatmul.mubr.f32.gmra.mrb[34].mxu0 %v3431_v38  ;;  %786 = vmatprep.mubr.f32.mxu1 %v3434_v39  ;;  %v3476_v38 = vld [vmem:[%s2823_s20 + $0x110] sm:$0xff] }
  0x95   : > { %1011 = vmatprep.mubr.f32.mxu0 %v3437_v40  ;;  %4259 = vst [vmem:[#allocation16_spill] sm:$0xff] %v3476_v38 }
  0x97   : > { %787 = vmatmul.mubr.f32.gmra.mrb[36].mxu1 %v3401_v2 }
  0x98   : > { %1012 = vmatmul.mubr.f32.gmra.mrb[36].mxu0 %v3444_v43  ;;  %791 = vmatprep.mubr.f32.mxu1 %v3447_v49  ;;  %v3470_v43 = vld [vmem:[%s2823_s20 + $0xf2] sm:$0xff] }
  0x99   : > { %1016 = vmatprep.mubr.f32.mxu0 %v3450_v52  ;;  %4258 = vst [vmem:[#allocation15_spill] sm:$0xff] %v3470_v43 }
  0x9b   : > { %792 = vmatmul.mubr.f32.gmra.mrb[38].mxu1 %v3421_v27 }
  0x9c   : > { %1017 = vmatmul.mubr.f32.gmra.mrb[38].mxu0 %v3457_v60  ;;  %796 = vmatprep.mubr.f32.mxu1 %v3460_v3  ;;  %v3483_v60 = vld [vmem:[%s2823_s20 + $0xfa] sm:$0xff] }
  0x9d   : > { %1021 = vmatprep.mubr.f32.mxu0 %v3463_v12  ;;  %4260 = vst [vmem:[#allocation17_spill] sm:$0xff] %v3483_v60 }
  0x9f   : > { %797 = vmatmul.mubr.f32.gmra.mrb[40].mxu1 %v3437_v40 }
  0xa0   : > { %1022 = vmatmul.mubr.f32.gmra.mrb[40].mxu0 %v3470_v43  ;;  %801 = vmatprep.mubr.f32.mxu1 %v3473_v32  ;;  %v3496_v43 = vld [vmem:[%s2823_s20 + $0x10a] sm:$0xff] }
  0xa1   : > { %1026 = vmatprep.mubr.f32.mxu0 %v3476_v38  ;;  %4262 = vst [vmem:[#allocation19_spill] sm:$0xff] %v3496_v43 }
  0xa3   : > { %802 = vmatmul.mubr.f32.gmra.mrb[42].mxu1 %v3450_v52 }
  0xa4   : > { %1027 = vmatmul.mubr.f32.gmra.mrb[42].mxu0 %v3483_v60  ;;  %806 = vmatprep.mubr.f32.mxu1 %v3486_v11  ;;  %v3509_v60 = vld [vmem:[%s2823_s20 + $0x112] sm:$0xff] }
  0xa5   : > { %1031 = vmatprep.mubr.f32.mxu0 %v3489_v14  ;;  %4264 = vst [vmem:[#allocation21_spill] sm:$0xff] %v3509_v60 }
  0xa7   : > { %807 = vmatmul.mubr.f32.gmra.mrb[44].mxu1 %v3463_v12 }
  0xa8   : > { %1032 = vmatmul.mubr.f32.gmra.mrb[44].mxu0 %v3496_v43  ;;  %811 = vmatprep.mubr.f32.mxu1 %v3499_v51  ;;  %v3522_v43 = vld [vmem:[%s2823_s20 + $0x122] sm:$0xff] }
  0xa9   : > { %1036 = vmatprep.mubr.f32.mxu0 %v3502_v57  ;;  %4267 = vst [vmem:[#allocation24_spill] sm:$0xff] %v3522_v43 }
  0xab   : > { %812 = vmatmul.mubr.f32.gmra.mrb[46].mxu1 %v3476_v38  ;;  %v3541_v38 = vld [vmem:[%s2823_s20 + $0x150] sm:$0xff] }
  0xac   : > { %1037 = vmatmul.mubr.f32.gmra.mrb[46].mxu0 %v3509_v60  ;;  %816 = vmatprep.mubr.f32.mxu1 %v3512_v36  ;;  %v3535_v60 = vld [vmem:[%s2823_s20 + $0x12a] sm:$0xff]  ;;  %v3538_v36 = vld [vmem:[%s2823_s20 + $0x139] sm:$0xff]  ;;  %4272 = vst [vmem:[#allocation29_spill] sm:$0xff] %v3541_v38 }
  0xad   : > { %1041 = vmatprep.mubr.f32.mxu0 %v3515_v23  ;;  %4270 = vst [vmem:[#allocation27_spill] sm:$0xff] %v3535_v60  ;;  %4271 = vst [vmem:[#allocation28_spill] sm:$0xff] %v3538_v36 }
  0xaf   : > { %817 = vmatmul.mubr.f32.gmra.mrb[48].mxu1 %v3489_v14  ;;  %v3554_v14 = vld [vmem:[%s2823_s20 + $0x158] sm:$0xff] }
  0xb0   : > { %1042 = vmatmul.mubr.f32.gmra.mrb[48].mxu0 %v3522_v43  ;;  %821 = vmatprep.mubr.f32.mxu1 %v3525_v22  ;;  %v3548_v43 = vld [vmem:[%s2823_s20 + $0x13a] sm:$0xff]  ;;  %4275 = vst [vmem:[#allocation32_spill] sm:$0xff] %v3554_v14 }
  0xb1   : > { %1046 = vmatprep.mubr.f32.mxu0 %v3528_v63  ;;  %4273 = vst [vmem:[#allocation30_spill] sm:$0xff] %v3548_v43  ;;  %v3551_v22 = vld [vmem:[%s2823_s20 + $0x141] sm:$0xff] }
  0xb2   : > { %4274 = vst [vmem:[#allocation31_spill] sm:$0xff] %v3551_v22 }
  0xb3   : > { %822 = vmatmul.mubr.f32.gmra.mrb[50].mxu1 %v3502_v57  ;;  %v3567_v57 = vld [vmem:[%s2823_s20 + $0x168] sm:$0xff] }
  0xb4   : > { %1047 = vmatmul.mubr.f32.gmra.mrb[50].mxu0 %v3535_v60  ;;  %826 = vmatprep.mubr.f32.mxu1 %v3538_v36  ;;  %v3561_v60 = vld [vmem:[%s2823_s20 + $0x142] sm:$0xff]  ;;  %v3564_v36 = vld [vmem:[%s2823_s20 + $0x151] sm:$0xff] }
  0xb5   : > { %1051 = vmatprep.mubr.f32.mxu0 %v3541_v38  ;;  %4276 = vst [vmem:[#allocation33_spill] sm:$0xff] %v3561_v60  ;;  %4277 = vst [vmem:[#allocation34_spill] sm:$0xff] %v3564_v36 }
  0xb7   : > { %827 = vmatmul.mubr.f32.gmra.mrb[52].mxu1 %v3515_v23  ;;  %v3580_v23 = vld [vmem:[%s2823_s20 + $0x170] sm:$0xff] }
  0xb8   : > { %1052 = vmatmul.mubr.f32.gmra.mrb[52].mxu0 %v3548_v43  ;;  %831 = vmatprep.mubr.f32.mxu1 %v3551_v22  ;;  %v3574_v43 = vld [vmem:[%s2823_s20 + $0x152] sm:$0xff] }
  0xb9   : > { %1056 = vmatprep.mubr.f32.mxu0 %v3554_v14  ;;  %4278 = vst [vmem:[#allocation35_spill] sm:$0xff] %v3574_v43  ;;  %v3577_v22 = vld [vmem:[%s2823_s20 + $0x159] sm:$0xff] }
  0xba   : > { %4279 = vst [vmem:[#allocation36_spill] sm:$0xff] %v3577_v22 }
  0xbb   : > { %832 = vmatmul.mubr.f32.gmra.mrb[54].mxu1 %v3528_v63  ;;  %v3593_v63 = vld [vmem:[%s2823_s20 + $0x180] sm:$0xff] }
  0xbc   : > { %1057 = vmatmul.mubr.f32.gmra.mrb[54].mxu0 %v3561_v60  ;;  %836 = vmatprep.mubr.f32.mxu1 %v3564_v36  ;;  %v3587_v60 = vld [vmem:[%s2823_s20 + $0x15a] sm:$0xff]  ;;  %v3590_v36 = vld [vmem:[%s2823_s20 + $0x169] sm:$0xff]  ;;  %4281 = vst [vmem:[#allocation38_spill] sm:$0xff] %v3593_v63 }
  0xbd   : > { %1061 = vmatprep.mubr.f32.mxu0 %v3567_v57  ;;  %4280 = vst [vmem:[#allocation37_spill] sm:$0xff] %v3587_v60 }
  0xbf   : > { %837 = vmatmul.mubr.f32.gmra.mrb[56].mxu1 %v3541_v38  ;;  %v3606_v38 = vld [vmem:[%s2823_s20 + $0x188] sm:$0xff] }
  0xc0   : > { %1062 = vmatmul.mubr.f32.gmra.mrb[56].mxu0 %v3574_v43  ;;  %841 = vmatprep.mubr.f32.mxu1 %v3577_v22  ;;  %v3600_v43 = vld [vmem:[%s2823_s20 + $0x16a] sm:$0xff]  ;;  %4283 = vst [vmem:[#allocation40_spill] sm:$0xff] %v3606_v38 }
  0xc1   : > { %1066 = vmatprep.mubr.f32.mxu0 %v3580_v23  ;;  %4282 = vst [vmem:[#allocation39_spill] sm:$0xff] %v3600_v43  ;;  %v3603_v22 = vld [vmem:[%s2823_s20 + $0x171] sm:$0xff] }
  0xc3   : > { %842 = vmatmul.mubr.f32.gmra.mrb[58].mxu1 %v3554_v14  ;;  %v3613_v14 = vld [vmem:[%s2823_s20 + $0x172] sm:$0xff] }
  0xc4   : > { %1067 = vmatmul.mubr.f32.gmra.mrb[58].mxu0 %v3587_v60  ;;  %846 = vmatprep.mubr.f32.mxu1 %v3590_v36  ;;  %4284 = vst [vmem:[#allocation41_spill] sm:$0xff] %v3613_v14  ;;  %v618_v60 = vld [vmem:[%s4180_s1 + $0x410] sm:$0xff] }
  0xc5   : > { %1071 = vmatprep.mubr.f32.mxu0 %v3593_v63  ;;  %v621_v63 = vld [vmem:[%s4180_s1 + $0x428] sm:$0xff] }
  0xc7   : > { %847 = vmatmul.mubr.f32.gmra.mrb[60].mxu1 %v3567_v57 }
  0xc8   : > { %1072 = vmatmul.mubr.f32.gmra.mrb[60].mxu0 %v3600_v43  ;;  %851 = vmatprep.mubr.f32.mxu1 %v3603_v22  ;;  %v619_v43 = vld [vmem:[%s4180_s1 + $0x418] sm:$0xff] }
  0xc9   : > { %1076 = vmatprep.mubr.f32.mxu0 %v3606_v38  ;;  %v2483_v38 = vpack.c.bf16 %v619_v43, %v618_v60  ;;  %v4319_v60 = vld [vmem:[#allocation27_spill] sm:$0xff] }
  0xcb   : > { %852 = vmatmul.mubr.f32.gmra.mrb[62].mxu1 %v3580_v23 }
  0xcc   : > { %1077 = vmatmul.mubr.f32.gmra.mrb[62].mxu0 %v3613_v14  ;;  %1411 = vmatprep.mubr.f32.mxu1 %v3273_v31  ;;  %v620_v14 = vld [vmem:[%s4180_s1 + $0x420] sm:$0xff] }
  0xcd   : > { %1146 = vmatprep.mubr.f32.mxu0 %v3029_v61  ;;  %v4285_v61 = vmov 0.0|0.0  }
  0xcf   : > { %1412 = vmatmul.mubr.f32.vlgmr.msra.gmra.mrb[64].mxu1 %v3218_v42  ;;  %v622_v42 = vld [vmem:[%s4180_s1 + $0x430] sm:$0xff] }
  0xd0   : > { %1147 = vmatmul.mubr.f32.vlgmr.msra.gmra.mrb[0].mxu0 %v3008_v53  ;;  %2482 = vmatpush3.bf16.msra.mxu1 %v3409_v13  ;;  %v2487_v53 = vpack.c.bf16 %v621_v63, %v620_v14  ;;  %v4306_v63 = vld [vmem:[#allocation13_spill] sm:$0xff]  ;;  %v3770_v13 = vld [vmem:[%s2823_s20 + $0x181] sm:$0xff] }
  0xd1   : > { %2433 = vmatpush1.bf16.msra.mxu0 %v2985_v41  ;;  %1151 = vmatprep.mubr.f32.mxu0 %v3056_v7  ;;  %v623_v41 = vld [vmem:[%s4180_s1 + $0x438] sm:$0xff]  ;;  %v624_v7 = vld [vmem:[%s4180_s1 + $0x440] sm:$0xff]  ;;  %v4314_v14 = vld [vmem:[#allocation19_spill] sm:$0xff] }
  0xd2   : > { %1416 = vmatprep.mubr.f32.mxu1 %v3302_v47  ;;  %2434 = vmatprep.subr.bf16.mxu0 %v4285_v61 }
  0xd3   : > { %1417 = vmatmul.mubr.f32.gmra.mrb[66].mxu1 %v3247_v21  ;;  %2484 = vmatprep.subr.bf16.mxu1 %v2483_v38  ;;  %v4299_v21 = vld [vmem:[#allocation6_spill] sm:$0xff] }
  0xd4   : > { %1152 = vmatmul.mubr.f32.gmra.mrb[2].mxu0 %v3032_v62  ;;  %1421 = vmatprep.mubr.f32.mxu1 %v3332_v0  ;;  %v2491_v62 = vpack.c.bf16 %v623_v41, %v622_v42  ;;  %v2123_v42 = vld [vmem:[%s2823_s20 + $0x3a] sm:$0xff] }
  0xd5   : > { %1156 = vmatprep.mubr.f32.mxu0 %v3082_v15  ;;  %2436 = vmatpush1.bf16.msra.mxu0 %v3012_v56  ;;  %v625_v15 = vld [vmem:[%s4180_s1 + $0x448] sm:$0xff]  ;;  %v4320_v41 = vld [vmem:[#allocation30_spill] sm:$0xff] }
  0xd6   : > { %2486 = vmatpush3.bf16.msra.mxu1 %v2483_v38  ;;  %2437 = vmatprep.subr.bf16.mxu0 %v4285_v61  ;;  %v2495_v56 = vpack.c.bf16 %v625_v15, %v624_v7 }
  0xd7   : > { %1422 = vmatmul.mubr.f32.gmra.mrb[68].mxu1 %v3276_v35  ;;  %2488 = vmatprep.subr.bf16.mxu1 %v2487_v53  ;;  %v4302_v35 = vld [vmem:[#allocation12_spill] sm:$0xff] }
  0xd8   : > { %1157 = vmatmul.mubr.f32.gmra.mrb[4].mxu0 %v3059_v8  ;;  %1426 = vmatprep.mubr.f32.mxu1 %v3362_v26  ;;  %v626_v8 = vld [vmem:[%s4180_s1 + $0x450] sm:$0xff] }
  0xd9   : > { %1161 = vmatprep.mubr.f32.mxu0 %v3108_v24  ;;  %2439 = vmatpush1.bf16.msra.mxu0 %v3037_v1  ;;  %v627_v24 = vld [vmem:[%s4180_s1 + $0x458] sm:$0xff] }
  0xda   : > { %2440 = vmatprep.subr.bf16.mxu0 %v4285_v61  ;;  %2490 = vmatpush3.bf16.msra.mxu1 %v2487_v53  ;;  %v2499_v1 = vpack.c.bf16 %v627_v24, %v626_v8  ;;  %v4321_v8 = vld [vmem:[#allocation33_spill] sm:$0xff]  ;;  %v2126_v24 = vld [vmem:[%s2823_s20 + $0x62] sm:$0xff] }
  0xdb   : > { %1427 = vmatmul.mubr.f32.gmra.mrb[70].mxu1 %v3305_v50  ;;  %2492 = vmatprep.subr.bf16.mxu1 %v2491_v62  ;;  %v4305_v50 = vld [vmem:[#allocation34_spill] sm:$0xff] }
  0xdc   : > { %1162 = vmatmul.mubr.f32.gmra.mrb[6].mxu0 %v3085_v16  ;;  %1431 = vmatprep.mubr.f32.mxu1 %v3398_v58  ;;  %v628_v16 = vld [vmem:[%s4180_s1 + $0x460] sm:$0xff] }
  0xdd   : > { %1166 = vmatprep.mubr.f32.mxu0 %v3134_v33  ;;  %2442 = vmatpush1.bf16.msra.mxu0 %v3064_v10  ;;  %v629_v33 = vld [vmem:[%s4180_s1 + $0x468] sm:$0xff] }
  0xde   : > { %2443 = vmatprep.subr.bf16.mxu0 %v4285_v61  ;;  %2494 = vmatpush3.bf16.msra.mxu1 %v2491_v62  ;;  %v2503_v10 = vpack.c.bf16 %v629_v33, %v628_v16  ;;  %v2124_v62 = vld [vmem:[%s2823_s20 + $0x4a] sm:$0xff] }
  0xdf   : > { %1432 = vmatmul.mubr.f32.gmra.mrb[72].mxu1 %v3335_v6  ;;  %2496 = vmatprep.subr.bf16.mxu1 %v2495_v56  ;;  %v4308_v6 = vld [vmem:[#allocation29_spill] sm:$0xff]  ;;  %v2127_v33 = vld [vmem:[%s2823_s20 + $0x6a] sm:$0xff] }
  0xe0   : > { %1167 = vmatmul.mubr.f32.gmra.mrb[8].mxu0 %v3111_v25  ;;  %1436 = vmatprep.mubr.f32.mxu1 %v3418_v20  ;;  %v630_v25 = vld [vmem:[%s4180_s1 + $0x470] sm:$0xff] }
  0xe1   : > { %1171 = vmatprep.mubr.f32.mxu0 %v3160_v44  ;;  %2445 = vmatpush1.bf16.msra.mxu0 %v3090_v19  ;;  %v631_v44 = vld [vmem:[%s4180_s1 + $0x478] sm:$0xff] }
  0xe2   : > { %2446 = vmatprep.subr.bf16.mxu0 %v4285_v61  ;;  %2498 = vmatpush3.bf16.msra.mxu1 %v2495_v56  ;;  %v2507_v19 = vpack.c.bf16 %v631_v44, %v630_v25  ;;  %v2125_v56 = vld [vmem:[%s2823_s20 + $0x52] sm:$0xff]  ;;  %v2128_v25 = vld [vmem:[%s2823_s20 + $0x7a] sm:$0xff] }
  0xe3   : > { %1437 = vmatmul.mubr.f32.gmra.mrb[74].mxu1 %v3365_v29  ;;  %2500 = vmatprep.subr.bf16.mxu1 %v2499_v1  ;;  %v4310_v29 = vld [vmem:[#allocation14_spill] sm:$0xff] }
  0xe4   : > { %1172 = vmatmul.mubr.f32.gmra.mrb[10].mxu0 %v3137_v34  ;;  %1441 = vmatprep.mubr.f32.mxu1 %v3434_v39  ;;  %v4287_v34 = vld [vmem:[#allocation2_spill] sm:$0xff] }
  0xe5   : > { %1176 = vmatprep.mubr.f32.mxu0 %v3186_v54  ;;  %2448 = vmatpush1.bf16.msra.mxu0 %v3116_v28  ;;  %v4286_v28 = vld [vmem:[#allocation5_spill] sm:$0xff]  ;;  %v4291_v54 = vld [vmem:[#allocation3_spill] sm:$0xff] }
  0xe6   : > { %2449 = vmatprep.subr.bf16.mxu0 %v4285_v61  ;;  %2502 = vmatpush3.bf16.msra.mxu1 %v2499_v1 }
  0xe7   : > { %1442 = vmatmul.mubr.f32.gmra.mrb[76].mxu1 %v3401_v2  ;;  %2504 = vmatprep.subr.bf16.mxu1 %v2503_v10  ;;  %v4312_v2 = vld [vmem:[#allocation15_spill] sm:$0xff] }
  0xe8   : > { %1177 = vmatmul.mubr.f32.gmra.mrb[12].mxu0 %v3163_v45  ;;  %1446 = vmatprep.mubr.f32.mxu1 %v3447_v49  ;;  %v4289_v45 = vld [vmem:[#allocation22_spill] sm:$0xff] }
  0xe9   : > { %1181 = vmatprep.mubr.f32.mxu0 %v3212_v4  ;;  %2451 = vmatpush1.bf16.msra.mxu0 %v3142_v37  ;;  %v4288_v37 = vld [vmem:[#allocation16_spill] sm:$0xff]  ;;  %v4294_v4 = vld [vmem:[#allocation9_spill] sm:$0xff] }
  0xea   : > { %2452 = vmatprep.subr.bf16.mxu0 %v4285_v61  ;;  %2506 = vmatpush3.bf16.msra.mxu1 %v2503_v10  ;;  %v4322_v10 = vld [vmem:[#allocation35_spill] sm:$0xff] }
  0xeb   : > { %1447 = vmatmul.mubr.f32.gmra.mrb[78].mxu1 %v3421_v27  ;;  %2508 = vmatprep.subr.bf16.mxu1 %v2507_v19  ;;  %v2120_v27 = vld [vmem:[%s2823_s20 + $0x199] sm:$0xff] }
  0xec   : > { %1182 = vmatmul.mubr.f32.gmra.mrb[14].mxu0 %v3189_v55  ;;  %1451 = vmatprep.mubr.f32.mxu1 %v3460_v3  ;;  %v4292_v55 = vld [vmem:[#allocation18_spill] sm:$0xff] }
  0xed   : > { %1186 = vmatprep.mubr.f32.mxu0 %v3241_v17  ;;  %2454 = vmatpush1.bf16.msra.mxu0 %v3168_v48  ;;  %v4290_v48 = vld [vmem:[#allocation7_spill] sm:$0xff]  ;;  %v4297_v17 = vld [vmem:[#allocation28_spill] sm:$0xff] }
  0xee   : > { %2455 = vmatprep.subr.bf16.mxu0 %v4285_v61  ;;  %2510 = vmatpush3.bf16.msra.mxu1 %v2507_v19 }
  0xef   : > { %1452 = vmatmul.mubr.f32.gmra.mrb[80].mxu1 %v3437_v40  ;;  %v4318_v40 = vld [vmem:[#allocation24_spill] sm:$0xff] }
  0xf0   : > { %1187 = vmatmul.mubr.f32.gmra.mrb[16].mxu0 %v3215_v5  ;;  %1456 = vmatprep.mubr.f32.mxu1 %v3473_v32  ;;  %v4295_v5 = vld [vmem:[#allocation4_spill] sm:$0xff] }
  0xf1   : > { %1191 = vmatprep.mubr.f32.mxu0 %v3270_v30  ;;  %2457 = vmatpush1.bf16.msra.mxu0 %v3194_v59  ;;  %v4293_v59 = vld [vmem:[#allocation25_spill] sm:$0xff]  ;;  %v4300_v30 = vld [vmem:[#allocation23_spill] sm:$0xff] }
  0xf2   : > { %2458 = vmatprep.subr.bf16.mxu0 %v4285_v61 }
  0xf3   : > { %1457 = vmatmul.mubr.f32.gmra.mrb[82].mxu1 %v3450_v52  ;;  %v2089_v52 = vld [vmem:[%s2823_s20 + $0x1a0] sm:$0xff] }
  0xf4   : > { %1192 = vmatmul.mubr.f32.gmra.mrb[18].mxu0 %v3244_v18  ;;  %1461 = vmatprep.mubr.f32.mxu1 %v3486_v11  ;;  %v4298_v18 = vld [vmem:[#allocation11_spill] sm:$0xff] }
  0xf5   : > { %1196 = vmatprep.mubr.f32.mxu0 %v3299_v46  ;;  %2460 = vmatpush1.bf16.msra.mxu0 %v3222_v9  ;;  %v4296_v9 = vld [vmem:[#allocation20_spill] sm:$0xff] }
  0xf6   : > { %2461 = vmatprep.subr.bf16.mxu0 %v4285_v61  ;;  %v4303_v46 = vld [vmem:[#allocation8_spill] sm:$0xff] }
  0xf7   : > { %1462 = vmatmul.mubr.f32.gmra.mrb[84].mxu1 %v3463_v12  ;;  %v4313_v12 = vld [vmem:[#allocation17_spill] sm:$0xff] }
  0xf8   : > { %1197 = vmatmul.mubr.f32.gmra.mrb[20].mxu0 %v3273_v31  ;;  %1466 = vmatprep.mubr.f32.mxu1 %v3499_v51  ;;  %v4301_v31 = vld [vmem:[#allocation31_spill] sm:$0xff] }
  0xf9   : > { %1201 = vmatprep.mubr.f32.mxu0 %v4286_v28  ;;  %2463 = vmatpush1.bf16.msra.mxu0 %v4287_v34  ;;  %v2129_v28 = vld [vmem:[%s2823_s20 + $0x82] sm:$0xff]  ;;  %v4323_v34 = vld [vmem:[#allocation37_spill] sm:$0xff] }
  0xfa   : > { %2464 = vmatprep.subr.bf16.mxu0 %v4285_v61 }
  0xfb   : > { %1467 = vmatmul.mubr.f32.gmra.mrb[86].mxu1 %v4288_v37  ;;  %v2130_v37 = vld [vmem:[%s2823_s20 + $0x92] sm:$0xff] }
  0xfc   : > { %1202 = vmatmul.mubr.f32.gmra.mrb[22].mxu0 %v3302_v47  ;;  %1471 = vmatprep.mubr.f32.mxu1 %v4289_v45  ;;  %v4304_v47 = vld [vmem:[#allocation26_spill] sm:$0xff] }
  0xfd   : > { %1206 = vmatprep.mubr.f32.mxu0 %v4290_v48  ;;  %2466 = vmatpush1.bf16.msra.mxu0 %v4291_v54  ;;  %v2131_v54 = vld [vmem:[%s2823_s20 + $0x9a] sm:$0xff] }
  0xfe   : > { %2467 = vmatprep.subr.bf16.mxu0 %v4285_v61 }
  0xff   : > { %1472 = vmatmul.mubr.f32.gmra.mrb[88].mxu1 %v4292_v55  ;;  %v4324_v55 = vld [vmem:[#allocation39_spill] sm:$0xff] }
 0x100   : > { %1207 = vmatmul.mubr.f32.gmra.mrb[24].mxu0 %v3332_v0  ;;  %1476 = vmatprep.mubr.f32.mxu1 %v4293_v59  ;;  %v4307_v0 = vld [vmem:[#allocation10_spill] sm:$0xff] }
 0x101   : > { %1211 = vmatprep.mubr.f32.mxu0 %v4294_v4  ;;  %2469 = vmatpush1.bf16.msra.mxu0 %v4295_v5 }
 0x102   : > { %2470 = vmatprep.subr.bf16.mxu0 %v4285_v61 }
 0x103   : > { %1477 = vmatmul.mubr.f32.gmra.mrb[90].mxu1 %v4296_v9  ;;  %v2133_v9 = vld [vmem:[%s2823_s20 + $0xb2] sm:$0xff] }
 0x104   : > { %1212 = vmatmul.mubr.f32.gmra.mrb[26].mxu0 %v3362_v26  ;;  %1481 = vmatprep.mubr.f32.mxu1 %v4297_v17  ;;  %v4309_v26 = vld [vmem:[#allocation36_spill] sm:$0xff] }
 0x105   : > { %1216 = vmatprep.mubr.f32.mxu0 %v4298_v18  ;;  %2472 = vmatpush1.bf16.msra.mxu0 %v4299_v21  ;;  %v2134_v18 = vld [vmem:[%s2823_s20 + $0xc2] sm:$0xff] }
 0x106   : > { %2473 = vmatprep.subr.bf16.mxu0 %v4285_v61 }
 0x107   : > { %1482 = vmatmul.mubr.f32.gmra.mrb[92].mxu1 %v4300_v30  ;;  %v3836_v30 = vld [vmem:[%s2823_s20 + $0x182] sm:$0xff] }
 0x108   : > { %1217 = vmatmul.mubr.f32.gmra.mrb[28].mxu0 %v3398_v58  ;;  %1486 = vmatprep.mubr.f32.mxu1 %v4301_v31  ;;  %v4311_v58 = vld [vmem:[#allocation32_spill] sm:$0xff] }
 0x109   : > { %1221 = vmatprep.mubr.f32.mxu0 %v4302_v35  ;;  %2475 = vmatpush1.bf16.msra.mxu0 %v4303_v46  ;;  %v2135_v35 = vld [vmem:[%s2823_s20 + $0xca] sm:$0xff] }
 0x10a   : > { %2476 = vmatprep.subr.bf16.mxu0 %v4285_v61  ;;  %v2122_v61 = vld [vmem:[%s2823_s20 + $0x32] sm:$0xff] }
 0x10b   : > { %1487 = vmatmul.mubr.f32.gmra.mrb[94].mxu1 %v4304_v47  ;;  %v3845_v47 = vld [vmem:[%s2823_s20 + $0x18a] sm:$0xff] }
 0x10c   : > { %1222 = vmatmul.mubr.f32.gmra.mrb[30].mxu0 %v3418_v20  ;;  %1491 = vmatprep.mubr.f32.mxu1 %v4305_v50  ;;  %v3777_v20 = vld [vmem:[%s2823_s20 + $0x189] sm:$0xff] }
 0x10d   : > { %1226 = vmatprep.mubr.f32.mxu0 %v4306_v63  ;;  %2478 = vmatpush1.bf16.msra.mxu0 %v4307_v0  ;;  %v2090_v63 = vld [vmem:[%s2823_s20 + $0x31] sm:$0xff] }
 0x10f   : > { %1492 = vmatmul.mubr.f32.gmra.mrb[96].mxu1 %v4308_v6  ;;  %v2058_v6 = vld [vmem:[%s2823_s20 + $0x30] sm:$0xff] }
 0x110   : > { %1227 = vmatmul.mubr.f32.gmra.mrb[32].mxu0 %v3434_v39  ;;  %1496 = vmatprep.mubr.f32.mxu1 %v4309_v26  ;;  %v2088_v39 = vld [vmem:[%s2823_s20 + $0x198] sm:$0xff] }
 0x111   : > { %1231 = vmatprep.mubr.f32.mxu0 %v4310_v29 }
 0x113   : > { %1497 = vmatmul.mubr.f32.gmra.mrb[98].mxu1 %v4311_v58  ;;  %v2091_v58 = vld [vmem:[%s2823_s20 + $0x39] sm:$0xff] }
 0x114   : > { %1232 = vmatmul.mubr.f32.gmra.mrb[34].mxu0 %v3447_v49  ;;  %1501 = vmatprep.mubr.f32.mxu1 %v3590_v36 }
 0x115   : > { %1236 = vmatprep.mubr.f32.mxu0 %v4312_v2 }
 0x117   : > { %1502 = vmatmul.mubr.f32.gmra.mrb[100].mxu1 %v3567_v57  ;;  %v4315_v57 = vld [vmem:[#allocation38_spill] sm:$0xff] }
 0x118   : > { %1237 = vmatmul.mubr.f32.gmra.mrb[36].mxu0 %v3460_v3  ;;  %1506 = vmatprep.mubr.f32.mxu1 %v3603_v22  ;;  %v4316_v3 = vld [vmem:[#allocation21_spill] sm:$0xff] }
 0x119   : > { %1241 = vmatprep.mubr.f32.mxu0 %v4313_v12 }
 0x11b   : > { %1507 = vmatmul.mubr.f32.gmra.mrb[102].mxu1 %v3580_v23 }
 0x11c   : > { %1242 = vmatmul.mubr.f32.gmra.mrb[38].mxu0 %v3473_v32  ;;  %1511 = vmatprep.mubr.f32.mxu1 %v3770_v13  ;;  %v4317_v32 = vld [vmem:[#allocation40_spill] sm:$0xff] }
 0x11d   : > { %1246 = vmatprep.mubr.f32.mxu0 %v4314_v14 }
 0x11f   : > { %1512 = vmatmul.mubr.f32.gmra.mrb[104].mxu1 %v4315_v57 }
 0x120   : > { %1247 = vmatmul.mubr.f32.gmra.mrb[40].mxu0 %v3486_v11  ;;  %1516 = vmatprep.mubr.f32.mxu1 %v3777_v20  ;;  %v2121_v11 = vld [vmem:[%s2823_s20 + $0x1a1] sm:$0xff] }
 0x121   : > { %1251 = vmatprep.mubr.f32.mxu0 %v4316_v3 }
 0x122   : > { %v3784_v23 = vpop.f32.mrb[0].mxu1 }
 0x123   : > { %1517 = vmatmul.mubr.f32.gmra.mrb[106].mxu1 %v4317_v32  ;;  %v700_v38 = vpop.f32.mrb[1].mxu1  ;;  %v2093_v32 = vld [vmem:[%s2823_s20 + $0x51] sm:$0xff] }
 0x124   : > { %1252 = vmatmul.mubr.f32.gmra.mrb[42].mxu0 %v3499_v51  ;;  %1521 = vmatprep.mubr.f32.mxu1 %v2120_v27  ;;  %v2060_v27 = vld [vmem:[%s2823_s20 + $0x48] sm:$0xff]  ;;  %v2061_v38 = vld [vmem:[%s2823_s20 + $0x50] sm:$0xff] }
 0x125   : > { %1256 = vmatprep.mubr.f32.mxu0 %v4318_v40 }
 0x126   : > { %v3791_v43 = vpop.f32.mrb[2].mxu1 }
 0x127   : > { %1522 = vmatmul.mubr.f32.gmra.mrb[108].mxu1 %v2088_v39  ;;  %v705_v49 = vpop.f32.mrb[3].mxu1  ;;  %v2094_v39 = vld [vmem:[%s2823_s20 + $0x61] sm:$0xff] }
 0x128   : > { %1257 = vmatmul.mubr.f32.gmra.mrb[44].mxu0 %v4289_v45  ;;  %1526 = vmatprep.mubr.f32.mxu1 %v2121_v11  ;;  %v2062_v11 = vld [vmem:[%s2823_s20 + $0x60] sm:$0xff] }
 0x129   : > { %1261 = vmatprep.mubr.f32.mxu0 %v4319_v60 }
 0x12a   : > { %v3797_v51 = vpop.f32.mrb[4].mxu1 }
 0x12b   : > { %1527 = vmatmul.mubr.f32.gmra.mrb[110].mxu1 %v2089_v52  ;;  %v710_v53 = vpop.f32.mrb[5].mxu1  ;;  %v2095_v52 = vld [vmem:[%s2823_s20 + $0x69] sm:$0xff] }
 0x12c   : > { %1262 = vmatmul.mubr.f32.gmra.mrb[46].mxu0 %v4293_v59  ;;  %2239 = vmatprep.mubr.f32.mxu1 %v2122_v61  ;;  %v2132_v59 = vld [vmem:[%s2823_s20 + $0xaa] sm:$0xff] }
 0x12d   : > { %1266 = vmatprep.mubr.f32.mxu0 %v4320_v41  ;;  %v2063_v61 = vld [vmem:[%s2823_s20 + $0x68] sm:$0xff] }
 0x12e   : > { %v3803_v7 = vpop.f32.mrb[6].mxu1 }
 0x12f   : > { %2240 = vmatmul.mubr.f32.vlgmr.msra.gmra.mrb[112].mxu1 %v2123_v42  ;;  %v715_v15 = vpop.f32.mrb[7].mxu1  ;;  %v2096_v42 = vld [vmem:[%s2823_s20 + $0x79] sm:$0xff] }
 0x130   : > { %1267 = vmatmul.mubr.f32.gmra.mrb[48].mxu0 %v4297_v17  ;;  %2242 = vmatprep.mubr.f32.mxu1 %v2124_v62  ;;  %v4325_v17 = vld [vmem:[#allocation41_spill] sm:$0xff] }
 0x131   : > { %1271 = vmatprep.mubr.f32.mxu0 %v4321_v8  ;;  %v2064_v62 = vld [vmem:[%s2823_s20 + $0x78] sm:$0xff] }
 0x132   : > { %v3809_v1 = vpop.f32.mrb[8].mxu1  ;;  %v2152_v15 = vld [vmem:[%s2823_s20 + $0x19a] sm:$0xff] }
 0x133   : > { %2243 = vmatmul.mubr.f32.gmra.mrb[114].mxu1 %v2125_v56  ;;  %v720_v16 = vpop.f32.mrb[9].mxu1 }
 0x134   : > { %1272 = vmatmul.mubr.f32.gmra.mrb[50].mxu0 %v4301_v31  ;;  %2245 = vmatprep.mubr.f32.mxu1 %v2126_v24  ;;  %v2153_v16 = vld [vmem:[%s2823_s20 + $0x1a2] sm:$0xff] }
 0x135   : > { %1276 = vmatprep.mubr.f32.mxu0 %v4322_v10 }
 0x136   : > { %v3815_v44 = vpop.f32.mrb[10].mxu1 }
 0x137   : > { %2246 = vmatmul.mubr.f32.gmra.mrb[116].mxu1 %v2127_v33  ;;  %v725_v19 = vpop.f32.mrb[11].mxu1  ;;  %v2065_v33 = vld [vmem:[%s2823_s20 + $0x80] sm:$0xff] }
 0x138   : > { %1277 = vmatmul.mubr.f32.gmra.mrb[52].mxu0 %v4305_v50  ;;  %2248 = vmatprep.mubr.f32.mxu1 %v2128_v25 }
 0x139   : > { %1281 = vmatprep.mubr.f32.mxu0 %v4323_v34 }
 0x13a   : > { %v3821_v45 = vpop.f32.mrb[12].mxu1 }
 0x13b   : > { %2249 = vmatmul.mubr.f32.gmra.mrb[118].mxu1 %v2129_v28  ;;  %v730_v48 = vpop.f32.mrb[13].mxu1 }
 0x13c   : > { %1282 = vmatmul.mubr.f32.gmra.mrb[54].mxu0 %v4309_v26  ;;  %2251 = vmatprep.mubr.f32.mxu1 %v2130_v37 }
 0x13d   : > { %1286 = vmatprep.mubr.f32.mxu0 %v4324_v55 }
 0x13e   : > { %v3827_v4 = vpop.f32.mrb[14].mxu1 }
 0x13f   : > { %2252 = vmatmul.mubr.f32.gmra.mrb[120].mxu1 %v2131_v54  ;;  %v735_v5 = vpop.f32.mrb[15].mxu1 }
 0x140   : > { %1287 = vmatmul.mubr.f32.gmra.mrb[56].mxu0 %v3590_v36  ;;  %2254 = vmatprep.mubr.f32.mxu1 %v2132_v59  ;;  %v2136_v36 = vld [vmem:[%s2823_s20 + $0xda] sm:$0xff] }
 0x141   : > { %1291 = vmatprep.mubr.f32.mxu0 %v4325_v17 }
 0x142   : > { %v3833_v21 = vpop.f32.mrb[16].mxu1 }
 0x143   : > { %2255 = vmatmul.mubr.f32.gmra.mrb[122].mxu1 %v2133_v9  ;;  %v740_v31 = vpop.f32.mrb[17].mxu1 }
 0x144   : > { %1292 = vmatmul.mubr.f32.gmra.mrb[58].mxu0 %v3603_v22  ;;  %2257 = vmatprep.mubr.f32.mxu1 %v2134_v18 }
 0x145   : > { %1296 = vmatprep.mubr.f32.mxu0 %v3836_v30 }
 0x146   : > { %v3842_v46 = vpop.f32.mrb[18].mxu1 }
 0x147   : > { %2258 = vmatmul.mubr.f32.gmra.mrb[124].mxu1 %v2135_v35  ;;  %v745_v50 = vpop.f32.mrb[19].mxu1 }
 0x148   : > { %1297 = vmatmul.mubr.f32.gmra.mrb[60].mxu0 %v3770_v13  ;;  %2260 = vmatprep.mubr.f32.mxu1 %v2136_v36 }
 0x149   : > { %1301 = vmatprep.mubr.f32.mxu0 %v3845_v47 }
 0x14a   : > { %v3849_v22 = vpop.f32.mrb[20].mxu1 }
 0x14b   : > { %2261 = vmatmul.mubr.f32.gmra.mrb[126].mxu1 %v4310_v29  ;;  %v750_v0 = vpop.f32.mrb[21].mxu1  ;;  %v2059_v29 = vld [vmem:[%s2823_s20 + $0x38] sm:$0xff] }
 0x14c   : > { %1302 = vmatmul.mubr.f32.gmra.mrb[62].mxu0 %v3777_v20  ;;  %2263 = vmatprep.mubr.f32.mxu1 %v4312_v2  ;;  %v2092_v20 = vld [vmem:[%s2823_s20 + $0x49] sm:$0xff] }
 0x14d   : > { %1371 = vmatprep.mubr.f32.mxu0 %v2090_v63 }
 0x14e   : > { %v3856_v26 = vpop.f32.mrb[22].mxu1 }
 0x14f   : > { %2264 = vmatmul.mubr.f32.gmra.mrb[128].mxu1 %v4313_v12  ;;  %v755_v13 = vpop.f32.mrb[23].mxu1 }
 0x150   : > { %1372 = vmatmul.mubr.f32.vlgmr.msra.gmra.mrb[0].mxu0 %v2058_v6  ;;  %2266 = vmatprep.mubr.f32.mxu1 %v4314_v14 }
 0x151   : > { %1376 = vmatprep.mubr.f32.mxu0 %v2091_v58 }
 0x152   : > { %v3862_v57 = vpop.f32.mrb[24].mxu1 }
 0x153   : > { %2267 = vmatmul.mubr.f32.gmra.mrb[130].mxu1 %v4316_v3  ;;  %v760_v2 = vpop.f32.mrb[25].mxu1 }
 0x154   : > { %1377 = vmatmul.mubr.f32.gmra.mrb[2].mxu0 %v2059_v29  ;;  %2269 = vmatprep.mubr.f32.mxu1 %v4318_v40 }
 0x155   : > { %1381 = vmatprep.mubr.f32.mxu0 %v2092_v20 }
 0x156   : > { %v3868_v12 = vpop.f32.mrb[26].mxu1 }
 0x157   : > { %2270 = vmatmul.mubr.f32.gmra.mrb[132].mxu1 %v4319_v60  ;;  %v765_v14 = vpop.f32.mrb[27].mxu1 }
 0x158   : > { %1382 = vmatmul.mubr.f32.gmra.mrb[4].mxu0 %v2060_v27  ;;  %2272 = vmatprep.mubr.f32.mxu1 %v4320_v41 }
 0x159   : > { %1386 = vmatprep.mubr.f32.mxu0 %v2093_v32 }
 0x15a   : > { %v3874_v3 = vpop.f32.mrb[28].mxu1 }
 0x15b   : > { %2273 = vmatmul.mubr.f32.gmra.mrb[134].mxu1 %v4321_v8  ;;  %v770_v40 = vpop.f32.mrb[29].mxu1  ;;  %v2097_v8 = vld [vmem:[%s2823_s20 + $0x81] sm:$0xff] }
 0x15c   : > { %1387 = vmatmul.mubr.f32.gmra.mrb[6].mxu0 %v2061_v38  ;;  %2275 = vmatprep.mubr.f32.mxu1 %v4322_v10 }
 0x15d   : > { %1391 = vmatprep.mubr.f32.mxu0 %v2094_v39 }
 0x15e   : > { %v3880_v49 = vpop.f32.mrb[30].mxu1 }
 0x15f   : > { %2276 = vmatmul.mubr.f32.gmra.mrb[136].mxu1 %v4323_v34  ;;  %v775_v60 = vpop.f32.mrb[31].mxu1 }
 0x160   : > { %1392 = vmatmul.mubr.f32.gmra.mrb[8].mxu0 %v2062_v11  ;;  %2278 = vmatprep.mubr.f32.mxu1 %v4324_v55 }
 0x161   : > { %1396 = vmatprep.mubr.f32.mxu0 %v2095_v52 }
 0x162   : > { %v3886_v53 = vpop.f32.mrb[32].mxu1 }
 0x163   : > { %2279 = vmatmul.mubr.f32.gmra.mrb[138].mxu1 %v4325_v17  ;;  %v780_v41 = vpop.f32.mrb[33].mxu1 }
 0x164   : > { %1397 = vmatmul.mubr.f32.gmra.mrb[10].mxu0 %v2063_v61  ;;  %2281 = vmatprep.mubr.f32.mxu1 %v3836_v30 }
 0x165   : > { %1401 = vmatprep.mubr.f32.mxu0 %v2096_v42 }
 0x166   : > { %v3893_v56 = vpop.f32.mrb[34].mxu1 }
 0x167   : > { %2282 = vmatmul.mubr.f32.gmra.mrb[140].mxu1 %v3845_v47  ;;  %v785_v24 = vpop.f32.mrb[35].mxu1 }
 0x168   : > { %1402 = vmatmul.mubr.f32.gmra.mrb[12].mxu0 %v2064_v62  ;;  %2284 = vmatprep.mubr.f32.mxu1 %v2152_v15 }
 0x169   : > { %1406 = vmatprep.mubr.f32.mxu0 %v2097_v8 }
 0x16a   : > { %v3899_v10 = vpop.f32.mrb[36].mxu1 }
 0x16b   : > { %2285 = vmatmul.mubr.f32.gmra.mrb[142].mxu1 %v2153_v16  ;;  %v790_v25 = vpop.f32.mrb[37].mxu1 }
 0x16c   : > { %1407 = vmatmul.mubr.f32.gmra.mrb[14].mxu0 %v2065_v33 }
 0x16e   : > { %v3901_v19 = vpop.f32.mrb[38].mxu1 }
 0x16f   : > { %v795_v28 = vpop.f32.mrb[39].mxu1 }
 0x172   : > { %v3903_v34 = vpop.f32.mrb[40].mxu1 }
 0x173   : > { %v800_v37 = vpop.f32.mrb[41].mxu1 }
 0x176   : > { %v3905_v48 = vpop.f32.mrb[42].mxu1 }
 0x177   : > { %v805_v54 = vpop.f32.mrb[43].mxu1 }
 0x17a   : > { %v3907_v55 = vpop.f32.mrb[44].mxu1 }
 0x17b   : > { %v810_v59 = vpop.f32.mrb[45].mxu1 }
 0x17e   : > { %v3909_v5 = vpop.f32.mrb[46].mxu1 }
 0x17f   : > { %v815_v9 = vpop.f32.mrb[47].mxu1 }
 0x182   : > { %v3911_v17 = vpop.f32.mrb[48].mxu1 }
 0x183   : > { %v820_v18 = vpop.f32.mrb[49].mxu1 }
 0x186   : > { %v3913_v30 = vpop.f32.mrb[50].mxu1 }
 0x187   : > { %v825_v31 = vpop.f32.mrb[51].mxu1 }
 0x18a   : > { %v3915_v35 = vpop.f32.mrb[52].mxu1 }
 0x18b   : > { %v830_v36 = vpop.f32.mrb[53].mxu1 }
 0x18e   : > { %v3917_v47 = vpop.f32.mrb[54].mxu1 }
 0x18f   : > { %v835_v50 = vpop.f32.mrb[55].mxu1 }
 0x192   : > { %v3919_v63 = vpop.f32.mrb[56].mxu1 }
 0x193   : > { %v840_v0 = vpop.f32.mrb[57].mxu1 }
 0x196   : > { %v3921_v6 = vpop.f32.mrb[58].mxu1 }
 0x197   : > { %v845_v58 = vpop.f32.mrb[59].mxu1 }
 0x19a   : > { %v3923_v13 = vpop.f32.mrb[60].mxu1 }
 0x19b   : > { %v850_v29 = vpop.f32.mrb[61].mxu1 }
 0x19e   : > { %v3925_v20 = vpop.f32.mrb[62].mxu1 }
 0x19f   : > { %v855_v2 = vpop.f32.mrb[63].mxu1 }
 0x1a2   : > { %v1413_v27 = vpop.f32.mrb[64].mxu1 }
 0x1a3   : > { %v1415_v32 = vpop.f32.mrb[65].mxu1 }
 0x1a6   : > { %v1418_v14 = vpop.f32.mrb[66].mxu1 }
 0x1a7   : > { %v1420_v38 = vpop.f32.mrb[67].mxu1 }
 0x1aa   : > { %v1423_v39 = vpop.f32.mrb[68].mxu1 }
 0x1ab   : > { %v1425_v40 = vpop.f32.mrb[69].mxu1 }
 0x1ae   : > { %v1428_v11 = vpop.f32.mrb[70].mxu1 }
 0x1af   : > { %v1430_v52 = vpop.f32.mrb[71].mxu1 }
 0x1b2   : > { %v1433_v60 = vpop.f32.mrb[72].mxu1 }
 0x1b3   : > { %v1435_v61 = vpop.f32.mrb[73].mxu1 }
 0x1b6   : > { %v1438_v42 = vpop.f32.mrb[74].mxu1 }
 0x1b7   : > { %v1440_v41 = vpop.f32.mrb[75].mxu1 }
 0x1ba   : > { %v1443_v62 = vpop.f32.mrb[76].mxu1 }
 0x1bb   : > { %v1445_v15 = vpop.f32.mrb[77].mxu1 }
 0x1be   : > { %v1448_v8 = vpop.f32.mrb[78].mxu1 }
 0x1bf   : > { %v1450_v24 = vpop.f32.mrb[79].mxu1 }
 0x1c2   : > { %v1453_v16 = vpop.f32.mrb[80].mxu1 }
 0x1c3   : > { %v1188_v33 = vpop.f32.mrb[16].mxu0  ;;  %v1455_v25 = vpop.f32.mrb[81].mxu1 }
 0x1c4   : > { %v2551_v28 = vadd.f32 %v1188_v33, %v3833_v21  ;;  %v1190_v37 = vpop.f32.mrb[17].mxu0 }
 0x1c6   : > { %v1458_v54 = vpop.f32.mrb[82].mxu1  ;;  %v3928_v59 = vadd.f32 %v2551_v28, %v1413_v27 }
 0x1c7   : > { %v1193_v9 = vpop.f32.mrb[18].mxu0  ;;  %v1460_v18 = vpop.f32.mrb[83].mxu1 }
 0x1c8   : > { %v2553_v31 = vadd.f32 %v1193_v9, %v3842_v46  ;;  %v1195_v36 = vpop.f32.mrb[19].mxu0 }
 0x1ca   : > { %v1463_v50 = vpop.f32.mrb[84].mxu1  ;;  %v3931_v0 = vadd.f32 %v2553_v31, %v1418_v14 }
 0x1cb   : > { %v1198_v58 = vpop.f32.mrb[20].mxu0  ;;  %v1465_v29 = vpop.f32.mrb[85].mxu1 }
 0x1cc   : > { %v2555_v2 = vadd.f32 %v1198_v58, %v3849_v22  ;;  %v1200_v32 = vpop.f32.mrb[21].mxu0 }
 0x1ce   : > { %v1468_v38 = vpop.f32.mrb[86].mxu1  ;;  %v3934_v40 = vadd.f32 %v2555_v2, %v1423_v39 }
 0x1cf   : > { %v1203_v21 = vpop.f32.mrb[22].mxu0  ;;  %v1470_v52 = vpop.f32.mrb[87].mxu1 }
 0x1d0   : > { %v2557_v27 = vadd.f32 %v1203_v21, %v3856_v26  ;;  %v1205_v61 = vpop.f32.mrb[23].mxu0 }
 0x1d2   : > { %v1473_v41 = vpop.f32.mrb[88].mxu1  ;;  %v3937_v15 = vadd.f32 %v2557_v27, %v1428_v11 }
 0x1d3   : > { %v1208_v46 = vpop.f32.mrb[24].mxu0  ;;  %v1475_v24 = vpop.f32.mrb[89].mxu1 }
 0x1d4   : > { %v2559_v14 = vadd.f32 %v1208_v46, %v3862_v57  ;;  %v1210_v33 = vpop.f32.mrb[25].mxu0 }
 0x1d6   : > { %v1478_v25 = vpop.f32.mrb[90].mxu1  ;;  %v3940_v28 = vadd.f32 %v2559_v14, %v1433_v60 }
 0x1d7   : > { %v1213_v22 = vpop.f32.mrb[26].mxu0  ;;  %v1480_v37 = vpop.f32.mrb[91].mxu1 }
 0x1d8   : > { %v2561_v39 = vadd.f32 %v1213_v22, %v3868_v12  ;;  %v1215_v9 = vpop.f32.mrb[27].mxu0 }
 0x1da   : > { %v1483_v18 = vpop.f32.mrb[92].mxu1  ;;  %v3943_v31 = vadd.f32 %v2561_v39, %v1438_v42 }
 0x1db   : > { %v1218_v26 = vpop.f32.mrb[28].mxu0  ;;  %v1485_v36 = vpop.f32.mrb[93].mxu1 }
 0x1dc   : > { %v2563_v11 = vadd.f32 %v1218_v26, %v3874_v3  ;;  %v1220_v58 = vpop.f32.mrb[29].mxu0 }
 0x1de   : > { %v1488_v29 = vpop.f32.mrb[94].mxu1  ;;  %v3946_v2 = vadd.f32 %v2563_v11, %v1443_v62 }
 0x1df   : > { %v1223_v57 = vpop.f32.mrb[30].mxu0  ;;  %v1490_v32 = vpop.f32.mrb[95].mxu1 }
 0x1e0   : > { %v2565_v60 = vadd.f32 %v1223_v57, %v3880_v49  ;;  %v1225_v21 = vpop.f32.mrb[31].mxu0 }
 0x1e2   : > { %v1493_v52 = vpop.f32.mrb[96].mxu1  ;;  %v3949_v27 = vadd.f32 %v2565_v60, %v1448_v8 }
 0x1e3   : > { %v1228_v12 = vpop.f32.mrb[32].mxu0  ;;  %v1495_v61 = vpop.f32.mrb[97].mxu1 }
 0x1e4   : > { %v2567_v42 = vadd.f32 %v1228_v12, %v3886_v53  ;;  %v1230_v46 = vpop.f32.mrb[33].mxu0 }
 0x1e6   : > { %v1498_v24 = vpop.f32.mrb[98].mxu1  ;;  %v3952_v14 = vadd.f32 %v2567_v42, %v1453_v16 }
 0x1e7   : > { %v1233_v3 = vpop.f32.mrb[34].mxu0  ;;  %v1500_v33 = vpop.f32.mrb[99].mxu1 }
 0x1e8   : > { %v2569_v62 = vadd.f32 %v1233_v3, %v3893_v56  ;;  %v1235_v22 = vpop.f32.mrb[35].mxu0 }
 0x1ea   : > { %v1503_v37 = vpop.f32.mrb[100].mxu1  ;;  %v3955_v39 = vadd.f32 %v2569_v62, %v1458_v54 }
 0x1eb   : > { %v1238_v49 = vpop.f32.mrb[36].mxu0  ;;  %v1505_v9 = vpop.f32.mrb[101].mxu1 }
 0x1ec   : > { %v2571_v8 = vadd.f32 %v1238_v49, %v3899_v10  ;;  %v1240_v26 = vpop.f32.mrb[37].mxu0 }
 0x1ee   : > { %v1508_v36 = vpop.f32.mrb[102].mxu1  ;;  %v3958_v11 = vadd.f32 %v2571_v8, %v1463_v50 }
 0x1ef   : > { %v1243_v53 = vpop.f32.mrb[38].mxu0  ;;  %v1510_v58 = vpop.f32.mrb[103].mxu1 }
 0x1f0   : > { %v2573_v16 = vadd.f32 %v1243_v53, %v3901_v19  ;;  %v1245_v57 = vpop.f32.mrb[39].mxu0 }
 0x1f2   : > { %v1513_v32 = vpop.f32.mrb[104].mxu1  ;;  %v3961_v60 = vadd.f32 %v2573_v16, %v1468_v38 }
 0x1f3   : > { %v1248_v56 = vpop.f32.mrb[40].mxu0  ;;  %v1515_v21 = vpop.f32.mrb[105].mxu1 }
 0x1f4   : > { %v2575_v54 = vadd.f32 %v1248_v56, %v3903_v34  ;;  %v1250_v12 = vpop.f32.mrb[41].mxu0 }
 0x1f6   : > { %v3964_v61 = vpop.f32.mrb[106].mxu1  ;;  %v3966_v10 = vadd.f32 %v2575_v54, %v1473_v41 }
 0x1f7   : > { %v1253_v42 = vpop.f32.mrb[42].mxu0  ;;  %v1520_v50 = vpop.f32.mrb[107].mxu1 }
 0x1f8   : > { %v2577_v46 = vadd.f32 %v1253_v42, %v3905_v48  ;;  %v1255_v3 = vpop.f32.mrb[43].mxu0 }
 0x1fa   : > { %v3969_v33 = vpop.f32.mrb[108].mxu1  ;;  %v3971_v19 = vadd.f32 %v2577_v46, %v1478_v25 }
 0x1fb   : > { %v1258_v38 = vpop.f32.mrb[44].mxu0  ;;  %v1525_v62 = vpop.f32.mrb[109].mxu1 }
 0x1fc   : > { %v2579_v22 = vadd.f32 %v1258_v38, %v3907_v55  ;;  %v1260_v49 = vpop.f32.mrb[45].mxu0 }
 0x1fe   : > { %v3974_v34 = vpop.f32.mrb[110].mxu1  ;;  %v3976_v9 = vadd.f32 %v2579_v22, %v1483_v18 }
 0x1ff   : > { %v1263_v41 = vpop.f32.mrb[46].mxu0  ;;  %v1530_v8 = vpop.f32.mrb[111].mxu1 }
 0x200   : > { %v2581_v26 = vadd.f32 %v1263_v41, %v3909_v5  ;;  %v1265_v53 = vpop.f32.mrb[47].mxu0 }
 0x202   : > { %v3979_v48 = vpop.f32.mrb[112].mxu1  ;;  %v3981_v58 = vadd.f32 %v2581_v26, %v1488_v29 }
 0x203   : > { %v1268_v25 = vpop.f32.mrb[48].mxu0  ;;  %v3983_v16 = vpop.f32.mrb[113].mxu1 }
 0x204   : > { %v2583_v57 = vadd.f32 %v1268_v25, %v3911_v17  ;;  %v1270_v55 = vpop.f32.mrb[49].mxu0  ;;  %v4019_v25 = vld [vmem:[%s4182_s3] ss:$0 sm:$0xff] }
 0x206   : > { %v3986_v56 = vpop.f32.mrb[114].mxu1  ;;  %v3988_v21 = vadd.f32 %v2583_v57, %v1493_v52 }
 0x207   : > { %v1273_v18 = vpop.f32.mrb[50].mxu0  ;;  %v3990_v54 = vpop.f32.mrb[115].mxu1 }
 0x208   : > { %v2585_v5 = vadd.f32 %v1273_v18, %v3913_v30  ;;  %v1275_v12 = vpop.f32.mrb[51].mxu0 }
 0x20a   : > { %v3993_v42 = vpop.f32.mrb[116].mxu1  ;;  %v3995_v29 = vadd.f32 %v2585_v5, %v1498_v24  ;;  %v4010_v24 = vld [vmem:[%s4181_s2] ss:$0 sm:$0xff] }
 0x20b   : > { %v1278_v50 = vpop.f32.mrb[52].mxu0  ;;  %v3997_v46 = vpop.f32.mrb[117].mxu1 }
 0x20c   : > { %v2587_v17 = vadd.f32 %v1278_v50, %v3915_v35  ;;  %v1280_v3 = vpop.f32.mrb[53].mxu0 }
 0x20e   : > { %v4000_v38 = vpop.f32.mrb[118].mxu1  ;;  %v4002_v52 = vadd.f32 %v2587_v17, %v1503_v37 }
 0x20f   : > { %v1283_v62 = vpop.f32.mrb[54].mxu0  ;;  %v4004_v22 = vpop.f32.mrb[119].mxu1 }
 0x210   : > { %v2589_v30 = vadd.f32 %v1283_v62, %v3917_v47  ;;  %v1285_v49 = vpop.f32.mrb[55].mxu0 }
 0x212   : > { %v2253_v41 = vpop.f32.mrb[120].mxu1  ;;  %v4012_v8 = vadd.f32 %v2589_v30, %v1508_v36 }
 0x213   : > { %v1288_v35 = vpop.f32.mrb[56].mxu0  ;;  %v1644_v26 = vadd.f32 %v3931_v0, %v2253_v41  ;;  %v1638_v53 = vpop.f32.mrb[121].mxu1 }
 0x214   : > { %v2591_v37 = vadd.f32 %v1288_v35, %v3919_v63  ;;  %v1290_v47 = vpop.f32.mrb[57].mxu0  ;;  %v1639_v57 = vadd.f32 %v3928_v59, %v1638_v53 }
 0x215   : > { %v1773_v55 = vmul.f32 %v4010_v24, %v1644_v26 }
 0x216   : > { %v1772_v36 = vmul.f32 %v4010_v24, %v1639_v57  ;;  %v2256_v18 = vpop.f32.mrb[122].mxu1  ;;  %v4025_v5 = vadd.f32 %v2591_v37, %v1513_v32 }
 0x217   : > { %v1812_v0 = vadd.f32 %v4019_v25, %v1773_v55  ;;  %v1293_v12 = vpop.f32.mrb[58].mxu0  ;;  %v1654_v63 = vadd.f32 %v3937_v15, %v2256_v18  ;;  %v1648_v50 = vpop.f32.mrb[123].mxu1 }
 0x218   : > { %v1811_v59 = vadd.f32 %v4019_v25, %v1772_v36  ;;  %v2593_v17 = vadd.f32 %v1293_v12, %v3921_v6  ;;  %v1295_v3 = vpop.f32.mrb[59].mxu0  ;;  %v1649_v32 = vadd.f32 %v3934_v40, %v1648_v50 }
 0x219   : > { %v1844_v62 = vmax.f32 %v1812_v0, 0.0  ;;  %v1775_v30 = vmul.f32 %v4010_v24, %v1654_v63 }
 0x21a   : > { %v1843_v49 = vmax.f32 %v1811_v59, 0.0  ;;  %v1774_v15 = vmul.f32 %v4010_v24, %v1649_v32  ;;  %v2259_v41 = vpop.f32.mrb[124].mxu1  ;;  %v4040_v35 = vadd.f32 %v2593_v17, %v3964_v61 }
 0x21b   : > { %1876 = vst [vmem:[%s4032_s11 + $0x48] sm:$0xff] %v1844_v62  ;;  %v1814_v26 = vadd.f32 %v4019_v25, %v1775_v30  ;;  %v1298_v53 = vpop.f32.mrb[60].mxu0  ;;  %v1664_v6 = vadd.f32 %v3943_v31, %v2259_v41  ;;  %v1658_v37 = vpop.f32.mrb[125].mxu1 }
 0x21c   : > { %1875 = vst [vmem:[%s4032_s11 + $0x40] sm:$0xff] %v1843_v49  ;;  %v1813_v40 = vadd.f32 %v4019_v25, %v1774_v15  ;;  %v2595_v47 = vadd.f32 %v1298_v53, %v3923_v13  ;;  %v1300_v57 = vpop.f32.mrb[61].mxu0  ;;  %v1659_v55 = vadd.f32 %v3940_v28, %v1658_v37 }
 0x21d   : > { %v1846_v36 = vmax.f32 %v1814_v26, 0.0  ;;  %v1777_v61 = vmul.f32 %v4010_v24, %v1664_v6 }
 0x21e   : > { %v1845_v18 = vmax.f32 %v1813_v40, 0.0  ;;  %v1776_v0 = vmul.f32 %v4010_v24, %v1659_v55  ;;  %v2262_v12 = vpop.f32.mrb[126].mxu1  ;;  %v4052_v63 = vadd.f32 %v2595_v47, %v3969_v33 }
 0x21f   : > { %1878 = vst [vmem:[%s4032_s11 + $0x58] sm:$0xff] %v1846_v36  ;;  %v1816_v31 = vadd.f32 %v4019_v25, %v1777_v61  ;;  %v1303_v50 = vpop.f32.mrb[62].mxu0  ;;  %v1674_v13 = vadd.f32 %v3949_v27, %v2262_v12  ;;  %v1668_v59 = vpop.f32.mrb[127].mxu1 }
 0x220   : > { %1877 = vst [vmem:[%s4032_s11 + $0x50] sm:$0xff] %v1845_v18  ;;  %v1815_v28 = vadd.f32 %v4019_v25, %v1776_v0  ;;  %v2597_v17 = vadd.f32 %v1303_v50, %v3925_v20  ;;  %v1305_v3 = vpop.f32.mrb[63].mxu0  ;;  %v1669_v32 = vadd.f32 %v3946_v2, %v1668_v59 }
 0x221   : > { %v1848_v62 = vmax.f32 %v1816_v31, 0.0  ;;  %v1779_v33 = vmul.f32 %v4010_v24, %v1674_v13 }
 0x222   : > { %v1847_v30 = vmax.f32 %v1815_v28, 0.0  ;;  %v1778_v49 = vmul.f32 %v4010_v24, %v1669_v32  ;;  %v2265_v15 = vpop.f32.mrb[128].mxu1  ;;  %v4064_v41 = vadd.f32 %v2597_v17, %v3974_v34 }
 0x223   : > { %1880 = vst [vmem:[%s4032_s11 + $0x68] sm:$0xff] %v1848_v62  ;;  %v1818_v27 = vadd.f32 %v4019_v25, %v1779_v33  ;;  %v1373_v26 = vpop.f32.mrb[0].mxu0  ;;  %v1684_v20 = vadd.f32 %v3955_v39, %v2265_v15  ;;  %v1678_v53 = vpop.f32.mrb[129].mxu1 }
 0x224   : > { %1879 = vst [vmem:[%s4032_s11 + $0x60] sm:$0xff] %v1847_v30  ;;  %v1817_v2 = vadd.f32 %v4019_v25, %v1778_v49  ;;  %v2543_v6 = vadd.f32 %v1373_v26, %v3784_v23  ;;  %v1375_v37 = vpop.f32.mrb[1].mxu0  ;;  %v1679_v40 = vadd.f32 %v3952_v14, %v1678_v53 }
 0x225   : > { %v1850_v47 = vmax.f32 %v1818_v27, 0.0  ;;  %v1781_v34 = vmul.f32 %v4010_v24, %v1684_v20 }
 0x226   : > { %v1849_v57 = vmax.f32 %v1817_v2, 0.0  ;;  %v1599_v55 = vadd.f32 %v2543_v6, %v3983_v16  ;;  %v1780_v36 = vmul.f32 %v4010_v24, %v1679_v40  ;;  %v2268_v61 = vpop.f32.mrb[130].mxu1 }
 0x227   : > { %1882 = vst [vmem:[%s4032_s11 + $0x78] sm:$0xff] %v1850_v47  ;;  %v1820_v39 = vadd.f32 %v4019_v25, %v1781_v34  ;;  %v1378_v18 = vpop.f32.mrb[2].mxu0  ;;  %v1694_v0 = vadd.f32 %v3961_v60, %v2268_v61  ;;  %v1688_v23 = vpop.f32.mrb[131].mxu1 }
 0x228   : > { %1881 = vst [vmem:[%s4032_s11 + $0x70] sm:$0xff] %v1849_v57  ;;  %v1764_v14 = vmul.f32 %v4010_v24, %v1599_v55  ;;  %v1819_v12 = vadd.f32 %v4019_v25, %v1780_v36  ;;  %v2544_v31 = vadd.f32 %v1378_v18, %v3791_v43  ;;  %v1380_v16 = vpop.f32.mrb[3].mxu0  ;;  %v1689_v50 = vadd.f32 %v3958_v11, %v1688_v23 }
 0x229   : > { %v1852_v13 = vmax.f32 %v1820_v39, 0.0  ;;  %v1783_v59 = vmul.f32 %v4010_v24, %v1694_v0 }
 0x22a   : > { %v1803_v28 = vadd.f32 %v4019_v25, %v1764_v14  ;;  %v1851_v17 = vmax.f32 %v1819_v12, 0.0  ;;  %v1604_v60 = vadd.f32 %v2544_v31, %v3979_v48  ;;  %v1782_v3 = vmul.f32 %v4010_v24, %v1689_v50  ;;  %v2271_v32 = vpop.f32.mrb[132].mxu1 }
 0x22b   : > { %1884 = vst [vmem:[%s4032_s11 + $0x88] sm:$0xff] %v1852_v13  ;;  %v1822_v62 = vadd.f32 %v4019_v25, %v1783_v59  ;;  %v1383_v43 = vpop.f32.mrb[4].mxu0  ;;  %v1704_v33 = vadd.f32 %v3971_v19, %v2271_v32  ;;  %v1698_v11 = vpop.f32.mrb[133].mxu1 }
 0x22c   : > { %v1835_v30 = vmax.f32 %v1803_v28, 0.0  ;;  %1883 = vst [vmem:[%s4032_s11 + $0x80] sm:$0xff] %v1851_v17  ;;  %v1765_v49 = vmul.f32 %v4010_v24, %v1604_v60  ;;  %v1821_v15 = vadd.f32 %v4019_v25, %v1782_v3  ;;  %v2545_v48 = vadd.f32 %v1383_v43, %v3797_v51  ;;  %v1385_v27 = vpop.f32.mrb[5].mxu0 }
 0x22d   : > { %v1854_v26 = vmax.f32 %v1822_v62, 0.0  ;;  %v1785_v20 = vmul.f32 %v4010_v24, %v1704_v33  ;;  %v1699_v53 = vadd.f32 %v3966_v10, %v1698_v11 }
 0x22e   : > { %1867 = vst [vmem:[%s4032_s11] sm:$0xff] %v1835_v30  ;;  %v1804_v19 = vadd.f32 %v4019_v25, %v1765_v49  ;;  %v1853_v2 = vmax.f32 %v1821_v15, 0.0  ;;  %v1609_v6 = vadd.f32 %v2545_v48, %v3990_v54  ;;  %v2274_v37 = vpop.f32.mrb[134].mxu1 }
 0x22f   : > { %1886 = vst [vmem:[%s4032_s11 + $0x98] sm:$0xff] %v1854_v26  ;;  %v1824_v40 = vadd.f32 %v4019_v25, %v1785_v20  ;;  %v1784_v51 = vmul.f32 %v4010_v24, %v1699_v53  ;;  %v1388_v47 = vpop.f32.mrb[6].mxu0  ;;  %v1714_v34 = vadd.f32 %v3981_v58, %v2274_v37  ;;  %v1708_v57 = vpop.f32.mrb[135].mxu1 }
 0x230   : > { %v1836_v55 = vmax.f32 %v1804_v19, 0.0  ;;  %1885 = vst [vmem:[%s4032_s11 + $0x90] sm:$0xff] %v1853_v2  ;;  %v1766_v10 = vmul.f32 %v4010_v24, %v1609_v6  ;;  %v2546_v36 = vadd.f32 %v1388_v47, %v3803_v7  ;;  %v1390_v61 = vpop.f32.mrb[7].mxu0  ;;  %v1709_v54 = vadd.f32 %v3976_v9, %v1708_v57 }
 0x231   : > { %v1856_v39 = vmax.f32 %v1824_v40, 0.0  ;;  %v1823_v18 = vadd.f32 %v4019_v25, %v1784_v51  ;;  %v1787_v0 = vmul.f32 %v4010_v24, %v1714_v34 }
 0x232   : > { %1868 = vst [vmem:[%s4032_s11 + $0x8] sm:$0xff] %v1836_v55  ;;  %v1805_v58 = vadd.f32 %v4019_v25, %v1766_v10  ;;  %v1614_v23 = vadd.f32 %v2546_v36, %v3986_v56  ;;  %v1786_v14 = vmul.f32 %v4010_v24, %v1709_v54  ;;  %v2277_v12 = vpop.f32.mrb[136].mxu1 }
 0x233   : > { %1888 = vst [vmem:[%s4032_s11 + $0xa8] sm:$0xff] %v1856_v39  ;;  %v1855_v7 = vmax.f32 %v1823_v18, 0.0  ;;  %v1826_v31 = vadd.f32 %v4019_v25, %v1787_v0  ;;  %v1393_v9 = vpop.f32.mrb[8].mxu0  ;;  %v1724_v16 = vadd.f32 %v3995_v29, %v2277_v12  ;;  %v1718_v50 = vpop.f32.mrb[137].mxu1 }
 0x234   : > { %v1837_v13 = vmax.f32 %v1805_v58, 0.0  ;;  %v1767_v59 = vmul.f32 %v4010_v24, %v1614_v23  ;;  %v1825_v28 = vadd.f32 %v4019_v25, %v1786_v14  ;;  %v2547_v56 = vadd.f32 %v1393_v9, %v3809_v1  ;;  %v1395_v17 = vpop.f32.mrb[9].mxu0 }
 0x235   : > { %1887 = vst [vmem:[%s4032_s11 + $0xa0] sm:$0xff] %v1855_v7  ;;  %v1858_v60 = vmax.f32 %v1826_v31, 0.0  ;;  %v1789_v3 = vmul.f32 %v4010_v24, %v1724_v16  ;;  %v1719_v32 = vadd.f32 %v3988_v21, %v1718_v50 }
 0x236   : > { %1869 = vst [vmem:[%s4032_s11 + $0x10] sm:$0xff] %v1837_v13  ;;  %v1806_v29 = vadd.f32 %v4019_v25, %v1767_v59  ;;  %v1857_v62 = vmax.f32 %v1825_v28, 0.0  ;;  %v1619_v43 = vadd.f32 %v2547_v56, %v3997_v46  ;;  %v2280_v33 = vpop.f32.mrb[138].mxu1 }
 0x237   : > { %1890 = vst [vmem:[%s4032_s11 + $0xb8] sm:$0xff] %v1858_v60  ;;  %v1828_v11 = vadd.f32 %v4019_v25, %v1789_v3  ;;  %v1788_v1 = vmul.f32 %v4010_v24, %v1719_v32  ;;  %v1398_v30 = vpop.f32.mrb[10].mxu0  ;;  %v1734_v49 = vadd.f32 %v4012_v8, %v2280_v33  ;;  %v1728_v15 = vpop.f32.mrb[139].mxu1 }
 0x238   : > { %v1838_v48 = vmax.f32 %v1806_v29, 0.0  ;;  %1889 = vst [vmem:[%s4032_s11 + $0xb0] sm:$0xff] %v1857_v62  ;;  %v1768_v21 = vmul.f32 %v4010_v24, %v1619_v43  ;;  %v2548_v27 = vadd.f32 %v1398_v30, %v3815_v44  ;;  %v1400_v26 = vpop.f32.mrb[11].mxu0  ;;  %v1729_v46 = vadd.f32 %v4002_v52, %v1728_v15 }
 0x239   : > { %v1860_v20 = vmax.f32 %v1828_v11, 0.0  ;;  %v1827_v53 = vadd.f32 %v4019_v25, %v1788_v1  ;;  %v1791_v19 = vmul.f32 %v4010_v24, %v1734_v49 }
 0x23a   : > { %1870 = vst [vmem:[%s4032_s11 + $0x18] sm:$0xff] %v1838_v48  ;;  %v1807_v8 = vadd.f32 %v4019_v25, %v1768_v21  ;;  %v1624_v2 = vadd.f32 %v2548_v27, %v3993_v42  ;;  %v1790_v6 = vmul.f32 %v4010_v24, %v1729_v46  ;;  %v2283_v37 = vpop.f32.mrb[140].mxu1 }
 0x23b   : > { %1892 = vst [vmem:[%s4032_s11 + $0xc8] sm:$0xff] %v1860_v20  ;;  %v1859_v44 = vmax.f32 %v1827_v53, 0.0  ;;  %v1830_v40 = vadd.f32 %v4019_v25, %v1791_v19  ;;  %v1403_v52 = vpop.f32.mrb[12].mxu0  ;;  %v1744_v51 = vadd.f32 %v4040_v35, %v2283_v37  ;;  %v1738_v47 = vpop.f32.mrb[141].mxu1 }
 0x23c   : > { %v1839_v34 = vmax.f32 %v1807_v8, 0.0  ;;  %v1769_v57 = vmul.f32 %v4010_v24, %v1624_v2  ;;  %v1829_v55 = vadd.f32 %v4019_v25, %v1790_v6  ;;  %v2549_v42 = vadd.f32 %v1403_v52, %v3821_v45  ;;  %v1405_v10 = vpop.f32.mrb[13].mxu0 }
 0x23d   : > { %1891 = vst [vmem:[%s4032_s11 + $0xc0] sm:$0xff] %v1859_v44  ;;  %v1862_v36 = vmax.f32 %v1830_v40, 0.0  ;;  %v1793_v61 = vmul.f32 %v4010_v24, %v1744_v51  ;;  %v1739_v54 = vadd.f32 %v4025_v5, %v1738_v47 }
 0x23e   : > { %1871 = vst [vmem:[%s4032_s11 + $0x20] sm:$0xff] %v1839_v34  ;;  %v1808_v35 = vadd.f32 %v4019_v25, %v1769_v57  ;;  %v1861_v39 = vmax.f32 %v1829_v55, 0.0  ;;  %v1629_v18 = vadd.f32 %v2549_v42, %v4004_v22  ;;  %v2286_v0 = vpop.f32.mrb[142].mxu1 }
 0x23f   : > { %1894 = vst [vmem:[%s4032_s11 + $0xd8] sm:$0xff] %v1862_v36  ;;  %v1832_v58 = vadd.f32 %v4019_v25, %v1793_v61  ;;  %v1792_v45 = vmul.f32 %v4010_v24, %v1739_v54  ;;  %v1408_v23 = vpop.f32.mrb[14].mxu0  ;;  %v1754_v14 = vadd.f32 %v4064_v41, %v2286_v0  ;;  %v1748_v12 = vpop.f32.mrb[143].mxu1 }
 0x240   : > { %v1840_v7 = vmax.f32 %v1808_v35, 0.0  ;;  %1893 = vst [vmem:[%s4032_s11 + $0xd0] sm:$0xff] %v1861_v39  ;;  %v1770_v5 = vmul.f32 %v4010_v24, %v1629_v18  ;;  %v2550_v31 = vadd.f32 %v1408_v23, %v3827_v4  ;;  %v1410_v22 = vpop.f32.mrb[15].mxu0  ;;  %v1749_v9 = vadd.f32 %v4052_v63, %v1748_v12 }
 0x241   : > { %v1864_v16 = vmax.f32 %v1832_v58, 0.0  ;;  %v1831_v50 = vadd.f32 %v4019_v25, %v1792_v45  ;;  %v1795_v13 = vmul.f32 %v4010_v24, %v1754_v14 }
 0x242   : > { %1872 = vst [vmem:[%s4032_s11 + $0x28] sm:$0xff] %v1840_v7  ;;  %v1809_v41 = vadd.f32 %v4019_v25, %v1770_v5  ;;  %v1634_v59 = vadd.f32 %v2550_v31, %v4000_v38  ;;  %v1794_v4 = vmul.f32 %v4010_v24, %v1749_v9 }
 0x243   : > { %1896 = vst [vmem:[%s4032_s11 + $0xe8] sm:$0xff] %v1864_v16  ;;  %v1863_v28 = vmax.f32 %v1831_v50, 0.0  ;;  %v1834_v63 = vadd.f32 %v4019_v25, %v1795_v13 }
 0x244   : > { %v1841_v56 = vmax.f32 %v1809_v41, 0.0  ;;  %v1771_v17 = vmul.f32 %v4010_v24, %v1634_v59  ;;  %v1833_v60 = vadd.f32 %v4019_v25, %v1794_v4 }
 0x245   : > { %1895 = vst [vmem:[%s4032_s11 + $0xe0] sm:$0xff] %v1863_v28  ;;  %v1866_v3 = vmax.f32 %v1834_v63, 0.0 }
 0x246   : > { %1873 = vst [vmem:[%s4032_s11 + $0x30] sm:$0xff] %v1841_v56  ;;  %v1810_v32 = vadd.f32 %v4019_v25, %v1771_v17  ;;  %v1865_v29 = vmax.f32 %v1833_v60, 0.0 }
 0x247   : > { %1898 = vst [vmem:[%s4032_s11 + $0xf8] sm:$0xff] %v1866_v3 }
 0x248   : > { %v1842_v38 = vmax.f32 %v1810_v32, 0.0  ;;  %1897 = vst [vmem:[%s4032_s11 + $0xf0] sm:$0xff] %v1865_v29 }
 0x24a   : > { %1874 = vst [vmem:[%s4032_s11 + $0x38] sm:$0xff] %v1842_v38 }
 0x24b PF: > { %s14_s15 = sadd.s32 1, %s2695_s15  }
 0x24c   : > { %p11_p4 = scmp.ge.s32.totalorder %s14_s15, 4  }
 0x24e   :  { %13 = sbr.rel (!%p11_p4) target bundleno = 1 (0x1), region = 68 }

// kernel: se_residual_block.5
= control target key start
LH: loop header
LB: loop body
LE: loop exit
PB: predicated region body
PF: predicated region fallthrough
CT: control target
= control target key end

     0   :  { %s3404_s30 = smov 0   ;;  %s5219_s0 = inlined_call_operand.vmem [shape: f32[2,18,18,128], index: 0, kind: input, shape index: {}]   ;;  %s5220_s1 = inlined_call_operand.vmem [shape: f32[2,16,16,128], index: 1, kind: input, shape index: {}]   ;;  %s5221_s2 = inlined_call_operand.vmem [shape: f32[1152,128], index: 2, kind: input, shape index: {}]   ;;  %s5222_s3 = inlined_call_operand.vmem [shape: f32[1,128], index: 3, kind: input, shape index: {}]   ;;  %s5223_s4 = inlined_call_operand.vmem [shape: f32[1,128], index: 4, kind: input, shape index: {}]   ;;  %s5224_s5 = inlined_call_operand.vmem [shape: f32[128,128], index: 5, kind: input, shape index: {}]   ;;  %s5225_s6 = inlined_call_operand.vmem [shape: f32[1,128], index: 6, kind: input, shape index: {}]   ;;  %s5226_s7 = inlined_call_operand.vmem [shape: f32[128,128], index: 7, kind: input, shape index: {}]   ;;  %s5227_s8 = inlined_call_operand.vmem [shape: f32[1,128], index: 8, kind: input, shape index: {}]   ;;  %s5228_s9 = inlined_call_operand.vmem [shape: f32[2,16,16,128], index: 9, kind: output, shape index: {}]  }
   0x1 LB: > { %s2441_s10 = sadd.s32 4294967295, %s3349_s30   ;;  %p2445_p0 = scmp.ge.s32.totalorder %s3349_s30, 1  ;;  %s3349_s30 = sphi %s3404_s30, %s19_s30  }
   0x2   : > { %p297_p1 = scmp.lt.s32.totalorder %s3349_s30, 3 }
   0x4   : > { %p298_p2 = pnand %p2445_p0, %p297_p1 }
   0x6   : > { %301 = sbr.rel (%p298_p2) target bundleno = 1150 (0x47e), region = 56 }
   0xd   : > { %v643_v0 = vld [vmem:[%s5221_s2] sm:$0xff]  ;;  %v644_v1 = vld [vmem:[%s5221_s2 + $0x8] sm:$0xff]  ;;  %v5229_v3 = vmov 0.0|0.0   ;;  %v645_v6 = vld [vmem:[%s5221_s2 + $0x10] sm:$0xff]  ;;  %p338_p3 = scmp.lt.s32.totalorder %s2441_s10, 1  ;;  %vm3352_vm0 = vmmov 0  }
   0xe   : > { %v675_v2 = vld [vmem:[%s5221_s2 + $0x100] sm:$0xff]  ;;  %2882 = vmatprep.subr.bf16.mxu1 %v5229_v3  ;;  %2930 = vmatprep.subr.bf16.mxu0 %v5229_v3  ;;  %v2883_v4 = vpack.c.bf16 %v644_v1, %v643_v0  ;;  %v676_v5 = vld [vmem:[%s5221_s2 + $0x108] sm:$0xff]  ;;  %v646_v7 = vld [vmem:[%s5221_s2 + $0x18] sm:$0xff] }
   0xf   : > { %v2931_v8 = vpack.c.bf16 %v676_v5, %v675_v2  ;;  %v677_v9 = vld [vmem:[%s5221_s2 + $0x110] sm:$0xff]  ;;  %v678_v10 = vld [vmem:[%s5221_s2 + $0x118] sm:$0xff]  ;;  %v2886_v11 = vpack.c.bf16 %v646_v7, %v645_v6  ;;  %v647_v13 = vld [vmem:[%s5221_s2 + $0x20] sm:$0xff]  ;;  %s5366_s10 = smov (!%p338_p3, %s2441_s10), 1 }
  0x10   : > { %2884 = vmatpush1.bf16.msra.mxu1 %v2883_v4  ;;  %v2934_v12 = vpack.c.bf16 %v678_v10, %v677_v9  ;;  %v648_v14 = vld [vmem:[%s5221_s2 + $0x28] sm:$0xff]  ;;  %v679_v15 = vld [vmem:[%s5221_s2 + $0x120] sm:$0xff]  ;;  %v649_v19 = vld [vmem:[%s5221_s2 + $0x30] sm:$0xff]  ;;  %s3327_s13 = smul.u32 432, %s5366_s10  ;;  %s2648_s27 = sshll.u32 %s5366_s10, 8 }
  0x11   : > { %2932 = vmatpush1.bf16.msra.mxu0 %v2931_v8  ;;  %2885 = vmatprep.subr.bf16.mxu1 %v5229_v3  ;;  %v680_v16 = vld [vmem:[%s5221_s2 + $0x128] sm:$0xff]  ;;  %v2889_v17 = vpack.c.bf16 %v648_v14, %v647_v13  ;;  %v650_v20 = vld [vmem:[%s5221_s2 + $0x38] sm:$0xff]  ;;  %v681_v21 = vld [vmem:[%s5221_s2 + $0x130] sm:$0xff]  ;;  %s5075_s11 = scalar_lea.vmem %s5220_s1, %s2648_s27 }
  0x12   : > { %2933 = vmatprep.subr.bf16.mxu0 %v5229_v3  ;;  %v2937_v18 = vpack.c.bf16 %v680_v16, %v679_v15  ;;  %v682_v22 = vld [vmem:[%s5221_s2 + $0x138] sm:$0xff]  ;;  %v2892_v23 = vpack.c.bf16 %v650_v20, %v649_v19  ;;  %v651_v25 = vld [vmem:[%s5221_s2 + $0x40] sm:$0xff]  ;;  %v652_v26 = vld [vmem:[%s5221_s2 + $0x48] sm:$0xff]  ;;  %s3504_s24 = scalar_lea.vmem %s5219_s0, %s3327_s13  ;;  %s5162_s13 = scalar_lea.vmem %s5228_s9, %s2648_s27 }
  0x13   : > { %v2940_v24 = vpack.c.bf16 %v682_v22, %v681_v21  ;;  %v683_v27 = vld [vmem:[%s5221_s2 + $0x140] sm:$0xff]  ;;  %v684_v28 = vld [vmem:[%s5221_s2 + $0x148] sm:$0xff]  ;;  %v2895_v29 = vpack.c.bf16 %v652_v26, %v651_v25  ;;  %v653_v31 = vld [vmem:[%s5221_s2 + $0x50] sm:$0xff] }
  0x14   : > { %2887 = vmatpush1.bf16.msra.mxu1 %v2886_v11  ;;  %v2943_v30 = vpack.c.bf16 %v684_v28, %v683_v27  ;;  %v654_v32 = vld [vmem:[%s5221_s2 + $0x58] sm:$0xff]  ;;  %v685_v33 = vld [vmem:[%s5221_s2 + $0x150] sm:$0xff]  ;;  %v655_v37 = vld [vmem:[%s5221_s2 + $0x60] sm:$0xff] }
  0x15   : > { %2935 = vmatpush1.bf16.msra.mxu0 %v2934_v12  ;;  %2888 = vmatprep.subr.bf16.mxu1 %v5229_v3  ;;  %v686_v34 = vld [vmem:[%s5221_s2 + $0x158] sm:$0xff]  ;;  %v2898_v35 = vpack.c.bf16 %v654_v32, %v653_v31  ;;  %v656_v38 = vld [vmem:[%s5221_s2 + $0x68] sm:$0xff]  ;;  %v687_v39 = vld [vmem:[%s5221_s2 + $0x160] sm:$0xff] }
  0x16   : > { %2936 = vmatprep.subr.bf16.mxu0 %v5229_v3  ;;  %v2946_v36 = vpack.c.bf16 %v686_v34, %v685_v33  ;;  %v688_v40 = vld [vmem:[%s5221_s2 + $0x168] sm:$0xff]  ;;  %v3522_v42 = vld [vmem:[%s3504_s24 + $0x18] sm:$0xff]  ;;  %v2901_v43 = vpack.c.bf16 %v656_v38, %v655_v37  ;;  %v657_v45 = vld [vmem:[%s5221_s2 + $0x70] sm:$0xff] }
  0x17   : > { %v385_v41 = vld [vmem:[%s3504_s24 + $0x1] sm:$0xff]  ;;  %1076 = vmatprep.mubr.f32.mxu0 %v3522_v42  ;;  %v2949_v44 = vpack.c.bf16 %v688_v40, %v687_v39  ;;  %v658_v46 = vld [vmem:[%s5221_s2 + $0x78] sm:$0xff]  ;;  %v689_v47 = vld [vmem:[%s5221_s2 + $0x170] sm:$0xff] }
  0x18   : > { %2890 = vmatpush1.bf16.msra.mxu1 %v2889_v17  ;;  %851 = vmatprep.mubr.f32.mxu1 %v385_v41  ;;  %v690_v48 = vld [vmem:[%s5221_s2 + $0x178] sm:$0xff]  ;;  %v2904_v49 = vpack.c.bf16 %v658_v46, %v657_v45  ;;  %v659_v51 = vld [vmem:[%s5221_s2 + $0x80] sm:$0xff]  ;;  %v660_v52 = vld [vmem:[%s5221_s2 + $0x88] sm:$0xff] }
  0x19   : > { %2938 = vmatpush1.bf16.msra.mxu0 %v2937_v18  ;;  %2891 = vmatprep.subr.bf16.mxu1 %v5229_v3  ;;  %v2952_v50 = vpack.c.bf16 %v690_v48, %v689_v47  ;;  %v691_v53 = vld [vmem:[%s5221_s2 + $0x180] sm:$0xff]  ;;  %v692_v54 = vld [vmem:[%s5221_s2 + $0x188] sm:$0xff]  ;;  %v2907_v55 = vpack.c.bf16 %v660_v52, %v659_v51  ;;  %v661_v57 = vld [vmem:[%s5221_s2 + $0x90] sm:$0xff] }
  0x1a   : > { %2939 = vmatprep.subr.bf16.mxu0 %v5229_v3  ;;  %v2955_v56 = vpack.c.bf16 %v692_v54, %v691_v53  ;;  %v662_v58 = vld [vmem:[%s5221_s2 + $0x98] sm:$0xff]  ;;  %v693_v59 = vld [vmem:[%s5221_s2 + $0x190] sm:$0xff]  ;;  %v663_v63 = vld [vmem:[%s5221_s2 + $0xa0] sm:$0xff] }
  0x1b   : > { %v694_v60 = vld [vmem:[%s5221_s2 + $0x198] sm:$0xff]  ;;  %v2910_v61 = vpack.c.bf16 %v662_v58, %v661_v57  ;;  %v664_v0 = vld [vmem:[%s5221_s2 + $0xa8] sm:$0xff]  ;;  %v695_v1 = vld [vmem:[%s5221_s2 + $0x1a0] sm:$0xff] }
  0x1c   : > { %2893 = vmatpush1.bf16.msra.mxu1 %v2892_v23  ;;  %v2958_v62 = vpack.c.bf16 %v694_v60, %v693_v59  ;;  %v696_v2 = vld [vmem:[%s5221_s2 + $0x1a8] sm:$0xff]  ;;  %v2913_v4 = vpack.c.bf16 %v664_v0, %v663_v63  ;;  %v665_v6 = vld [vmem:[%s5221_s2 + $0xb0] sm:$0xff]  ;;  %v666_v7 = vld [vmem:[%s5221_s2 + $0xb8] sm:$0xff] }
  0x1d   : > { %2941 = vmatpush1.bf16.msra.mxu0 %v2940_v24  ;;  %2894 = vmatprep.subr.bf16.mxu1 %v5229_v3  ;;  %v2961_v5 = vpack.c.bf16 %v696_v2, %v695_v1  ;;  %v697_v8 = vld [vmem:[%s5221_s2 + $0x1b0] sm:$0xff]  ;;  %v698_v9 = vld [vmem:[%s5221_s2 + $0x1b8] sm:$0xff]  ;;  %v2916_v10 = vpack.c.bf16 %v666_v7, %v665_v6  ;;  %v667_v12 = vld [vmem:[%s5221_s2 + $0xc0] sm:$0xff] }
  0x1e   : > { %2942 = vmatprep.subr.bf16.mxu0 %v5229_v3  ;;  %v2964_v11 = vpack.c.bf16 %v698_v9, %v697_v8  ;;  %v668_v13 = vld [vmem:[%s5221_s2 + $0xc8] sm:$0xff]  ;;  %v699_v14 = vld [vmem:[%s5221_s2 + $0x1c0] sm:$0xff]  ;;  %v669_v18 = vld [vmem:[%s5221_s2 + $0xd0] sm:$0xff] }
  0x1f   : > { %v700_v15 = vld [vmem:[%s5221_s2 + $0x1c8] sm:$0xff]  ;;  %v2919_v16 = vpack.c.bf16 %v668_v13, %v667_v12  ;;  %v670_v19 = vld [vmem:[%s5221_s2 + $0xd8] sm:$0xff]  ;;  %v701_v20 = vld [vmem:[%s5221_s2 + $0x1d0] sm:$0xff] }
  0x20   : > { %2896 = vmatpush1.bf16.msra.mxu1 %v2895_v29  ;;  %v2967_v17 = vpack.c.bf16 %v700_v15, %v699_v14  ;;  %v702_v21 = vld [vmem:[%s5221_s2 + $0x1d8] sm:$0xff]  ;;  %v2922_v22 = vpack.c.bf16 %v670_v19, %v669_v18  ;;  %v671_v24 = vld [vmem:[%s5221_s2 + $0xe0] sm:$0xff]  ;;  %v672_v25 = vld [vmem:[%s5221_s2 + $0xe8] sm:$0xff] }
  0x21   : > { %2944 = vmatpush1.bf16.msra.mxu0 %v2943_v30  ;;  %2897 = vmatprep.subr.bf16.mxu1 %v5229_v3  ;;  %v2970_v23 = vpack.c.bf16 %v702_v21, %v701_v20  ;;  %v703_v26 = vld [vmem:[%s5221_s2 + $0x1e0] sm:$0xff]  ;;  %v704_v27 = vld [vmem:[%s5221_s2 + $0x1e8] sm:$0xff]  ;;  %v2925_v28 = vpack.c.bf16 %v672_v25, %v671_v24  ;;  %v673_v30 = vld [vmem:[%s5221_s2 + $0xf0] sm:$0xff] }
  0x22   : > { %2945 = vmatprep.subr.bf16.mxu0 %v5229_v3  ;;  %v2973_v29 = vpack.c.bf16 %v704_v27, %v703_v26  ;;  %v674_v31 = vld [vmem:[%s5221_s2 + $0xf8] sm:$0xff]  ;;  %v705_v32 = vld [vmem:[%s5221_s2 + $0x1f0] sm:$0xff]  ;;  %v708_v37 = vld [vmem:[%s5221_s2 + $0x208] sm:$0xff] }
  0x23   : > { %v706_v33 = vld [vmem:[%s5221_s2 + $0x1f8] sm:$0xff]  ;;  %v2928_v34 = vpack.c.bf16 %v674_v31, %v673_v30  ;;  %v739_v38 = vld [vmem:[%s5221_s2 + $0x300] sm:$0xff]  ;;  %v740_v39 = vld [vmem:[%s5221_s2 + $0x308] sm:$0xff] }
  0x24   : > { %2899 = vmatpush1.bf16.msra.mxu1 %v2898_v35  ;;  %v2976_v35 = vpack.c.bf16 %v706_v33, %v705_v32  ;;  %v353_v40 = vld [vmem:[%s3504_s24] sm:$0xff]  ;;  %v709_v46 = vld [vmem:[%s5221_s2 + $0x210] sm:$0xff]  ;;  %v710_v47 = vld [vmem:[%s5221_s2 + $0x218] sm:$0xff]  ;;  %v3677_v48 = vpack.c.bf16 %v740_v39, %v739_v38 }
  0x25   : > { %2947 = vmatpush1.bf16.msra.mxu0 %v2946_v36  ;;  %2900 = vmatprep.subr.bf16.mxu1 %v5229_v3  ;;  %v707_v36 = vld [vmem:[%s5221_s2 + $0x200] sm:$0xff]  ;;  %v354_v51 = vld [vmem:[%s3504_s24 + $0x8] sm:$0xff]  ;;  %v2982_v54 = vpack.c.bf16 %v710_v47, %v709_v46  ;;  %v2454_v0 = vld [vmem:[%s3504_s24 + $0x38] sm:$0xff] }
  0x26   : > { %2948 = vmatprep.subr.bf16.mxu0 %v5229_v3  ;;  %v417_v41 = vld [vmem:[%s3504_s24 + $0x2] sm:$0xff]  ;;  %v418_v52 = vld [vmem:[%s3504_s24 + $0xa] sm:$0xff]  ;;  %v3688_v53 = vld [vmem:[%s3504_s24 + $0x19] sm:$0xff] }
  0x27   : > { %v2452_v45 = vld [vmem:[%s3504_s24 + $0x20] sm:$0xff]  ;;  %v712_v57 = vld [vmem:[%s5221_s2 + $0x228] sm:$0xff]  ;;  %v713_v1 = vld [vmem:[%s5221_s2 + $0x230] sm:$0xff] }
  0x28   : > { %2902 = vmatpush1.bf16.msra.mxu1 %v2901_v43  ;;  %v2979_v43 = vpack.c.bf16 %v708_v37, %v707_v36  ;;  %v743_v59 = vld [vmem:[%s5221_s2 + $0x320] sm:$0xff]  ;;  %v744_v60 = vld [vmem:[%s5221_s2 + $0x328] sm:$0xff]  ;;  %v714_v2 = vld [vmem:[%s5221_s2 + $0x238] sm:$0xff] }
  0x29   : > { %2950 = vmatpush1.bf16.msra.mxu0 %v2949_v44  ;;  %2903 = vmatprep.subr.bf16.mxu1 %v5229_v3  ;;  %v386_v44 = vld [vmem:[%s3504_s24 + $0x9] sm:$0xff]  ;;  %v746_v6 = vld [vmem:[%s5221_s2 + $0x338] sm:$0xff]  ;;  %v747_v13 = vld [vmem:[%s5221_s2 + $0x340] sm:$0xff] }
  0x2a   : > { %2951 = vmatprep.subr.bf16.mxu0 %v5229_v3  ;;  %v3737_v7 = vld [vmem:[%s3504_s24 + $0x22] sm:$0xff]  ;;  %v3740_v8 = vld [vmem:[%s3504_s24 + $0x31] sm:$0xff]  ;;  %v3789_v24 = vld [vmem:[%s3504_s24 + $0x3a] sm:$0xff] }
  0x2b   : > { %v2455_v9 = vld [vmem:[%s3504_s24 + $0x48] sm:$0xff]  ;;  %v3763_v15 = vld [vmem:[%s3504_s24 + $0x32] sm:$0xff]  ;;  %v2457_v27 = vld [vmem:[%s3504_s24 + $0x60] sm:$0xff] }
  0x2c   : > { %2905 = vmatpush1.bf16.msra.mxu1 %v2904_v49  ;;  %v741_v49 = vld [vmem:[%s5221_s2 + $0x310] sm:$0xff]  ;;  %v748_v14 = vld [vmem:[%s5221_s2 + $0x348] sm:$0xff]  ;;  %v718_v20 = vld [vmem:[%s5221_s2 + $0x258] sm:$0xff] }
  0x2d   : > { %2953 = vmatpush1.bf16.msra.mxu0 %v2952_v50  ;;  %2906 = vmatprep.subr.bf16.mxu1 %v5229_v3  ;;  %v742_v50 = vld [vmem:[%s5221_s2 + $0x318] sm:$0xff]  ;;  %v2456_v18 = vld [vmem:[%s3504_s24 + $0x50] sm:$0xff]  ;;  %v3777_v21 = vpack.c.bf16 %v748_v14, %v747_v13  ;;  %v751_v31 = vld [vmem:[%s5221_s2 + $0x360] sm:$0xff] }
  0x2e   : > { %2954 = vmatprep.subr.bf16.mxu0 %v5229_v3  ;;  %v3699_v58 = vpack.c.bf16 %v742_v50, %v741_v49  ;;  %v717_v19 = vld [vmem:[%s5221_s2 + $0x250] sm:$0xff]  ;;  %v752_v32 = vld [vmem:[%s5221_s2 + $0x368] sm:$0xff]  ;;  %v722_v38 = vld [vmem:[%s5221_s2 + $0x278] sm:$0xff] }
  0x2f   : > { %v3792_v25 = vld [vmem:[%s3504_s24 + $0x49] sm:$0xff]  ;;  %v2994_v26 = vpack.c.bf16 %v718_v20, %v717_v19  ;;  %v3829_v39 = vpack.c.bf16 %v752_v32, %v751_v31  ;;  %v2459_v46 = vld [vmem:[%s3504_s24 + $0x78] sm:$0xff]  ;;  %v723_v47 = vld [vmem:[%s5221_s2 + $0x280] sm:$0xff] }
  0x30   : > { %2908 = vmatpush1.bf16.msra.mxu1 %v2907_v55  ;;  %v2453_v55 = vld [vmem:[%s3504_s24 + $0x30] sm:$0xff]  ;;  %v2458_v36 = vld [vmem:[%s3504_s24 + $0x68] sm:$0xff]  ;;  %v759_v13 = vld [vmem:[%s5221_s2 + $0x3a0] sm:$0xff] }
  0x31   : > { %2956 = vmatpush1.bf16.msra.mxu0 %v2955_v56  ;;  %2909 = vmatprep.subr.bf16.mxu1 %v5229_v3  ;;  %v711_v56 = vld [vmem:[%s5221_s2 + $0x220] sm:$0xff]  ;;  %v3815_v33 = vld [vmem:[%s3504_s24 + $0x4a] sm:$0xff]  ;;  %v2462_v20 = vld [vmem:[%s3504_s24 + $0x98] sm:$0xff] }
  0x32   : > { %2957 = vmatprep.subr.bf16.mxu0 %v5229_v3  ;;  %v2985_v63 = vpack.c.bf16 %v712_v57, %v711_v56  ;;  %v721_v37 = vld [vmem:[%s5221_s2 + $0x270] sm:$0xff]  ;;  %v724_v49 = vld [vmem:[%s5221_s2 + $0x288] sm:$0xff]  ;;  %v2460_v57 = vld [vmem:[%s3504_s24 + $0x80] sm:$0xff] }
  0x33   : > { %v3003_v56 = vpack.c.bf16 %v724_v49, %v723_v47  ;;  %v760_v14 = vld [vmem:[%s5221_s2 + $0x3a8] sm:$0xff]  ;;  %v3948_v31 = vld [vmem:[%s3504_s24 + $0x91] sm:$0xff] }
  0x34   : > { %2911 = vmatpush1.bf16.msra.mxu1 %v2910_v61  ;;  %v3710_v61 = vld [vmem:[%s3504_s24 + $0x1a] sm:$0xff]  ;;  %v2464_v49 = vld [vmem:[%s3504_s24 + $0xb0] sm:$0xff] }
  0x35   : > { %2959 = vmatpush1.bf16.msra.mxu0 %v2958_v62  ;;  %2912 = vmatprep.subr.bf16.mxu1 %v5229_v3  ;;  %v3713_v62 = vld [vmem:[%s3504_s24 + $0x21] sm:$0xff] }
  0x36   : > { %2960 = vmatprep.subr.bf16.mxu0 %v5229_v3 }
  0x38   : > { %2914 = vmatpush1.bf16.msra.mxu1 %v2913_v4  ;;  %v3724_v4 = vpack.c.bf16 %v744_v60, %v743_v59  ;;  %v725_v59 = vld [vmem:[%s5221_s2 + $0x290] sm:$0xff]  ;;  %v726_v60 = vld [vmem:[%s5221_s2 + $0x298] sm:$0xff] }
  0x39   : > { %2962 = vmatpush1.bf16.msra.mxu0 %v2961_v5  ;;  %2915 = vmatprep.subr.bf16.mxu1 %v5229_v3  ;;  %v745_v5 = vld [vmem:[%s5221_s2 + $0x330] sm:$0xff] }
  0x3a   : > { %2963 = vmatprep.subr.bf16.mxu0 %v5229_v3  ;;  %v3751_v12 = vpack.c.bf16 %v746_v6, %v745_v5  ;;  %v3896_v5 = vld [vmem:[%s3504_s24 + $0x79] sm:$0xff]  ;;  %v3006_v6 = vpack.c.bf16 %v726_v60, %v725_v59 }
  0x3b   : > { %v766_v59 = vld [vmem:[%s5221_s2 + $0x3d8] sm:$0xff] }
  0x3c   : > { %2917 = vmatpush1.bf16.msra.mxu1 %v2916_v10  ;;  %v715_v10 = vld [vmem:[%s5221_s2 + $0x240] sm:$0xff] }
  0x3d   : > { %2965 = vmatpush1.bf16.msra.mxu0 %v2964_v11  ;;  %2918 = vmatprep.subr.bf16.mxu1 %v5229_v3  ;;  %v716_v11 = vld [vmem:[%s5221_s2 + $0x248] sm:$0xff]  ;;  %v3997_v60 = vld [vmem:[%s3504_s24 + $0x9a] sm:$0xff] }
  0x3e   : > { %2966 = vmatprep.subr.bf16.mxu0 %v5229_v3  ;;  %5289 = vst [vmem:[#allocation6_spill] sm:$0xff] %v3997_v60 }
  0x40   : > { %2920 = vmatpush1.bf16.msra.mxu1 %v2919_v16  ;;  %v3766_v16 = vld [vmem:[%s3504_s24 + $0x39] sm:$0xff] }
  0x41   : > { %2968 = vmatpush1.bf16.msra.mxu0 %v2967_v17  ;;  %2921 = vmatprep.subr.bf16.mxu1 %v5229_v3  ;;  %v2991_v17 = vpack.c.bf16 %v716_v11, %v715_v10  ;;  %v728_v10 = vld [vmem:[%s5221_s2 + $0x2a8] sm:$0xff] }
  0x42   : > { %2969 = vmatprep.subr.bf16.mxu0 %v5229_v3 }
  0x44   : > { %2923 = vmatpush1.bf16.msra.mxu1 %v2922_v22  ;;  %v749_v22 = vld [vmem:[%s5221_s2 + $0x350] sm:$0xff] }
  0x45   : > { %2971 = vmatpush1.bf16.msra.mxu0 %v2970_v23  ;;  %2924 = vmatprep.subr.bf16.mxu1 %v5229_v3  ;;  %v750_v23 = vld [vmem:[%s5221_s2 + $0x358] sm:$0xff] }
  0x46   : > { %2972 = vmatprep.subr.bf16.mxu0 %v5229_v3  ;;  %v3803_v30 = vpack.c.bf16 %v750_v23, %v749_v22  ;;  %v729_v22 = vld [vmem:[%s5221_s2 + $0x2b0] sm:$0xff]  ;;  %v730_v23 = vld [vmem:[%s5221_s2 + $0x2b8] sm:$0xff] }
  0x47   : > { %v3012_v32 = vpack.c.bf16 %v730_v23, %v729_v22  ;;  %v4026_v22 = vld [vmem:[%s3504_s24 + $0xb1] sm:$0xff]  ;;  %v4029_v23 = vld [vmem:[%s3504_s24 + $0xc8] sm:$0xff] }
  0x48   : > { %2926 = vmatpush1.bf16.msra.mxu1 %v2925_v28  ;;  %v719_v28 = vld [vmem:[%s5221_s2 + $0x260] sm:$0xff]  ;;  %5293 = vst [vmem:[#allocation10_spill] sm:$0xff] %v4026_v22 }
  0x49   : > { %2974 = vmatpush1.bf16.msra.mxu0 %v2973_v29  ;;  %2927 = vmatprep.subr.bf16.mxu1 %v5229_v3  ;;  %v720_v29 = vld [vmem:[%s5221_s2 + $0x268] sm:$0xff] }
  0x4a   : > { %2975 = vmatprep.subr.bf16.mxu0 %v5229_v3 }
  0x4c   : > { %2929 = vmatpush1.bf16.msra.mxu1 %v2928_v34  ;;  %v3818_v34 = vld [vmem:[%s3504_s24 + $0x51] sm:$0xff] }
  0x4d   : > { %2977 = vmatpush1.bf16.msra.mxu0 %v2976_v35  ;;  %3154 = vmatprep.subr.bf16.mxu1 %v5229_v3  ;;  %v2997_v35 = vpack.c.bf16 %v720_v29, %v719_v28  ;;  %v762_v28 = vld [vmem:[%s5221_s2 + $0x3b8] sm:$0xff]  ;;  %v3945_v29 = vld [vmem:[%s3504_s24 + $0x82] sm:$0xff] }
  0x4e   : > { %2978 = vmatprep.subr.bf16.mxu0 %v5229_v3 }
  0x4f   : > { %852 = vmatmul.mubr.f32.vlgmr.msra.gmra.mrb[0].mxu1 %v353_v40  ;;  %v753_v40 = vld [vmem:[%s5221_s2 + $0x370] sm:$0xff] }
  0x50   : > { %1077 = vmatmul.mubr.f32.vlgmr.msra.gmra.mrb[0].mxu0 %v417_v41  ;;  %856 = vmatprep.mubr.f32.mxu1 %v386_v44  ;;  %v754_v41 = vld [vmem:[%s5221_s2 + $0x378] sm:$0xff]  ;;  %v3844_v44 = vld [vmem:[%s3504_s24 + $0x61] sm:$0xff] }
  0x51   : > { %2980 = vmatpush1.bf16.msra.mxu0 %v2979_v43  ;;  %1081 = vmatprep.mubr.f32.mxu0 %v2452_v45  ;;  %v3841_v43 = vld [vmem:[%s3504_s24 + $0x52] sm:$0xff]  ;;  %v3855_v50 = vpack.c.bf16 %v754_v41, %v753_v40  ;;  %v763_v40 = vld [vmem:[%s5221_s2 + $0x3c0] sm:$0xff]  ;;  %v764_v41 = vld [vmem:[%s5221_s2 + $0x3c8] sm:$0xff] }
  0x52   : > { %2981 = vmatprep.subr.bf16.mxu0 %v5229_v3  ;;  %3170 = vmatpush1.bf16.msra.mxu1 %v3677_v48 }
  0x53   : > { %857 = vmatmul.mubr.f32.gmra.mrb[2].mxu1 %v354_v51  ;;  %3155 = vmatprep.subr.bf16.mxu1 %v5229_v3  ;;  %v755_v51 = vld [vmem:[%s5221_s2 + $0x380] sm:$0xff] }
  0x54   : > { %1082 = vmatmul.mubr.f32.gmra.mrb[2].mxu0 %v418_v52  ;;  %861 = vmatprep.mubr.f32.mxu1 %v3688_v53  ;;  %v756_v52 = vld [vmem:[%s5221_s2 + $0x388] sm:$0xff] }
  0x55   : > { %1086 = vmatprep.mubr.f32.mxu0 %v2453_v55  ;;  %2983 = vmatpush1.bf16.msra.mxu0 %v2982_v54  ;;  %v3867_v54 = vld [vmem:[%s3504_s24 + $0x62] sm:$0xff] }
  0x56   : > { %2984 = vmatprep.subr.bf16.mxu0 %v5229_v3  ;;  %3171 = vmatpush1.bf16.msra.mxu1 %v3699_v58 }
  0x57   : > { %862 = vmatmul.mubr.f32.gmra.mrb[4].mxu1 %v3522_v42  ;;  %3156 = vmatprep.subr.bf16.mxu1 %v5229_v3  ;;  %v2988_v42 = vpack.c.bf16 %v714_v2, %v713_v1  ;;  %v758_v1 = vld [vmem:[%s5221_s2 + $0x398] sm:$0xff]  ;;  %v3893_v2 = vld [vmem:[%s3504_s24 + $0x6a] sm:$0xff] }
  0x58   : > { %1087 = vmatmul.mubr.f32.gmra.mrb[4].mxu0 %v3710_v61  ;;  %866 = vmatprep.mubr.f32.mxu1 %v3713_v62 }
  0x59   : > { %1091 = vmatprep.mubr.f32.mxu0 %v2454_v0  ;;  %2986 = vmatpush1.bf16.msra.mxu0 %v2985_v63  ;;  %v3881_v63 = vpack.c.bf16 %v756_v52, %v755_v51  ;;  %v733_v51 = vld [vmem:[%s5221_s2 + $0x2d0] sm:$0xff]  ;;  %v734_v52 = vld [vmem:[%s5221_s2 + $0x2d8] sm:$0xff] }
  0x5a   : > { %2987 = vmatprep.subr.bf16.mxu0 %v5229_v3  ;;  %3172 = vmatpush1.bf16.msra.mxu1 %v3724_v4 }
  0x5b   : > { %867 = vmatmul.mubr.f32.gmra.mrb[6].mxu1 %v2452_v45  ;;  %3157 = vmatprep.subr.bf16.mxu1 %v5229_v3  ;;  %v3000_v45 = vpack.c.bf16 %v722_v38, %v721_v37  ;;  %v732_v37 = vld [vmem:[%s5221_s2 + $0x2c8] sm:$0xff] }
  0x5c   : > { %1092 = vmatmul.mubr.f32.gmra.mrb[6].mxu0 %v3737_v7  ;;  %871 = vmatprep.mubr.f32.mxu1 %v3740_v8 }
  0x5d   : > { %1096 = vmatprep.mubr.f32.mxu0 %v2455_v9  ;;  %2989 = vmatpush1.bf16.msra.mxu0 %v2988_v42  ;;  %v2461_v42 = vld [vmem:[%s3504_s24 + $0x90] sm:$0xff] }
  0x5e   : > { %2990 = vmatprep.subr.bf16.mxu0 %v5229_v3  ;;  %3173 = vmatpush1.bf16.msra.mxu1 %v3751_v12 }
  0x5f   : > { %872 = vmatmul.mubr.f32.gmra.mrb[8].mxu1 %v2453_v55  ;;  %3158 = vmatprep.subr.bf16.mxu1 %v5229_v3  ;;  %v3870_v55 = vld [vmem:[%s3504_s24 + $0x69] sm:$0xff] }
  0x60   : > { %1097 = vmatmul.mubr.f32.gmra.mrb[8].mxu0 %v3763_v15  ;;  %876 = vmatprep.mubr.f32.mxu1 %v3766_v16 }
  0x61   : > { %1101 = vmatprep.mubr.f32.mxu0 %v2456_v18  ;;  %2992 = vmatpush1.bf16.msra.mxu0 %v2991_v17  ;;  %v3919_v17 = vld [vmem:[%s3504_s24 + $0x7a] sm:$0xff] }
  0x62   : > { %2993 = vmatprep.subr.bf16.mxu0 %v5229_v3  ;;  %3174 = vmatpush1.bf16.msra.mxu1 %v3777_v21 }
  0x63   : > { %877 = vmatmul.mubr.f32.gmra.mrb[10].mxu1 %v2454_v0  ;;  %3159 = vmatprep.subr.bf16.mxu1 %v5229_v3  ;;  %v757_v0 = vld [vmem:[%s5221_s2 + $0x390] sm:$0xff] }
  0x64   : > { %1102 = vmatmul.mubr.f32.gmra.mrb[10].mxu0 %v3789_v24  ;;  %881 = vmatprep.mubr.f32.mxu1 %v3792_v25  ;;  %v3907_v11 = vpack.c.bf16 %v758_v1, %v757_v0  ;;  %v4000_v0 = vld [vmem:[%s3504_s24 + $0xa9] sm:$0xff]  ;;  %v3018_v1 = vpack.c.bf16 %v734_v52, %v733_v51  ;;  %v4064_v52 = vld [vmem:[%s3504_s24 + $0xd8] sm:$0xff] }
  0x65   : > { %1106 = vmatprep.mubr.f32.mxu0 %v2457_v27  ;;  %2995 = vmatpush1.bf16.msra.mxu0 %v2994_v26  ;;  %v3933_v26 = vpack.c.bf16 %v760_v14, %v759_v13  ;;  %5290 = vst [vmem:[#allocation7_spill] sm:$0xff] %v4000_v0  ;;  %v767_v13 = vld [vmem:[%s5221_s2 + $0x3e0] sm:$0xff]  ;;  %v768_v14 = vld [vmem:[%s5221_s2 + $0x3e8] sm:$0xff] }
  0x66   : > { %2996 = vmatprep.subr.bf16.mxu0 %v5229_v3  ;;  %3175 = vmatpush1.bf16.msra.mxu1 %v3803_v30 }
  0x67   : > { %882 = vmatmul.mubr.f32.gmra.mrb[12].mxu1 %v2455_v9  ;;  %3160 = vmatprep.subr.bf16.mxu1 %v5229_v3  ;;  %v727_v9 = vld [vmem:[%s5221_s2 + $0x2a0] sm:$0xff]  ;;  %5285 = vst [vmem:[#allocation2_spill] sm:$0xff] %v3933_v26 }
  0x68   : > { %1107 = vmatmul.mubr.f32.gmra.mrb[12].mxu0 %v3815_v33  ;;  %886 = vmatprep.mubr.f32.mxu1 %v3818_v34  ;;  %v3009_v19 = vpack.c.bf16 %v728_v10, %v727_v9  ;;  %v736_v9 = vld [vmem:[%s5221_s2 + $0x2e8] sm:$0xff] }
  0x69   : > { %1111 = vmatprep.mubr.f32.mxu0 %v2458_v36  ;;  %2998 = vmatpush1.bf16.msra.mxu0 %v2997_v35  ;;  %v2463_v35 = vld [vmem:[%s3504_s24 + $0xa8] sm:$0xff] }
  0x6a   : > { %2999 = vmatprep.subr.bf16.mxu0 %v5229_v3  ;;  %3176 = vmatpush1.bf16.msra.mxu1 %v3829_v39 }
  0x6b   : > { %887 = vmatmul.mubr.f32.gmra.mrb[14].mxu1 %v2456_v18  ;;  %3161 = vmatprep.subr.bf16.mxu1 %v5229_v3  ;;  %v3922_v18 = vld [vmem:[%s3504_s24 + $0x81] sm:$0xff] }
  0x6c   : > { %1112 = vmatmul.mubr.f32.gmra.mrb[14].mxu0 %v3841_v43  ;;  %891 = vmatprep.mubr.f32.mxu1 %v3844_v44 }
  0x6d   : > { %1116 = vmatprep.mubr.f32.mxu0 %v2459_v46  ;;  %3001 = vmatpush1.bf16.msra.mxu0 %v3000_v45  ;;  %v3971_v45 = vld [vmem:[%s3504_s24 + $0x92] sm:$0xff] }
  0x6e   : > { %3002 = vmatprep.subr.bf16.mxu0 %v5229_v3  ;;  %3177 = vmatpush1.bf16.msra.mxu1 %v3855_v50 }
  0x6f   : > { %892 = vmatmul.mubr.f32.gmra.mrb[16].mxu1 %v2457_v27  ;;  %3162 = vmatprep.subr.bf16.mxu1 %v5229_v3  ;;  %v761_v27 = vld [vmem:[%s5221_s2 + $0x3b0] sm:$0xff] }
  0x70   : > { %1117 = vmatmul.mubr.f32.gmra.mrb[16].mxu0 %v3867_v54  ;;  %896 = vmatprep.mubr.f32.mxu1 %v3870_v55  ;;  %v3959_v38 = vpack.c.bf16 %v762_v28, %v761_v27  ;;  %v737_v27 = vld [vmem:[%s5221_s2 + $0x2f0] sm:$0xff]  ;;  %v738_v28 = vld [vmem:[%s5221_s2 + $0x2f8] sm:$0xff] }
  0x71   : > { %1121 = vmatprep.mubr.f32.mxu0 %v2460_v57  ;;  %3004 = vmatpush1.bf16.msra.mxu0 %v3003_v56  ;;  %v3985_v56 = vpack.c.bf16 %v764_v41, %v763_v40  ;;  %v771_v40 = vld [vmem:[%s5221_s2 + $0x400] sm:$0xff]  ;;  %v4058_v41 = vld [vmem:[%s3504_s24 + $0xb2] sm:$0xff]  ;;  %v3024_v51 = vpack.c.bf16 %v738_v28, %v737_v27 }
  0x72   : > { %3005 = vmatprep.subr.bf16.mxu0 %v5229_v3  ;;  %3178 = vmatpush1.bf16.msra.mxu1 %v3881_v63  ;;  %5286 = vst [vmem:[#allocation3_spill] sm:$0xff] %v3959_v38  ;;  %5295 = vst [vmem:[#allocation12_spill] sm:$0xff] %v4058_v41  ;;  %v4111_v27 = vld [vmem:[%s3504_s24 + $0xf8] sm:$0xff]  ;;  %v4118_v28 = vld [vmem:[%s3504_s24 + $0xe2] sm:$0xff] }
  0x73   : > { %897 = vmatmul.mubr.f32.gmra.mrb[18].mxu1 %v2458_v36  ;;  %3163 = vmatprep.subr.bf16.mxu1 %v5229_v3  ;;  %v731_v36 = vld [vmem:[%s5221_s2 + $0x2c0] sm:$0xff]  ;;  %5288 = vst [vmem:[#allocation5_spill] sm:$0xff] %v3985_v56  ;;  %5302 = vst [vmem:[#allocation19_spill] sm:$0xff] %v4118_v28 }
  0x74   : > { %1122 = vmatmul.mubr.f32.gmra.mrb[18].mxu0 %v3893_v2  ;;  %901 = vmatprep.mubr.f32.mxu1 %v3896_v5  ;;  %v3015_v47 = vpack.c.bf16 %v732_v37, %v731_v36  ;;  %v769_v36 = vld [vmem:[%s5221_s2 + $0x3f0] sm:$0xff]  ;;  %v770_v37 = vld [vmem:[%s5221_s2 + $0x3f8] sm:$0xff] }
  0x75   : > { %1126 = vmatprep.mubr.f32.mxu0 %v2461_v42  ;;  %3007 = vmatpush1.bf16.msra.mxu0 %v3006_v6  ;;  %v2465_v6 = vld [vmem:[%s3504_s24 + $0xc0] sm:$0xff] }
  0x76   : > { %3008 = vmatprep.subr.bf16.mxu0 %v5229_v3  ;;  %3179 = vmatpush1.bf16.msra.mxu1 %v3907_v11 }
  0x77   : > { %902 = vmatmul.mubr.f32.gmra.mrb[20].mxu1 %v2459_v46  ;;  %3164 = vmatprep.subr.bf16.mxu1 %v5229_v3  ;;  %v3974_v46 = vld [vmem:[%s3504_s24 + $0x99] sm:$0xff] }
  0x78   : > { %1127 = vmatmul.mubr.f32.gmra.mrb[20].mxu0 %v3919_v17  ;;  %906 = vmatprep.mubr.f32.mxu1 %v3922_v18  ;;  %5287 = vst [vmem:[#allocation4_spill] sm:$0xff] %v3974_v46 }
  0x79   : > { %1131 = vmatprep.mubr.f32.mxu0 %v2462_v20  ;;  %3010 = vmatpush1.bf16.msra.mxu0 %v3009_v19  ;;  %v4023_v19 = vld [vmem:[%s3504_s24 + $0xaa] sm:$0xff] }
  0x7a   : > { %3011 = vmatprep.subr.bf16.mxu0 %v5229_v3  ;;  %3180 = vmatpush1.bf16.msra.mxu1 %v3933_v26  ;;  %5292 = vst [vmem:[#allocation9_spill] sm:$0xff] %v4023_v19  ;;  %v4241_v26 = vld [vmem:[%s3504_s24 + $0x170] sm:$0xff] }
  0x7b   : > { %907 = vmatmul.mubr.f32.gmra.mrb[22].mxu1 %v2460_v57  ;;  %3165 = vmatprep.subr.bf16.mxu1 %v5229_v3  ;;  %v765_v57 = vld [vmem:[%s5221_s2 + $0x3d0] sm:$0xff] }
  0x7c   : > { %1132 = vmatmul.mubr.f32.gmra.mrb[22].mxu0 %v3945_v29  ;;  %911 = vmatprep.mubr.f32.mxu1 %v3948_v31  ;;  %v4011_v10 = vpack.c.bf16 %v766_v59, %v765_v57  ;;  %v4068_v57 = vpack.c.bf16 %v770_v37, %v769_v36  ;;  %v4121_v36 = vld [vmem:[%s3504_s24 + $0xf1] sm:$0xff]  ;;  %v4124_v37 = vld [vmem:[%s3504_s24 + $0x108] sm:$0xff] }
  0x7d   : > { %1136 = vmatprep.mubr.f32.mxu0 %v2463_v35  ;;  %3013 = vmatpush1.bf16.msra.mxu0 %v3012_v32  ;;  %v4039_v32 = vpack.c.bf16 %v768_v14, %v767_v13  ;;  %v4095_v13 = vld [vmem:[%s3504_s24 + $0xd9] sm:$0xff]  ;;  %v4098_v14 = vld [vmem:[%s3504_s24 + $0xf0] sm:$0xff] }
  0x7e   : > { %3014 = vmatprep.subr.bf16.mxu0 %v5229_v3  ;;  %3181 = vmatpush1.bf16.msra.mxu1 %v3959_v38  ;;  %5291 = vst [vmem:[#allocation8_spill] sm:$0xff] %v4011_v10  ;;  %5297 = vst [vmem:[#allocation14_spill] sm:$0xff] %v4068_v57  ;;  %v4225_v38 = vld [vmem:[%s3504_s24 + $0x151] sm:$0xff] }
  0x7f   : > { %912 = vmatmul.mubr.f32.gmra.mrb[24].mxu1 %v2461_v42  ;;  %3166 = vmatprep.subr.bf16.mxu1 %v5229_v3  ;;  %v735_v42 = vld [vmem:[%s5221_s2 + $0x2e0] sm:$0xff]  ;;  %5294 = vst [vmem:[#allocation11_spill] sm:$0xff] %v4039_v32  ;;  %5313 = vst [vmem:[#allocation30_spill] sm:$0xff] %v4225_v38 }
  0x80   : > { %1137 = vmatmul.mubr.f32.gmra.mrb[24].mxu0 %v3971_v45  ;;  %916 = vmatprep.mubr.f32.mxu1 %v3974_v46  ;;  %v4238_v46 = vld [vmem:[%s3504_s24 + $0x159] sm:$0xff] }
  0x81   : > { %1141 = vmatprep.mubr.f32.mxu0 %v2464_v49  ;;  %3016 = vmatpush1.bf16.msra.mxu0 %v3015_v47  ;;  %v4061_v47 = vld [vmem:[%s3504_s24 + $0xc1] sm:$0xff]  ;;  %5315 = vst [vmem:[#allocation32_spill] sm:$0xff] %v4238_v46 }
  0x82   : > { %3017 = vmatprep.subr.bf16.mxu0 %v5229_v3  ;;  %3182 = vmatpush1.bf16.msra.mxu1 %v3985_v56  ;;  %5296 = vst [vmem:[#allocation13_spill] sm:$0xff] %v4061_v47  ;;  %v4202_v56 = vld [vmem:[%s3504_s24 + $0x150] sm:$0xff] }
  0x83   : > { %917 = vmatmul.mubr.f32.gmra.mrb[26].mxu1 %v2462_v20  ;;  %3167 = vmatprep.subr.bf16.mxu1 %v5229_v3  ;;  %v3021_v20 = vpack.c.bf16 %v736_v9, %v735_v42  ;;  %v4080_v42 = vld [vmem:[%s3504_s24 + $0xc9] sm:$0xff]  ;;  %5309 = vst [vmem:[#allocation26_spill] sm:$0xff] %v4202_v56 }
  0x84   : > { %1142 = vmatmul.mubr.f32.gmra.mrb[26].mxu0 %v3997_v60  ;;  %921 = vmatprep.mubr.f32.mxu1 %v4000_v0  ;;  %5299 = vst [vmem:[#allocation16_spill] sm:$0xff] %v4080_v42  ;;  %v4092_v9 = vld [vmem:[%s3504_s24 + $0xca] sm:$0xff]  ;;  %v4215_v0 = vld [vmem:[%s3504_s24 + $0x158] sm:$0xff] }
  0x85   : > { %1146 = vmatprep.mubr.f32.mxu0 %v2465_v6  ;;  %3019 = vmatpush1.bf16.msra.mxu0 %v3018_v1  ;;  %v4077_v1 = vld [vmem:[%s3504_s24 + $0xc2] sm:$0xff]  ;;  %5300 = vst [vmem:[#allocation17_spill] sm:$0xff] %v4092_v9  ;;  %5311 = vst [vmem:[#allocation28_spill] sm:$0xff] %v4215_v0 }
  0x86   : > { %3020 = vmatprep.subr.bf16.mxu0 %v5229_v3  ;;  %3183 = vmatpush1.bf16.msra.mxu1 %v4011_v10  ;;  %5298 = vst [vmem:[#allocation15_spill] sm:$0xff] %v4077_v1  ;;  %v4186_v10 = vld [vmem:[%s3504_s24 + $0x129] sm:$0xff] }
  0x87   : > { %922 = vmatmul.mubr.f32.gmra.mrb[28].mxu1 %v2463_v35  ;;  %3168 = vmatprep.subr.bf16.mxu1 %v5229_v3  ;;  %v772_v35 = vld [vmem:[%s5221_s2 + $0x408] sm:$0xff] }
  0x88   : > { %1147 = vmatmul.mubr.f32.gmra.mrb[28].mxu0 %v4023_v19  ;;  %926 = vmatprep.mubr.f32.mxu1 %v4026_v22  ;;  %v4071_v59 = vpack.c.bf16 %v772_v35, %v771_v40  ;;  %v4131_v40 = vld [vmem:[%s3504_s24 + $0xf2] sm:$0xff]  ;;  %v4228_v19 = vld [vmem:[%s3504_s24 + $0x168] sm:$0xff] }
  0x89   : > { %1151 = vmatprep.mubr.f32.mxu0 %v4029_v23  ;;  %3022 = vmatpush1.bf16.msra.mxu0 %v3021_v20  ;;  %v4108_v20 = vld [vmem:[%s3504_s24 + $0xe1] sm:$0xff]  ;;  %5303 = vst [vmem:[#allocation20_spill] sm:$0xff] %v4131_v40  ;;  %v4134_v35 = vld [vmem:[%s3504_s24 + $0xf9] sm:$0xff]  ;;  %v4251_v60 = vld [vmem:[%s3504_s24 + $0x169] sm:$0xff] }
  0x8a   : > { %3023 = vmatprep.subr.bf16.mxu0 %v5229_v3  ;;  %3184 = vmatpush1.bf16.msra.mxu1 %v4039_v32  ;;  %v4163_v32 = vld [vmem:[%s3504_s24 + $0x128] sm:$0xff]  ;;  %v4199_v22 = vld [vmem:[%s3504_s24 + $0x139] sm:$0xff] }
  0x8b   : > { %927 = vmatmul.mubr.f32.gmra.mrb[30].mxu1 %v2464_v49  ;;  %3169 = vmatprep.subr.bf16.mxu1 %v5229_v3  ;;  %v4083_v49 = vld [vmem:[%s3504_s24 + $0xe0] sm:$0xff] }
  0x8c   : > { %1152 = vmatmul.mubr.f32.gmra.mrb[30].mxu0 %v4058_v41  ;;  %931 = vmatprep.mubr.f32.mxu1 %v4061_v47  ;;  %v4176_v47 = vld [vmem:[%s3504_s24 + $0x138] sm:$0xff]  ;;  %v4212_v41 = vld [vmem:[%s3504_s24 + $0x141] sm:$0xff] }
  0x8d   : > { %1156 = vmatprep.mubr.f32.mxu0 %v4064_v52  ;;  %3025 = vmatpush1.bf16.msra.mxu0 %v3024_v51  ;;  %v4137_v51 = vld [vmem:[%s3504_s24 + $0x110] sm:$0xff] }
  0x8e   : > { %3185 = vmatpush1.bf16.msra.mxu1 %v4068_v57  ;;  %3026 = vmatprep.subr.bf16.mxu0 %v5229_v3  ;;  %v4144_v3 = vld [vmem:[%s3504_s24 + $0xfa] sm:$0xff] }
  0x8f   : > { %932 = vmatmul.mubr.f32.gmra.mrb[32].mxu1 %v2465_v6  ;;  %3075 = vmatprep.subr.bf16.mxu1 %v4071_v59  ;;  %v4105_v6 = vld [vmem:[%s3504_s24 + $0xda] sm:$0xff]  ;;  %5304 = vst [vmem:[#allocation21_spill] sm:$0xff] %v4144_v3 }
  0x90   : > { %1157 = vmatmul.mubr.f32.gmra.mrb[32].mxu0 %v4077_v1  ;;  %936 = vmatprep.mubr.f32.mxu1 %v4080_v42  ;;  %5301 = vst [vmem:[#allocation18_spill] sm:$0xff] %v4105_v6  ;;  %v4150_v57 = vld [vmem:[%s3504_s24 + $0x120] sm:$0xff] }
  0x91   : > { %1161 = vmatprep.mubr.f32.mxu0 %v4083_v49  ;;  %v4189_v1 = vld [vmem:[%s3504_s24 + $0x140] sm:$0xff] }
  0x93   : > { %937 = vmatmul.mubr.f32.gmra.mrb[34].mxu1 %v4029_v23 }
  0x94   : > { %1162 = vmatmul.mubr.f32.gmra.mrb[34].mxu0 %v4092_v9  ;;  %941 = vmatprep.mubr.f32.mxu1 %v4095_v13  ;;  %v4173_v9 = vld [vmem:[%s3504_s24 + $0x121] sm:$0xff] }
  0x95   : > { %1166 = vmatprep.mubr.f32.mxu0 %v4098_v14 }
  0x97   : > { %942 = vmatmul.mubr.f32.gmra.mrb[36].mxu1 %v4064_v52 }
  0x98   : > { %1167 = vmatmul.mubr.f32.gmra.mrb[36].mxu0 %v4105_v6  ;;  %946 = vmatprep.mubr.f32.mxu1 %v4108_v20  ;;  %v4160_v6 = vld [vmem:[%s3504_s24 + $0x111] sm:$0xff] }
  0x99   : > { %1171 = vmatprep.mubr.f32.mxu0 %v4111_v27 }
  0x9b   : > { %947 = vmatmul.mubr.f32.gmra.mrb[38].mxu1 %v4083_v49 }
  0x9c   : > { %1172 = vmatmul.mubr.f32.gmra.mrb[38].mxu0 %v4118_v28  ;;  %951 = vmatprep.mubr.f32.mxu1 %v4121_v36  ;;  %v4147_v28 = vld [vmem:[%s3504_s24 + $0x109] sm:$0xff] }
  0x9d   : > { %1176 = vmatprep.mubr.f32.mxu0 %v4124_v37 }
  0x9f   : > { %952 = vmatmul.mubr.f32.gmra.mrb[40].mxu1 %v4098_v14 }
  0xa0   : > { %1177 = vmatmul.mubr.f32.gmra.mrb[40].mxu0 %v4131_v40  ;;  %956 = vmatprep.mubr.f32.mxu1 %v4134_v35  ;;  %v4157_v40 = vld [vmem:[%s3504_s24 + $0x10a] sm:$0xff] }
  0xa1   : > { %1181 = vmatprep.mubr.f32.mxu0 %v4137_v51  ;;  %5305 = vst [vmem:[#allocation22_spill] sm:$0xff] %v4157_v40 }
  0xa3   : > { %957 = vmatmul.mubr.f32.gmra.mrb[42].mxu1 %v4111_v27 }
  0xa4   : > { %1182 = vmatmul.mubr.f32.gmra.mrb[42].mxu0 %v4144_v3  ;;  %961 = vmatprep.mubr.f32.mxu1 %v4147_v28  ;;  %v4170_v3 = vld [vmem:[%s3504_s24 + $0x112] sm:$0xff] }
  0xa5   : > { %1186 = vmatprep.mubr.f32.mxu0 %v4150_v57  ;;  %5306 = vst [vmem:[#allocation23_spill] sm:$0xff] %v4170_v3 }
  0xa7   : > { %962 = vmatmul.mubr.f32.gmra.mrb[44].mxu1 %v4124_v37 }
  0xa8   : > { %1187 = vmatmul.mubr.f32.gmra.mrb[44].mxu0 %v4157_v40  ;;  %966 = vmatprep.mubr.f32.mxu1 %v4160_v6  ;;  %v4183_v40 = vld [vmem:[%s3504_s24 + $0x122] sm:$0xff] }
  0xa9   : > { %1191 = vmatprep.mubr.f32.mxu0 %v4163_v32  ;;  %5307 = vst [vmem:[#allocation24_spill] sm:$0xff] %v4183_v40 }
  0xab   : > { %967 = vmatmul.mubr.f32.gmra.mrb[46].mxu1 %v4137_v51 }
  0xac   : > { %1192 = vmatmul.mubr.f32.gmra.mrb[46].mxu0 %v4170_v3  ;;  %971 = vmatprep.mubr.f32.mxu1 %v4173_v9  ;;  %v4196_v3 = vld [vmem:[%s3504_s24 + $0x12a] sm:$0xff] }
  0xad   : > { %1196 = vmatprep.mubr.f32.mxu0 %v4176_v47  ;;  %5308 = vst [vmem:[#allocation25_spill] sm:$0xff] %v4196_v3 }
  0xaf   : > { %972 = vmatmul.mubr.f32.gmra.mrb[48].mxu1 %v4150_v57 }
  0xb0   : > { %1197 = vmatmul.mubr.f32.gmra.mrb[48].mxu0 %v4183_v40  ;;  %976 = vmatprep.mubr.f32.mxu1 %v4186_v10  ;;  %v4209_v40 = vld [vmem:[%s3504_s24 + $0x13a] sm:$0xff] }
  0xb1   : > { %1201 = vmatprep.mubr.f32.mxu0 %v4189_v1  ;;  %5310 = vst [vmem:[#allocation27_spill] sm:$0xff] %v4209_v40 }
  0xb3   : > { %977 = vmatmul.mubr.f32.gmra.mrb[50].mxu1 %v4163_v32 }
  0xb4   : > { %1202 = vmatmul.mubr.f32.gmra.mrb[50].mxu0 %v4196_v3  ;;  %981 = vmatprep.mubr.f32.mxu1 %v4199_v22  ;;  %v4222_v3 = vld [vmem:[%s3504_s24 + $0x142] sm:$0xff] }
  0xb5   : > { %1206 = vmatprep.mubr.f32.mxu0 %v4202_v56  ;;  %5312 = vst [vmem:[#allocation29_spill] sm:$0xff] %v4222_v3 }
  0xb7   : > { %982 = vmatmul.mubr.f32.gmra.mrb[52].mxu1 %v4176_v47 }
  0xb8   : > { %1207 = vmatmul.mubr.f32.gmra.mrb[52].mxu0 %v4209_v40  ;;  %986 = vmatprep.mubr.f32.mxu1 %v4212_v41  ;;  %v4235_v40 = vld [vmem:[%s3504_s24 + $0x152] sm:$0xff] }
  0xb9   : > { %1211 = vmatprep.mubr.f32.mxu0 %v4215_v0  ;;  %5314 = vst [vmem:[#allocation31_spill] sm:$0xff] %v4235_v40 }
  0xbb   : > { %987 = vmatmul.mubr.f32.gmra.mrb[54].mxu1 %v4189_v1 }
  0xbc   : > { %1212 = vmatmul.mubr.f32.gmra.mrb[54].mxu0 %v4222_v3  ;;  %991 = vmatprep.mubr.f32.mxu1 %v4225_v38  ;;  %v4248_v3 = vld [vmem:[%s3504_s24 + $0x15a] sm:$0xff] }
  0xbd   : > { %1216 = vmatprep.mubr.f32.mxu0 %v4228_v19  ;;  %5316 = vst [vmem:[#allocation33_spill] sm:$0xff] %v4248_v3  ;;  %v4254_v38 = vld [vmem:[%s3504_s24 + $0x180] sm:$0xff] }
  0xbf   : > { %992 = vmatmul.mubr.f32.gmra.mrb[56].mxu1 %v4202_v56  ;;  %v4267_v56 = vld [vmem:[%s3504_s24 + $0x188] sm:$0xff] }
  0xc0   : > { %1217 = vmatmul.mubr.f32.gmra.mrb[56].mxu0 %v4235_v40  ;;  %996 = vmatprep.mubr.f32.mxu1 %v4238_v46  ;;  %v4261_v40 = vld [vmem:[%s3504_s24 + $0x16a] sm:$0xff]  ;;  %5318 = vst [vmem:[#allocation35_spill] sm:$0xff] %v4267_v56 }
  0xc1   : > { %1221 = vmatprep.mubr.f32.mxu0 %v4241_v26  ;;  %5317 = vst [vmem:[#allocation34_spill] sm:$0xff] %v4261_v40  ;;  %v4264_v46 = vld [vmem:[%s3504_s24 + $0x171] sm:$0xff] }
  0xc3   : > { %997 = vmatmul.mubr.f32.gmra.mrb[58].mxu1 %v4215_v0  ;;  %v4274_v0 = vld [vmem:[%s3504_s24 + $0x172] sm:$0xff] }
  0xc4   : > { %1222 = vmatmul.mubr.f32.gmra.mrb[58].mxu0 %v4248_v3  ;;  %1001 = vmatprep.mubr.f32.mxu1 %v4251_v60  ;;  %5319 = vst [vmem:[#allocation36_spill] sm:$0xff] %v4274_v0  ;;  %v773_v3 = vld [vmem:[%s5221_s2 + $0x410] sm:$0xff] }
  0xc5   : > { %1226 = vmatprep.mubr.f32.mxu0 %v4254_v38 }
  0xc7   : > { %1002 = vmatmul.mubr.f32.gmra.mrb[60].mxu1 %v4228_v19 }
  0xc8   : > { %1227 = vmatmul.mubr.f32.gmra.mrb[60].mxu0 %v4261_v40  ;;  %1006 = vmatprep.mubr.f32.mxu1 %v4264_v46  ;;  %v774_v40 = vld [vmem:[%s5221_s2 + $0x418] sm:$0xff] }
  0xc9   : > { %1231 = vmatprep.mubr.f32.mxu0 %v4267_v56  ;;  %v3078_v56 = vpack.c.bf16 %v774_v40, %v773_v3  ;;  %v5346_v40 = vld [vmem:[#allocation22_spill] sm:$0xff] }
  0xcb   : > { %1007 = vmatmul.mubr.f32.gmra.mrb[62].mxu1 %v4241_v26 }
  0xcc   : > { %1232 = vmatmul.mubr.f32.gmra.mrb[62].mxu0 %v4274_v0  ;;  %1591 = vmatprep.mubr.f32.mxu1 %v4080_v42  ;;  %v775_v0 = vld [vmem:[%s5221_s2 + $0x420] sm:$0xff]  ;;  %v776_v42 = vld [vmem:[%s5221_s2 + $0x428] sm:$0xff] }
  0xcd   : > { %1301 = vmatprep.mubr.f32.mxu0 %v3710_v61  ;;  %v5320_v61 = vmov 0.0|0.0   ;;  %v3082_v3 = vpack.c.bf16 %v776_v42, %v775_v0  ;;  %v5337_v0 = vld [vmem:[#allocation17_spill] sm:$0xff]  ;;  %v2578_v42 = vld [vmem:[%s3504_s24 + $0x1a0] sm:$0xff] }
  0xcf   : > { %1592 = vmatmul.mubr.f32.vlgmr.msra.gmra.mrb[64].mxu1 %v4029_v23  ;;  %v5338_v23 = vld [vmem:[#allocation11_spill] sm:$0xff] }
  0xd0   : > { %1302 = vmatmul.mubr.f32.vlgmr.msra.gmra.mrb[0].mxu0 %v3688_v53  ;;  %1596 = vmatprep.mubr.f32.mxu1 %v4095_v13  ;;  %v777_v53 = vld [vmem:[%s5221_s2 + $0x430] sm:$0xff] }
  0xd1   : > { %3028 = vmatpush1.bf16.msra.mxu0 %v3677_v48  ;;  %1306 = vmatprep.mubr.f32.mxu0 %v3737_v7  ;;  %v778_v48 = vld [vmem:[%s5221_s2 + $0x438] sm:$0xff]  ;;  %v779_v7 = vld [vmem:[%s5221_s2 + $0x440] sm:$0xff] }
  0xd2   : > { %3029 = vmatprep.subr.bf16.mxu0 %v5320_v61  ;;  %3077 = vmatpush3.bf16.msra.mxu1 %v4071_v59  ;;  %v2577_v59 = vld [vmem:[%s3504_s24 + $0x198] sm:$0xff] }
  0xd3   : > { %1597 = vmatmul.mubr.f32.gmra.mrb[66].mxu1 %v4064_v52  ;;  %3079 = vmatprep.subr.bf16.mxu1 %v3078_v56  ;;  %v5341_v52 = vld [vmem:[#allocation14_spill] sm:$0xff] }
  0xd4   : > { %1307 = vmatmul.mubr.f32.gmra.mrb[2].mxu0 %v3713_v62  ;;  %1601 = vmatprep.mubr.f32.mxu1 %v4108_v20  ;;  %v3086_v62 = vpack.c.bf16 %v778_v48, %v777_v53  ;;  %v2617_v53 = vld [vmem:[%s3504_s24 + $0x7a] sm:$0xff] }
  0xd5   : > { %1311 = vmatprep.mubr.f32.mxu0 %v3763_v15  ;;  %3031 = vmatpush1.bf16.msra.mxu0 %v3699_v58  ;;  %v780_v15 = vld [vmem:[%s5221_s2 + $0x448] sm:$0xff] }
  0xd6   : > { %3032 = vmatprep.subr.bf16.mxu0 %v5320_v61  ;;  %3081 = vmatpush3.bf16.msra.mxu1 %v3078_v56  ;;  %v3090_v58 = vpack.c.bf16 %v780_v15, %v779_v7  ;;  %v5336_v56 = vld [vmem:[#allocation13_spill] sm:$0xff]  ;;  %v5348_v7 = vld [vmem:[#allocation24_spill] sm:$0xff] }
  0xd7   : > { %1602 = vmatmul.mubr.f32.gmra.mrb[68].mxu1 %v4083_v49  ;;  %3083 = vmatprep.subr.bf16.mxu1 %v3082_v3  ;;  %v5344_v49 = vld [vmem:[#allocation20_spill] sm:$0xff] }
  0xd8   : > { %1312 = vmatmul.mubr.f32.gmra.mrb[4].mxu0 %v3740_v8  ;;  %1606 = vmatprep.mubr.f32.mxu1 %v4121_v36  ;;  %v781_v8 = vld [vmem:[%s5221_s2 + $0x450] sm:$0xff] }
  0xd9   : > { %1316 = vmatprep.mubr.f32.mxu0 %v3789_v24  ;;  %3034 = vmatpush1.bf16.msra.mxu0 %v3724_v4  ;;  %v782_v24 = vld [vmem:[%s5221_s2 + $0x458] sm:$0xff] }
  0xda   : > { %3035 = vmatprep.subr.bf16.mxu0 %v5320_v61  ;;  %3085 = vmatpush3.bf16.msra.mxu1 %v3082_v3  ;;  %v3094_v4 = vpack.c.bf16 %v782_v24, %v781_v8  ;;  %v5347_v3 = vld [vmem:[#allocation23_spill] sm:$0xff]  ;;  %v2619_v15 = vld [vmem:[%s3504_s24 + $0x92] sm:$0xff]  ;;  %v2620_v8 = vld [vmem:[%s3504_s24 + $0x9a] sm:$0xff] }
  0xdb   : > { %1607 = vmatmul.mubr.f32.gmra.mrb[70].mxu1 %v4098_v14  ;;  %3087 = vmatprep.subr.bf16.mxu1 %v3086_v62  ;;  %v2611_v14 = vld [vmem:[%s3504_s24 + $0x32] sm:$0xff] }
  0xdc   : > { %1317 = vmatmul.mubr.f32.gmra.mrb[6].mxu0 %v3766_v16  ;;  %1611 = vmatprep.mubr.f32.mxu1 %v4134_v35  ;;  %v783_v16 = vld [vmem:[%s5221_s2 + $0x460] sm:$0xff]  ;;  %v5349_v24 = vld [vmem:[#allocation25_spill] sm:$0xff] }
  0xdd   : > { %1321 = vmatprep.mubr.f32.mxu0 %v3815_v33  ;;  %3037 = vmatpush1.bf16.msra.mxu0 %v3751_v12  ;;  %v784_v33 = vld [vmem:[%s5221_s2 + $0x468] sm:$0xff] }
  0xde   : > { %3038 = vmatprep.subr.bf16.mxu0 %v5320_v61  ;;  %3089 = vmatpush3.bf16.msra.mxu1 %v3086_v62  ;;  %v3098_v12 = vpack.c.bf16 %v784_v33, %v783_v16  ;;  %v2618_v62 = vld [vmem:[%s3504_s24 + $0x82] sm:$0xff]  ;;  %v2622_v33 = vld [vmem:[%s3504_s24 + $0xb2] sm:$0xff] }
  0xdf   : > { %1612 = vmatmul.mubr.f32.gmra.mrb[72].mxu1 %v4111_v27  ;;  %3091 = vmatprep.subr.bf16.mxu1 %v3090_v58  ;;  %v5345_v27 = vld [vmem:[#allocation21_spill] sm:$0xff] }
  0xe0   : > { %1322 = vmatmul.mubr.f32.gmra.mrb[8].mxu0 %v3792_v25  ;;  %1616 = vmatprep.mubr.f32.mxu1 %v4147_v28  ;;  %v785_v25 = vld [vmem:[%s5221_s2 + $0x470] sm:$0xff] }
  0xe1   : > { %1326 = vmatprep.mubr.f32.mxu0 %v3841_v43  ;;  %3040 = vmatpush1.bf16.msra.mxu0 %v3777_v21  ;;  %v786_v43 = vld [vmem:[%s5221_s2 + $0x478] sm:$0xff] }
  0xe2   : > { %3041 = vmatprep.subr.bf16.mxu0 %v5320_v61  ;;  %3093 = vmatpush3.bf16.msra.mxu1 %v3090_v58  ;;  %v3102_v21 = vpack.c.bf16 %v786_v43, %v785_v25 }
  0xe3   : > { %1617 = vmatmul.mubr.f32.gmra.mrb[74].mxu1 %v4124_v37  ;;  %3095 = vmatprep.subr.bf16.mxu1 %v3094_v4  ;;  %v2613_v37 = vld [vmem:[%s3504_s24 + $0x4a] sm:$0xff] }
  0xe4   : > { %1327 = vmatmul.mubr.f32.gmra.mrb[10].mxu0 %v3818_v34  ;;  %1621 = vmatprep.mubr.f32.mxu1 %v4160_v6  ;;  %v5322_v34 = vld [vmem:[#allocation6_spill] sm:$0xff] }
  0xe5   : > { %1331 = vmatprep.mubr.f32.mxu0 %v3867_v54  ;;  %3043 = vmatpush1.bf16.msra.mxu0 %v3803_v30  ;;  %v5321_v30 = vld [vmem:[#allocation30_spill] sm:$0xff]  ;;  %v5326_v54 = vld [vmem:[#allocation32_spill] sm:$0xff] }
  0xe6   : > { %3044 = vmatprep.subr.bf16.mxu0 %v5320_v61  ;;  %3097 = vmatpush3.bf16.msra.mxu1 %v3094_v4  ;;  %v2621_v4 = vld [vmem:[%s3504_s24 + $0xaa] sm:$0xff] }
  0xe7   : > { %1622 = vmatmul.mubr.f32.gmra.mrb[76].mxu1 %v4137_v51  ;;  %3099 = vmatprep.subr.bf16.mxu1 %v3098_v12  ;;  %v2615_v51 = vld [vmem:[%s3504_s24 + $0x62] sm:$0xff] }
  0xe8   : > { %1332 = vmatmul.mubr.f32.gmra.mrb[12].mxu0 %v3844_v44  ;;  %1626 = vmatprep.mubr.f32.mxu1 %v4173_v9  ;;  %v5324_v44 = vld [vmem:[#allocation26_spill] sm:$0xff] }
  0xe9   : > { %1336 = vmatprep.mubr.f32.mxu0 %v3893_v2  ;;  %3046 = vmatpush1.bf16.msra.mxu0 %v3829_v39  ;;  %v5323_v39 = vld [vmem:[#allocation2_spill] sm:$0xff]  ;;  %v5329_v2 = vld [vmem:[#allocation28_spill] sm:$0xff] }
  0xea   : > { %3047 = vmatprep.subr.bf16.mxu0 %v5320_v61  ;;  %3101 = vmatpush3.bf16.msra.mxu1 %v3098_v12  ;;  %v5350_v12 = vld [vmem:[#allocation27_spill] sm:$0xff] }
  0xeb   : > { %1627 = vmatmul.mubr.f32.gmra.mrb[78].mxu1 %v4150_v57  ;;  %3103 = vmatprep.subr.bf16.mxu1 %v3102_v21  ;;  %v5342_v57 = vld [vmem:[#allocation35_spill] sm:$0xff] }
  0xec   : > { %1337 = vmatmul.mubr.f32.gmra.mrb[14].mxu0 %v3870_v55  ;;  %1631 = vmatprep.mubr.f32.mxu1 %v4186_v10  ;;  %v5327_v55 = vld [vmem:[#allocation9_spill] sm:$0xff] }
  0xed   : > { %1341 = vmatprep.mubr.f32.mxu0 %v3919_v17  ;;  %3049 = vmatpush1.bf16.msra.mxu0 %v3855_v50  ;;  %v5325_v50 = vld [vmem:[#allocation4_spill] sm:$0xff]  ;;  %v5332_v17 = vld [vmem:[#allocation5_spill] sm:$0xff] }
  0xee   : > { %3050 = vmatprep.subr.bf16.mxu0 %v5320_v61  ;;  %3105 = vmatpush3.bf16.msra.mxu1 %v3102_v21 }
  0xef   : > { %1632 = vmatmul.mubr.f32.gmra.mrb[80].mxu1 %v4163_v32  ;;  %3106 = vmatprep.subr.bf16.mxu1 %v5320_v61  ;;  %v5339_v32 = vld [vmem:[#allocation16_spill] sm:$0xff] }
  0xf0   : > { %1342 = vmatmul.mubr.f32.gmra.mrb[16].mxu0 %v3896_v5  ;;  %1636 = vmatprep.mubr.f32.mxu1 %v4199_v22  ;;  %v5330_v5 = vld [vmem:[#allocation7_spill] sm:$0xff] }
  0xf1   : > { %1346 = vmatprep.mubr.f32.mxu0 %v3945_v29  ;;  %3052 = vmatpush1.bf16.msra.mxu0 %v3881_v63  ;;  %v5328_v63 = vld [vmem:[#allocation3_spill] sm:$0xff] }
  0xf2   : > { %3053 = vmatprep.subr.bf16.mxu0 %v5320_v61  ;;  %v5334_v29 = vld [vmem:[#allocation15_spill] sm:$0xff] }
  0xf3   : > { %1637 = vmatmul.mubr.f32.gmra.mrb[82].mxu1 %v4176_v47  ;;  %v2609_v47 = vld [vmem:[%s3504_s24 + $0x199] sm:$0xff] }
  0xf4   : > { %1347 = vmatmul.mubr.f32.gmra.mrb[18].mxu0 %v3922_v18  ;;  %1641 = vmatprep.mubr.f32.mxu1 %v4212_v41  ;;  %v5333_v18 = vld [vmem:[#allocation10_spill] sm:$0xff] }
  0xf5   : > { %1351 = vmatprep.mubr.f32.mxu0 %v3971_v45  ;;  %3055 = vmatpush1.bf16.msra.mxu0 %v3907_v11  ;;  %v5331_v11 = vld [vmem:[#allocation12_spill] sm:$0xff] }
  0xf6   : > { %3056 = vmatprep.subr.bf16.mxu0 %v5320_v61  ;;  %v5335_v45 = vld [vmem:[#allocation8_spill] sm:$0xff] }
  0xf7   : > { %1642 = vmatmul.mubr.f32.gmra.mrb[84].mxu1 %v4189_v1  ;;  %v5343_v1 = vld [vmem:[#allocation19_spill] sm:$0xff] }
  0xf8   : > { %1352 = vmatmul.mubr.f32.gmra.mrb[20].mxu0 %v3948_v31  ;;  %1646 = vmatprep.mubr.f32.mxu1 %v5321_v30  ;;  %v4407_v31 = vld [vmem:[%s3504_s24 + $0x181] sm:$0xff] }
  0xf9   : > { %1356 = vmatprep.mubr.f32.mxu0 %v5322_v34  ;;  %3058 = vmatpush1.bf16.msra.mxu0 %v5323_v39 }
  0xfa   : > { %3059 = vmatprep.subr.bf16.mxu0 %v5320_v61 }
  0xfb   : > { %1647 = vmatmul.mubr.f32.gmra.mrb[86].mxu1 %v5324_v44  ;;  %v5353_v44 = vld [vmem:[#allocation33_spill] sm:$0xff] }
  0xfc   : > { %1357 = vmatmul.mubr.f32.gmra.mrb[22].mxu0 %v5325_v50  ;;  %1651 = vmatprep.mubr.f32.mxu1 %v5326_v54 }
  0xfd   : > { %1361 = vmatprep.mubr.f32.mxu0 %v5327_v55  ;;  %3061 = vmatpush1.bf16.msra.mxu0 %v5328_v63  ;;  %v5354_v55 = vld [vmem:[#allocation34_spill] sm:$0xff] }
  0xfe   : > { %3062 = vmatprep.subr.bf16.mxu0 %v5320_v61 }
  0xff   : > { %1652 = vmatmul.mubr.f32.gmra.mrb[88].mxu1 %v5329_v2  ;;  %v5355_v2 = vld [vmem:[#allocation36_spill] sm:$0xff] }
 0x100   : > { %1362 = vmatmul.mubr.f32.gmra.mrb[24].mxu0 %v5330_v5  ;;  %1656 = vmatprep.mubr.f32.mxu1 %v4251_v60  ;;  %v2545_v5 = vld [vmem:[%s3504_s24 + $0x182] sm:$0xff] }
 0x101   : > { %1366 = vmatprep.mubr.f32.mxu0 %v5331_v11  ;;  %3064 = vmatpush1.bf16.msra.mxu0 %v5332_v17  ;;  %v2546_v17 = vld [vmem:[%s3504_s24 + $0x18a] sm:$0xff] }
 0x102   : > { %3065 = vmatprep.subr.bf16.mxu0 %v5320_v61 }
 0x103   : > { %1657 = vmatmul.mubr.f32.gmra.mrb[90].mxu1 %v4228_v19  ;;  %v4416_v19 = vld [vmem:[%s3504_s24 + $0x189] sm:$0xff] }
 0x104   : > { %1367 = vmatmul.mubr.f32.gmra.mrb[26].mxu0 %v5333_v18  ;;  %1661 = vmatprep.mubr.f32.mxu1 %v4264_v46 }
 0x105   : > { %1371 = vmatprep.mubr.f32.mxu0 %v5334_v29  ;;  %3067 = vmatpush1.bf16.msra.mxu0 %v5335_v45 }
 0x106   : > { %3068 = vmatprep.subr.bf16.mxu0 %v5320_v61 }
 0x107   : > { %1662 = vmatmul.mubr.f32.gmra.mrb[92].mxu1 %v4241_v26  ;;  %v5340_v26 = vld [vmem:[#allocation18_spill] sm:$0xff] }
 0x108   : > { %1372 = vmatmul.mubr.f32.gmra.mrb[28].mxu0 %v5336_v56  ;;  %1666 = vmatprep.mubr.f32.mxu1 %v4407_v31  ;;  %v2547_v56 = vld [vmem:[%s3504_s24 + $0x30] sm:$0xff] }
 0x109   : > { %1376 = vmatprep.mubr.f32.mxu0 %v5337_v0  ;;  %3070 = vmatpush1.bf16.msra.mxu0 %v5338_v23 }
 0x10a   : > { %3071 = vmatprep.subr.bf16.mxu0 %v5320_v61 }
 0x10b   : > { %1667 = vmatmul.mubr.f32.gmra.mrb[94].mxu1 %v4254_v38  ;;  %v2610_v38 = vld [vmem:[%s3504_s24 + $0x1a1] sm:$0xff] }
 0x10c   : > { %1377 = vmatmul.mubr.f32.gmra.mrb[30].mxu0 %v5339_v32  ;;  %1671 = vmatprep.mubr.f32.mxu1 %v4416_v19  ;;  %v2548_v32 = vld [vmem:[%s3504_s24 + $0x38] sm:$0xff] }
 0x10d   : > { %1381 = vmatprep.mubr.f32.mxu0 %v5340_v26  ;;  %3073 = vmatpush1.bf16.msra.mxu0 %v5341_v52 }
 0x10f   : > { %1672 = vmatmul.mubr.f32.gmra.mrb[96].mxu1 %v5342_v57  ;;  %v2642_v57 = vld [vmem:[%s3504_s24 + $0x1a2] sm:$0xff] }
 0x110   : > { %1382 = vmatmul.mubr.f32.gmra.mrb[32].mxu0 %v4095_v13  ;;  %1676 = vmatprep.mubr.f32.mxu1 %v2609_v47  ;;  %v2612_v13 = vld [vmem:[%s3504_s24 + $0x3a] sm:$0xff] }
 0x111   : > { %1386 = vmatprep.mubr.f32.mxu0 %v5343_v1 }
 0x113   : > { %1677 = vmatmul.mubr.f32.gmra.mrb[98].mxu1 %v2577_v59  ;;  %v2549_v59 = vld [vmem:[%s3504_s24 + $0x48] sm:$0xff] }
 0x114   : > { %1387 = vmatmul.mubr.f32.gmra.mrb[34].mxu0 %v4108_v20  ;;  %1681 = vmatprep.mubr.f32.mxu1 %v2610_v38  ;;  %v2614_v20 = vld [vmem:[%s3504_s24 + $0x52] sm:$0xff] }
 0x115   : > { %1391 = vmatprep.mubr.f32.mxu0 %v5344_v49 }
 0x117   : > { %1682 = vmatmul.mubr.f32.gmra.mrb[100].mxu1 %v2578_v42 }
 0x118   : > { %1392 = vmatmul.mubr.f32.gmra.mrb[36].mxu0 %v4121_v36  ;;  %2764 = vmatprep.mubr.f32.mxu1 %v2611_v14  ;;  %v2616_v36 = vld [vmem:[%s3504_s24 + $0x6a] sm:$0xff]  ;;  %v2583_v14 = vld [vmem:[%s3504_s24 + $0x61] sm:$0xff] }
 0x119   : > { %1396 = vmatprep.mubr.f32.mxu0 %v5345_v27 }
 0x11b   : > { %2765 = vmatmul.mubr.f32.vlgmr.msra.gmra.mrb[102].mxu1 %v2612_v13 }
 0x11c   : > { %1397 = vmatmul.mubr.f32.gmra.mrb[38].mxu0 %v4134_v35  ;;  %2767 = vmatprep.mubr.f32.mxu1 %v2613_v37  ;;  %v2551_v37 = vld [vmem:[%s3504_s24 + $0x60] sm:$0xff] }
 0x11d   : > { %1401 = vmatprep.mubr.f32.mxu0 %v5346_v40 }
 0x11f   : > { %2768 = vmatmul.mubr.f32.gmra.mrb[104].mxu1 %v2614_v20  ;;  %v2584_v20 = vld [vmem:[%s3504_s24 + $0x69] sm:$0xff] }
 0x120   : > { %1402 = vmatmul.mubr.f32.gmra.mrb[40].mxu0 %v4147_v28  ;;  %2770 = vmatprep.mubr.f32.mxu1 %v2615_v51 }
 0x121   : > { %1406 = vmatprep.mubr.f32.mxu0 %v5347_v3 }
 0x122   : > { %v4447_v48 = vpop.f32.mrb[0].mxu1 }
 0x123   : > { %2771 = vmatmul.mubr.f32.gmra.mrb[106].mxu1 %v2616_v36  ;;  %v855_v35 = vpop.f32.mrb[1].mxu1  ;;  %v2552_v36 = vld [vmem:[%s3504_s24 + $0x68] sm:$0xff] }
 0x124   : > { %1407 = vmatmul.mubr.f32.gmra.mrb[42].mxu0 %v4160_v6  ;;  %2773 = vmatprep.mubr.f32.mxu1 %v2617_v53 }
 0x125   : > { %1411 = vmatprep.mubr.f32.mxu0 %v5348_v7 }
 0x126   : > { %v4453_v28 = vpop.f32.mrb[2].mxu1 }
 0x127   : > { %2774 = vmatmul.mubr.f32.gmra.mrb[108].mxu1 %v2618_v62  ;;  %v860_v58 = vpop.f32.mrb[3].mxu1  ;;  %v2553_v62 = vld [vmem:[%s3504_s24 + $0x78] sm:$0xff] }
 0x128   : > { %1412 = vmatmul.mubr.f32.gmra.mrb[44].mxu0 %v4173_v9  ;;  %2776 = vmatprep.mubr.f32.mxu1 %v2619_v15  ;;  %v5351_v9 = vld [vmem:[#allocation29_spill] sm:$0xff] }
 0x129   : > { %1416 = vmatprep.mubr.f32.mxu0 %v5349_v24 }
 0x12a   : > { %v4459_v16 = vpop.f32.mrb[4].mxu1 }
 0x12b   : > { %2777 = vmatmul.mubr.f32.gmra.mrb[110].mxu1 %v2620_v8  ;;  %v865_v6 = vpop.f32.mrb[5].mxu1  ;;  %v2554_v8 = vld [vmem:[%s3504_s24 + $0x80] sm:$0xff] }
 0x12c   : > { %1417 = vmatmul.mubr.f32.gmra.mrb[46].mxu0 %v4186_v10  ;;  %2779 = vmatprep.mubr.f32.mxu1 %v2621_v4  ;;  %v5352_v10 = vld [vmem:[#allocation31_spill] sm:$0xff] }
 0x12d   : > { %1421 = vmatprep.mubr.f32.mxu0 %v5350_v12 }
 0x12e   : > { %v4464_v25 = vpop.f32.mrb[6].mxu1 }
 0x12f   : > { %2780 = vmatmul.mubr.f32.gmra.mrb[112].mxu1 %v2622_v33  ;;  %v870_v43 = vpop.f32.mrb[7].mxu1  ;;  %v2555_v33 = vld [vmem:[%s3504_s24 + $0x90] sm:$0xff] }
 0x130   : > { %1422 = vmatmul.mubr.f32.gmra.mrb[48].mxu0 %v4199_v22  ;;  %2782 = vmatprep.mubr.f32.mxu1 %v5334_v29  ;;  %v2579_v29 = vld [vmem:[%s3504_s24 + $0x31] sm:$0xff] }
 0x131   : > { %1426 = vmatprep.mubr.f32.mxu0 %v5351_v9 }
 0x132   : > { %v4469_v21 = vpop.f32.mrb[8].mxu1 }
 0x133   : > { %2783 = vmatmul.mubr.f32.gmra.mrb[114].mxu1 %v5337_v0  ;;  %v875_v34 = vpop.f32.mrb[9].mxu1 }
 0x134   : > { %1427 = vmatmul.mubr.f32.gmra.mrb[50].mxu0 %v4212_v41  ;;  %2785 = vmatprep.mubr.f32.mxu1 %v5340_v26  ;;  %v2641_v26 = vld [vmem:[%s3504_s24 + $0x19a] sm:$0xff] }
 0x135   : > { %1431 = vmatprep.mubr.f32.mxu0 %v5352_v10  ;;  %v2556_v34 = vld [vmem:[%s3504_s24 + $0x98] sm:$0xff] }
 0x136   : > { %v4475_v39 = vpop.f32.mrb[10].mxu1 }
 0x137   : > { %2786 = vmatmul.mubr.f32.gmra.mrb[116].mxu1 %v5343_v1  ;;  %v880_v22 = vpop.f32.mrb[11].mxu1  ;;  %v2582_v1 = vld [vmem:[%s3504_s24 + $0x51] sm:$0xff] }
 0x138   : > { %1432 = vmatmul.mubr.f32.gmra.mrb[52].mxu0 %v5321_v30  ;;  %2788 = vmatprep.mubr.f32.mxu1 %v5344_v49  ;;  %v2550_v49 = vld [vmem:[%s3504_s24 + $0x50] sm:$0xff] }
 0x139   : > { %1436 = vmatprep.mubr.f32.mxu0 %v5353_v44 }
 0x13a   : > { %v4481_v50 = vpop.f32.mrb[12].mxu1 }
 0x13b   : > { %2789 = vmatmul.mubr.f32.gmra.mrb[118].mxu1 %v5345_v27  ;;  %v885_v41 = vpop.f32.mrb[13].mxu1 }
 0x13c   : > { %1437 = vmatmul.mubr.f32.gmra.mrb[54].mxu0 %v5326_v54  ;;  %2791 = vmatprep.mubr.f32.mxu1 %v5346_v40  ;;  %v2557_v41 = vld [vmem:[%s3504_s24 + $0xa8] sm:$0xff] }
 0x13d   : > { %1441 = vmatprep.mubr.f32.mxu0 %v5354_v55 }
 0x13e   : > { %v4487_v63 = vpop.f32.mrb[14].mxu1 }
 0x13f   : > { %2792 = vmatmul.mubr.f32.gmra.mrb[120].mxu1 %v5347_v3  ;;  %v890_v30 = vpop.f32.mrb[15].mxu1  ;;  %v2585_v3 = vld [vmem:[%s3504_s24 + $0x79] sm:$0xff] }
 0x140   : > { %1442 = vmatmul.mubr.f32.gmra.mrb[56].mxu0 %v4251_v60  ;;  %2794 = vmatprep.mubr.f32.mxu1 %v5348_v7  ;;  %v2586_v7 = vld [vmem:[%s3504_s24 + $0x81] sm:$0xff] }
 0x141   : > { %1446 = vmatprep.mubr.f32.mxu0 %v5355_v2 }
 0x142   : > { %v4494_v11 = vpop.f32.mrb[16].mxu1 }
 0x143   : > { %2795 = vmatmul.mubr.f32.gmra.mrb[122].mxu1 %v5349_v24  ;;  %v895_v54 = vpop.f32.mrb[17].mxu1  ;;  %v2587_v24 = vld [vmem:[%s3504_s24 + $0x91] sm:$0xff] }
 0x144   : > { %1447 = vmatmul.mubr.f32.gmra.mrb[58].mxu0 %v4264_v46  ;;  %2797 = vmatprep.mubr.f32.mxu1 %v5350_v12  ;;  %v2588_v12 = vld [vmem:[%s3504_s24 + $0x99] sm:$0xff]  ;;  %v2591_v54 = vld [vmem:[%s3504_s24 + $0xc1] sm:$0xff] }
 0x145   : > { %1451 = vmatprep.mubr.f32.mxu0 %v2545_v5 }
 0x146   : > { %v4500_v60 = vpop.f32.mrb[18].mxu1 }
 0x147   : > { %2798 = vmatmul.mubr.f32.gmra.mrb[124].mxu1 %v5351_v9  ;;  %v900_v18 = vpop.f32.mrb[19].mxu1 }
 0x148   : > { %1452 = vmatmul.mubr.f32.gmra.mrb[60].mxu0 %v4407_v31  ;;  %2800 = vmatprep.mubr.f32.mxu1 %v5352_v10  ;;  %v2580_v31 = vld [vmem:[%s3504_s24 + $0x39] sm:$0xff]  ;;  %v2589_v10 = vld [vmem:[%s3504_s24 + $0xa9] sm:$0xff] }
 0x149   : > { %1456 = vmatprep.mubr.f32.mxu0 %v2546_v17 }
 0x14a   : > { %v4506_v46 = vpop.f32.mrb[20].mxu1 }
 0x14b   : > { %2801 = vmatmul.mubr.f32.gmra.mrb[126].mxu1 %v5353_v44  ;;  %v905_v45 = vpop.f32.mrb[21].mxu1 }
 0x14c   : > { %1457 = vmatmul.mubr.f32.gmra.mrb[62].mxu0 %v4416_v19  ;;  %2803 = vmatprep.mubr.f32.mxu1 %v5354_v55  ;;  %v2581_v19 = vld [vmem:[%s3504_s24 + $0x49] sm:$0xff]  ;;  %v2590_v55 = vld [vmem:[%s3504_s24 + $0xb1] sm:$0xff] }
 0x14d   : > { %1526 = vmatprep.mubr.f32.mxu0 %v2579_v29  ;;  %v2559_v29 = vld [vmem:[%s3504_s24 + $0xc0] sm:$0xff] }
 0x14e   : > { %v4513_v0 = vpop.f32.mrb[22].mxu1 }
 0x14f   : > { %2804 = vmatmul.mubr.f32.gmra.mrb[128].mxu1 %v5355_v2  ;;  %v910_v23 = vpop.f32.mrb[23].mxu1 }
 0x150   : > { %1527 = vmatmul.mubr.f32.vlgmr.msra.gmra.mrb[0].mxu0 %v2547_v56  ;;  %2806 = vmatprep.mubr.f32.mxu1 %v2545_v5  ;;  %v2558_v5 = vld [vmem:[%s3504_s24 + $0xb0] sm:$0xff] }
 0x151   : > { %1531 = vmatprep.mubr.f32.mxu0 %v2580_v31 }
 0x152   : > { %v4519_v47 = vpop.f32.mrb[24].mxu1 }
 0x153   : > { %5356 = vst [vmem:[#allocation30_spill] sm:$0xff] %v4519_v47  ;;  %2807 = vmatmul.mubr.f32.gmra.mrb[130].mxu1 %v2546_v17  ;;  %v915_v52 = vpop.f32.mrb[25].mxu1 }
 0x154   : > { %1532 = vmatmul.mubr.f32.gmra.mrb[2].mxu0 %v2548_v32  ;;  %2809 = vmatprep.mubr.f32.mxu1 %v2641_v26 }
 0x155   : > { %1536 = vmatprep.mubr.f32.mxu0 %v2581_v19 }
 0x156   : > { %v4524_v38 = vpop.f32.mrb[26].mxu1 }
 0x157   : > { %2810 = vmatmul.mubr.f32.gmra.mrb[132].mxu1 %v2642_v57  ;;  %v920_v42 = vpop.f32.mrb[27].mxu1 }
 0x158   : > { %1537 = vmatmul.mubr.f32.gmra.mrb[4].mxu0 %v2549_v59 }
 0x159   : > { %1541 = vmatprep.mubr.f32.mxu0 %v2582_v1 }
 0x15a   : > { %v4528_v13 = vpop.f32.mrb[28].mxu1 }
 0x15b   : > { %v925_v27 = vpop.f32.mrb[29].mxu1 }
 0x15c   : > { %1542 = vmatmul.mubr.f32.gmra.mrb[6].mxu0 %v2550_v49 }
 0x15d   : > { %1546 = vmatprep.mubr.f32.mxu0 %v2583_v14 }
 0x15e   : > { %v4532_v40 = vpop.f32.mrb[30].mxu1 }
 0x15f   : > { %v930_v51 = vpop.f32.mrb[31].mxu1 }
 0x160   : > { %1547 = vmatmul.mubr.f32.gmra.mrb[8].mxu0 %v2551_v37 }
 0x161   : > { %1551 = vmatprep.mubr.f32.mxu0 %v2584_v20 }
 0x162   : > { %v4536_v53 = vpop.f32.mrb[32].mxu1 }
 0x163   : > { %v935_v35 = vpop.f32.mrb[33].mxu1 }
 0x164   : > { %1552 = vmatmul.mubr.f32.gmra.mrb[10].mxu0 %v2552_v36 }
 0x165   : > { %1556 = vmatprep.mubr.f32.mxu0 %v2585_v3 }
 0x166   : > { %v4540_v15 = vpop.f32.mrb[34].mxu1 }
 0x167   : > { %v940_v58 = vpop.f32.mrb[35].mxu1 }
 0x168   : > { %1557 = vmatmul.mubr.f32.gmra.mrb[12].mxu0 %v2553_v62 }
 0x169   : > { %1561 = vmatprep.mubr.f32.mxu0 %v2586_v7 }
 0x16a   : > { %v4544_v4 = vpop.f32.mrb[36].mxu1 }
 0x16b   : > { %v945_v6 = vpop.f32.mrb[37].mxu1 }
 0x16c   : > { %1562 = vmatmul.mubr.f32.gmra.mrb[14].mxu0 %v2554_v8 }
 0x16d   : > { %1566 = vmatprep.mubr.f32.mxu0 %v2587_v24 }
 0x16e   : > { %v4548_v43 = vpop.f32.mrb[38].mxu1 }
 0x16f   : > { %v950_v9 = vpop.f32.mrb[39].mxu1 }
 0x170   : > { %1567 = vmatmul.mubr.f32.gmra.mrb[16].mxu0 %v2555_v33 }
 0x171   : > { %1571 = vmatprep.mubr.f32.mxu0 %v2588_v12 }
 0x172   : > { %v4552_v22 = vpop.f32.mrb[40].mxu1 }
 0x173   : > { %v955_v44 = vpop.f32.mrb[41].mxu1 }
 0x174   : > { %1572 = vmatmul.mubr.f32.gmra.mrb[18].mxu0 %v2556_v34 }
 0x175   : > { %1576 = vmatprep.mubr.f32.mxu0 %v2589_v10 }
 0x176   : > { %v4556_v30 = vpop.f32.mrb[42].mxu1 }
 0x177   : > { %v960_v2 = vpop.f32.mrb[43].mxu1 }
 0x178   : > { %1577 = vmatmul.mubr.f32.gmra.mrb[20].mxu0 %v2557_v41 }
 0x179   : > { %1581 = vmatprep.mubr.f32.mxu0 %v2590_v55 }
 0x17a   : > { %v4560_v17 = vpop.f32.mrb[44].mxu1 }
 0x17b   : > { %v965_v18 = vpop.f32.mrb[45].mxu1 }
 0x17c   : > { %1582 = vmatmul.mubr.f32.gmra.mrb[22].mxu0 %v2558_v5 }
 0x17d   : > { %1586 = vmatprep.mubr.f32.mxu0 %v2591_v54 }
 0x17e   : > { %v4563_v45 = vpop.f32.mrb[46].mxu1 }
 0x17f   : > { %v970_v56 = vpop.f32.mrb[47].mxu1 }
 0x180   : > { %1587 = vmatmul.mubr.f32.gmra.mrb[24].mxu0 %v2559_v29 }
 0x182   : > { %v4565_v31 = vpop.f32.mrb[48].mxu1 }
 0x183   : > { %v975_v23 = vpop.f32.mrb[49].mxu1 }
 0x186   : > { %v4567_v32 = vpop.f32.mrb[50].mxu1 }
 0x187   : > { %v980_v26 = vpop.f32.mrb[51].mxu1 }
 0x18a   : > { %v4569_v19 = vpop.f32.mrb[52].mxu1 }
 0x18b   : > { %v985_v52 = vpop.f32.mrb[53].mxu1 }
 0x18e   : > { %v4571_v57 = vpop.f32.mrb[54].mxu1 }
 0x18f   : > { %v990_v59 = vpop.f32.mrb[55].mxu1 }
 0x192   : > { %v4573_v1 = vpop.f32.mrb[56].mxu1 }
 0x193   : > { %v995_v42 = vpop.f32.mrb[57].mxu1 }
 0x196   : > { %v4575_v49 = vpop.f32.mrb[58].mxu1 }
 0x197   : > { %v1000_v14 = vpop.f32.mrb[59].mxu1 }
 0x19a   : > { %v4577_v27 = vpop.f32.mrb[60].mxu1 }
 0x19b   : > { %v1005_v37 = vpop.f32.mrb[61].mxu1 }
 0x19e   : > { %v4579_v20 = vpop.f32.mrb[62].mxu1 }
 0x19f   : > { %v1010_v51 = vpop.f32.mrb[63].mxu1 }
 0x1a2   : > { %v1593_v36 = vpop.f32.mrb[64].mxu1 }
 0x1a3   : > { %v1595_v3 = vpop.f32.mrb[65].mxu1 }
 0x1a6   : > { %v1598_v35 = vpop.f32.mrb[66].mxu1 }
 0x1a7   : > { %v1600_v62 = vpop.f32.mrb[67].mxu1 }
 0x1aa   : > { %v1603_v7 = vpop.f32.mrb[68].mxu1 }
 0x1ab   : > { %v1605_v58 = vpop.f32.mrb[69].mxu1 }
 0x1ae   : > { %v1608_v8 = vpop.f32.mrb[70].mxu1 }
 0x1af   : > { %v1610_v24 = vpop.f32.mrb[71].mxu1 }
 0x1b2   : > { %v1613_v6 = vpop.f32.mrb[72].mxu1 }
 0x1b3   : > { %v1615_v33 = vpop.f32.mrb[73].mxu1 }
 0x1b6   : > { %v1618_v12 = vpop.f32.mrb[74].mxu1 }
 0x1b7   : > { %v1620_v9 = vpop.f32.mrb[75].mxu1 }
 0x1ba   : > { %v1623_v34 = vpop.f32.mrb[76].mxu1 }
 0x1bb   : > { %v1625_v10 = vpop.f32.mrb[77].mxu1 }
 0x1be   : > { %v4581_v44 = vpop.f32.mrb[78].mxu1 }
 0x1bf   : > { %v1630_v41 = vpop.f32.mrb[79].mxu1 }
 0x1c2   : > { %v4583_v55 = vpop.f32.mrb[80].mxu1 }
 0x1c3   : > { %v1635_v2 = vpop.f32.mrb[81].mxu1 }
 0x1c6   : > { %v4585_v5 = vpop.f32.mrb[82].mxu1 }
 0x1c7   : > { %v1640_v54 = vpop.f32.mrb[83].mxu1 }
 0x1ca   : > { %v4587_v18 = vpop.f32.mrb[84].mxu1 }
 0x1cb   : > { %v1645_v29 = vpop.f32.mrb[85].mxu1 }
 0x1ce   : > { %v4589_v56 = vpop.f32.mrb[86].mxu1 }
 0x1cf   : > { %v1650_v23 = vpop.f32.mrb[87].mxu1 }
 0x1d2   : > { %v4591_v26 = vpop.f32.mrb[88].mxu1 }
 0x1d3   : > { %v1655_v52 = vpop.f32.mrb[89].mxu1 }
 0x1d6   : > { %v4593_v59 = vpop.f32.mrb[90].mxu1 }
 0x1d7   : > { %v1368_v42 = vpop.f32.mrb[26].mxu0  ;;  %v1660_v14 = vpop.f32.mrb[91].mxu1 }
 0x1d8   : > { %v3199_v37 = vadd.f32 %v1368_v42, %v4524_v38  ;;  %v1370_v51 = vpop.f32.mrb[27].mxu0 }
 0x1da   : > { %v4596_v3 = vpop.f32.mrb[92].mxu1  ;;  %v4598_v62 = vadd.f32 %v3199_v37, %v1593_v36 }
 0x1db   : > { %v1373_v58 = vpop.f32.mrb[28].mxu0  ;;  %v1665_v24 = vpop.f32.mrb[93].mxu1 }
 0x1dc   : > { %v3201_v33 = vadd.f32 %v1373_v58, %v4528_v13  ;;  %v1375_v9 = vpop.f32.mrb[29].mxu0 }
 0x1de   : > { %v4601_v10 = vpop.f32.mrb[94].mxu1  ;;  %v4603_v41 = vadd.f32 %v3201_v33, %v1598_v35 }
 0x1df   : > { %v1378_v2 = vpop.f32.mrb[30].mxu0  ;;  %v1670_v54 = vpop.f32.mrb[95].mxu1 }
 0x1e0   : > { %v3203_v29 = vadd.f32 %v1378_v2, %v4532_v40  ;;  %v1380_v23 = vpop.f32.mrb[31].mxu0 }
 0x1e2   : > { %v4606_v38 = vpop.f32.mrb[96].mxu1  ;;  %v4608_v52 = vadd.f32 %v3203_v29, %v1603_v7 }
 0x1e3   : > { %v1383_v36 = vpop.f32.mrb[32].mxu0  ;;  %v1675_v42 = vpop.f32.mrb[97].mxu1 }
 0x1e4   : > { %v3205_v14 = vadd.f32 %v1383_v36, %v4536_v53  ;;  %v1385_v37 = vpop.f32.mrb[33].mxu0 }
 0x1e6   : > { %v4611_v13 = vpop.f32.mrb[98].mxu1  ;;  %v4613_v51 = vadd.f32 %v3205_v14, %v1608_v8  ;;  %v2030_v14 = vld [vmem:[%s5224_s5 + $0x8] sm:$0xff] }
 0x1e7   : > { %v1388_v35 = vpop.f32.mrb[34].mxu0  ;;  %v1680_v58 = vpop.f32.mrb[99].mxu1 }
 0x1e8   : > { %v3207_v24 = vadd.f32 %v1388_v35, %v4540_v15  ;;  %v1390_v33 = vpop.f32.mrb[35].mxu0 }
 0x1ea   : > { %v4616_v40 = vpop.f32.mrb[100].mxu1  ;;  %v4618_v9 = vadd.f32 %v3207_v24, %v1613_v6  ;;  %v2029_v6 = vld [vmem:[%s5224_s5] sm:$0xff] }
 0x1eb   : > { %v1393_v7 = vpop.f32.mrb[36].mxu0  ;;  %v1685_v2 = vpop.f32.mrb[101].mxu1 }
 0x1ec   : > { %v3209_v54 = vadd.f32 %v1393_v7, %v4544_v4  ;;  %v1395_v29 = vpop.f32.mrb[37].mxu0  ;;  %v3107_v4 = vpack.c.bf16 %v2030_v14, %v2029_v6  ;;  %v5284_v7 = vmov 0.0  }
 0x1ed   : > { %2844 = vmatprep.mubr.msk.f32.mxu1 %vm3352_vm0, %v5284_v7  ;;  %v2034_v29 = vld [vmem:[%s5224_s5 + $0x28] sm:$0xff] }
 0x1ee   : > { %v4621_v53 = vpop.f32.mrb[102].mxu1  ;;  %v4623_v23 = vadd.f32 %v3209_v54, %v1618_v12  ;;  %v2031_v12 = vld [vmem:[%s5224_s5 + $0x10] sm:$0xff]  ;;  %3108 = vmatpush3.bf16.msra.mxu1 %v3107_v4  ;;  %v2033_v54 = vld [vmem:[%s5224_s5 + $0x20] sm:$0xff] }
 0x1ef   : > { %v1398_v8 = vpop.f32.mrb[38].mxu0  ;;  %v4625_v36 = vpop.f32.mrb[103].mxu1  ;;  %3109 = vmatprep.subr.bf16.mxu1 %v5320_v61 }
 0x1f0   : > { %v3211_v42 = vadd.f32 %v1398_v8, %v4548_v43  ;;  %v1400_v15 = vpop.f32.mrb[39].mxu0  ;;  %v2032_v43 = vld [vmem:[%s5224_s5 + $0x18] sm:$0xff] }
 0x1f1   : > { %v3110_v33 = vpack.c.bf16 %v2032_v43, %v2031_v12  ;;  %v2035_v12 = vld [vmem:[%s5224_s5 + $0x30] sm:$0xff]  ;;  %v2036_v43 = vld [vmem:[%s5224_s5 + $0x38] sm:$0xff] }
 0x1f2   : > { %v4634_v37 = vpop.f32.mrb[104].mxu1  ;;  %v4636_v35 = vadd.f32 %v3211_v42, %v1623_v34 }
 0x1f3   : > { %v1403_v58 = vpop.f32.mrb[40].mxu0  ;;  %v4644_v24 = vpop.f32.mrb[105].mxu1  ;;  %3111 = vmatpush3.bf16.msra.mxu1 %v3110_v33 }
 0x1f4   : > { %v3213_v34 = vadd.f32 %v1403_v58, %v4552_v22  ;;  %v1405_v2 = vpop.f32.mrb[41].mxu0  ;;  %v3113_v22 = vpack.c.bf16 %v2034_v29, %v2033_v54  ;;  %3112 = vmatprep.subr.bf16.mxu1 %v5320_v61  ;;  %v2037_v29 = vld [vmem:[%s5224_s5 + $0x40] sm:$0xff] }
 0x1f6   : > { %v4656_v8 = vpop.f32.mrb[106].mxu1  ;;  %v4659_v42 = vadd.f32 %v3213_v34, %v4581_v44 }
 0x1f7   : > { %v1408_v15 = vpop.f32.mrb[42].mxu0  ;;  %v4661_v6 = vpop.f32.mrb[107].mxu1  ;;  %3114 = vmatpush3.bf16.msra.mxu1 %v3113_v22 }
 0x1f8   : > { %v3215_v14 = vadd.f32 %v1408_v15, %v4556_v30  ;;  %v1410_v4 = vpop.f32.mrb[43].mxu0  ;;  %v3116_v30 = vpack.c.bf16 %v2036_v43, %v2035_v12  ;;  %3115 = vmatprep.subr.bf16.mxu1 %v5320_v61  ;;  %v2038_v15 = vld [vmem:[%s5224_s5 + $0x48] sm:$0xff] }
 0x1fa   : > { %v4671_v44 = vpop.f32.mrb[108].mxu1  ;;  %v4674_v58 = vadd.f32 %v3215_v14, %v4583_v55 }
 0x1fb   : > { %v1413_v33 = vpop.f32.mrb[44].mxu0  ;;  %v4676_v34 = vpop.f32.mrb[109].mxu1  ;;  %3117 = vmatpush3.bf16.msra.mxu1 %v3116_v30 }
 0x1fc   : > { %v3217_v2 = vadd.f32 %v1413_v33, %v4560_v17  ;;  %v1415_v54 = vpop.f32.mrb[45].mxu0  ;;  %v3119_v17 = vpack.c.bf16 %v2038_v15, %v2037_v29  ;;  %3118 = vmatprep.subr.bf16.mxu1 %v5320_v61  ;;  %v2039_v33 = vld [vmem:[%s5224_s5 + $0x50] sm:$0xff] }
 0x1fd   : > { %v2040_v54 = vld [vmem:[%s5224_s5 + $0x58] sm:$0xff] }
 0x1fe   : > { %v4686_v55 = vpop.f32.mrb[110].mxu1  ;;  %v4689_v14 = vadd.f32 %v3217_v2, %v4585_v5 }
 0x1ff   : > { %v1418_v22 = vpop.f32.mrb[46].mxu0  ;;  %v4691_v4 = vpop.f32.mrb[111].mxu1  ;;  %3120 = vmatpush3.bf16.msra.mxu1 %v3119_v17 }
 0x200   : > { %v3219_v12 = vadd.f32 %v1418_v22, %v4563_v45  ;;  %v1420_v43 = vpop.f32.mrb[47].mxu0  ;;  %v3122_v45 = vpack.c.bf16 %v2040_v54, %v2039_v33  ;;  %3121 = vmatprep.subr.bf16.mxu1 %v5320_v61  ;;  %v2041_v22 = vld [vmem:[%s5224_s5 + $0x60] sm:$0xff] }
 0x201   : > { %v2042_v43 = vld [vmem:[%s5224_s5 + $0x68] sm:$0xff] }
 0x202   : > { %v4701_v5 = vpop.f32.mrb[112].mxu1  ;;  %v3220_v2 = vadd.f32 %v3219_v12, %v4587_v18 }
 0x203   : > { %5357 = vst [vmem:[#allocation6_spill] sm:$0xff] %v4701_v5  ;;  %v1423_v7 = vpop.f32.mrb[48].mxu0  ;;  %v4704_v30 = vpop.f32.mrb[113].mxu1  ;;  %3123 = vmatpush3.bf16.msra.mxu1 %v3122_v45 }
 0x204   : > { %v3221_v29 = vadd.f32 %v1423_v7, %v4565_v31  ;;  %v1425_v15 = vpop.f32.mrb[49].mxu0  ;;  %v3125_v7 = vpack.c.bf16 %v2042_v43, %v2041_v22  ;;  %3124 = vmatprep.subr.bf16.mxu1 %v5320_v61 }
 0x205   : > { %v2043_v15 = vld [vmem:[%s5224_s5 + $0x70] sm:$0xff] }
 0x206   : > { %v2784_v47 = vpop.f32.mrb[114].mxu1  ;;  %v4715_v18 = vadd.f32 %v3221_v29, %v4589_v56  ;;  %v2044_v56 = vld [vmem:[%s5224_s5 + $0x78] sm:$0xff] }
 0x207   : > { %v1428_v12 = vpop.f32.mrb[50].mxu0  ;;  %v4718_v17 = vadd.f32 %v4598_v62, %v2784_v47  ;;  %v4720_v31 = vpop.f32.mrb[115].mxu1  ;;  %3126 = vmatpush3.bf16.msra.mxu1 %v3125_v7 }
 0x208   : > { %5359 = vst [vmem:[#allocation26_spill] sm:$0xff] %v4720_v31  ;;  %v3223_v33 = vadd.f32 %v1428_v12, %v4567_v32  ;;  %v1430_v54 = vpop.f32.mrb[51].mxu0  ;;  %v3128_v32 = vpack.c.bf16 %v2044_v56, %v2043_v15  ;;  %3127 = vmatprep.subr.bf16.mxu1 %v5320_v61 }
 0x209   : > { %5358 = vst [vmem:[#allocation2_spill] sm:$0xff] %v4718_v17 }
 0x20a   : > { %v2787_v29 = vpop.f32.mrb[116].mxu1  ;;  %v3224_v47 = vadd.f32 %v3223_v33, %v4591_v26 }
 0x20b   : > { %v1433_v62 = vpop.f32.mrb[52].mxu0  ;;  %v4732_v45 = vadd.f32 %v4608_v52, %v2787_v29  ;;  %v1823_v22 = vpop.f32.mrb[117].mxu1  ;;  %3129 = vmatpush3.bf16.msra.mxu1 %v3128_v32 }
 0x20c   : > { %v3225_v43 = vadd.f32 %v1433_v62, %v4569_v19  ;;  %v1435_v12 = vpop.f32.mrb[53].mxu0  ;;  %v4736_v54 = vadd.f32 %v4603_v41, %v1823_v22  ;;  %3130 = vmatprep.subr.bf16.mxu1 %v5320_v61 }
 0x20e   : > { %v2790_v17 = vpop.f32.mrb[118].mxu1  ;;  %v3226_v31 = vadd.f32 %v3225_v43, %v4593_v59 }
 0x20f   : > { %v1438_v5 = vpop.f32.mrb[54].mxu0  ;;  %v4741_v26 = vadd.f32 %v4618_v9, %v2790_v17  ;;  %v1833_v52 = vpop.f32.mrb[119].mxu1 }
 0x210   : > { %v3227_v7 = vadd.f32 %v1438_v5, %v4571_v57  ;;  %v1440_v33 = vpop.f32.mrb[55].mxu0  ;;  %v4745_v19 = vadd.f32 %v4613_v51, %v1833_v52 }
 0x212   : > { %v2793_v41 = vpop.f32.mrb[120].mxu1  ;;  %v3228_v15 = vadd.f32 %v3227_v7, %v4596_v3 }
 0x213   : > { %v1443_v56 = vpop.f32.mrb[56].mxu0  ;;  %v4750_v59 = vadd.f32 %v4636_v35, %v2793_v41  ;;  %v1843_v29 = vpop.f32.mrb[121].mxu1 }
 0x214   : > { %v3229_v9 = vadd.f32 %v1443_v56, %v4573_v1  ;;  %v1445_v17 = vpop.f32.mrb[57].mxu0  ;;  %v4754_v62 = vadd.f32 %v4623_v23, %v1843_v29 }
 0x216   : > { %v2796_v57 = vpop.f32.mrb[122].mxu1  ;;  %v3230_v51 = vadd.f32 %v3229_v9, %v4601_v10 }
 0x217   : > { %v1448_v5 = vpop.f32.mrb[58].mxu0  ;;  %v4758_v22 = vadd.f32 %v4674_v58, %v2796_v57  ;;  %v1853_v32 = vpop.f32.mrb[123].mxu1 }
 0x218   : > { %v3231_v3 = vadd.f32 %v1448_v5, %v4575_v49  ;;  %v1450_v43 = vpop.f32.mrb[59].mxu0  ;;  %v4762_v35 = vadd.f32 %v4659_v42, %v1853_v32 }
 0x21a   : > { %v2799_v12 = vpop.f32.mrb[124].mxu1  ;;  %v3232_v1 = vadd.f32 %v3231_v3, %v4606_v38 }
 0x21b   : > { %v1453_v52 = vpop.f32.mrb[60].mxu0  ;;  %v4765_v23 = vadd.f32 %v3220_v2, %v2799_v12  ;;  %v1863_v7 = vpop.f32.mrb[125].mxu1 }
 0x21c   : > { %v3233_v10 = vadd.f32 %v1453_v52, %v4577_v27  ;;  %v1455_v33 = vpop.f32.mrb[61].mxu0  ;;  %v4769_v58 = vadd.f32 %v4689_v14, %v1863_v7 }
 0x21e   : > { %v2802_v41 = vpop.f32.mrb[126].mxu1  ;;  %v3234_v49 = vadd.f32 %v3233_v10, %v4611_v13 }
 0x21f   : > { %v1458_v56 = vpop.f32.mrb[62].mxu0  ;;  %v4772_v29 = vadd.f32 %v3224_v47, %v2802_v41  ;;  %v1873_v42 = vpop.f32.mrb[127].mxu1 }
 0x220   : > { %v3235_v9 = vadd.f32 %v1458_v56, %v4579_v20  ;;  %v1460_v38 = vpop.f32.mrb[63].mxu0  ;;  %v4776_v2 = vadd.f32 %v4715_v18, %v1873_v42 }
 0x222   : > { %v2805_v17 = vpop.f32.mrb[128].mxu1  ;;  %v3236_v27 = vadd.f32 %v3235_v9, %v4616_v40 }
 0x223   : > { %v1528_v57 = vpop.f32.mrb[0].mxu0  ;;  %v4779_v5 = vadd.f32 %v3228_v15, %v2805_v17  ;;  %v1883_v14 = vpop.f32.mrb[129].mxu1 }
 0x224   : > { %v3186_v32 = vadd.f32 %v1528_v57, %v4447_v48  ;;  %v1530_v13 = vpop.f32.mrb[1].mxu0  ;;  %v4782_v3 = vadd.f32 %v3226_v31, %v1883_v14 }
 0x226   : > { %v1754_v47 = vadd.f32 %v3186_v32, %v4625_v36  ;;  %v2808_v43 = vpop.f32.mrb[130].mxu1 }
 0x227   : > { %v1533_v20 = vpop.f32.mrb[2].mxu0  ;;  %v4785_v12 = vadd.f32 %v3232_v1, %v2808_v43  ;;  %v1893_v18 = vpop.f32.mrb[131].mxu1 }
 0x228   : > { %v3187_v52 = vadd.f32 %v1533_v20, %v4453_v28  ;;  %v1535_v7 = vpop.f32.mrb[3].mxu0  ;;  %v4788_v40 = vadd.f32 %v3230_v51, %v1893_v18 }
 0x22a   : > { %v1759_v15 = vadd.f32 %v3187_v52, %v4621_v53  ;;  %v2811_v10 = vpop.f32.mrb[132].mxu1 }
 0x22b   : > { %v1538_v33 = vpop.f32.mrb[4].mxu0  ;;  %v4791_v48 = vadd.f32 %v3236_v27, %v2811_v10  ;;  %v1903_v31 = vpop.f32.mrb[133].mxu1 }
 0x22c   : > { %v3188_v41 = vadd.f32 %v1538_v33, %v4459_v16  ;;  %v1540_v36 = vpop.f32.mrb[5].mxu0  ;;  %v4794_v56 = vadd.f32 %v3234_v49, %v1903_v31 }
 0x22e   : > { %v1764_v1 = vadd.f32 %v3188_v41, %v4644_v24 }
 0x22f   : > { %v1543_v42 = vpop.f32.mrb[6].mxu0 }
 0x230   : > { %v3189_v28 = vadd.f32 %v1543_v42, %v4464_v25  ;;  %v1545_v9 = vpop.f32.mrb[7].mxu0  ;;  %v4807_v25 = vld [vmem:[%s5222_s3] ss:$0 sm:$0xff] }
 0x231   : > { %v1919_v43 = vmul.f32 %v4807_v25, %v1754_v47 }
 0x232   : > { %v1769_v51 = vadd.f32 %v3189_v28, %v4634_v37 }
 0x233   : > { %v1548_v38 = vpop.f32.mrb[8].mxu0 }
 0x234   : > { %v3190_v53 = vadd.f32 %v1548_v38, %v4469_v21  ;;  %v1550_v17 = vpop.f32.mrb[9].mxu0  ;;  %v1920_v21 = vmul.f32 %v4807_v25, %v1759_v15  ;;  %v1922_v52 = vmul.f32 %v4807_v25, %v1769_v51 }
 0x236   : > { %v1774_v27 = vadd.f32 %v3190_v53, %v4661_v6 }
 0x237   : > { %v1553_v57 = vpop.f32.mrb[10].mxu0 }
 0x238   : > { %v3191_v16 = vadd.f32 %v1553_v57, %v4475_v39  ;;  %v1555_v14 = vpop.f32.mrb[11].mxu0  ;;  %v1921_v39 = vmul.f32 %v4807_v25, %v1764_v1 }
 0x23a   : > { %v1779_v49 = vadd.f32 %v3191_v16, %v4656_v8 }
 0x23b   : > { %v1558_v32 = vpop.f32.mrb[12].mxu0 }
 0x23c   : > { %v3192_v24 = vadd.f32 %v1558_v32, %v4481_v50  ;;  %v1560_v13 = vpop.f32.mrb[13].mxu0  ;;  %v4817_v50 = vld [vmem:[%s5223_s4] ss:$0 sm:$0xff] }
 0x23d   : > { %v4820_v18 = vadd.f32 %v4817_v50, %v1920_v21  ;;  %v4825_v47 = vadd.f32 %v4817_v50, %v1919_v43  ;;  %v4828_v15 = vadd.f32 %v4817_v50, %v1921_v39  ;;  %v4835_v41 = vadd.f32 %v4817_v50, %v1922_v52  ;;  %v5360_v52 = vld [vmem:[#allocation6_spill] sm:$0xff] }
 0x23e   : > { %v1784_v37 = vadd.f32 %v3192_v24, %v4676_v34 }
 0x23f   : > { %v1563_v6 = vpop.f32.mrb[14].mxu0  ;;  %v1990_v31 = vadd.f32 %v4820_v18, %v4825_v47 }
 0x240   : > { %v3193_v8 = vadd.f32 %v1563_v6, %v4487_v63  ;;  %v1565_v20 = vpop.f32.mrb[15].mxu0  ;;  %v1923_v63 = vmul.f32 %v4807_v25, %v1774_v27  ;;  %v1925_v9 = vmul.f32 %v4807_v25, %v1784_v37 }
 0x241   : > { %v1991_v42 = vadd.f32 %v1990_v31, %v4828_v15 }
 0x242   : > { %v1789_v34 = vadd.f32 %v3193_v8, %v4671_v44  ;;  %v1924_v44 = vmul.f32 %v4807_v25, %v1779_v49  ;;  %v4841_v28 = vadd.f32 %v4817_v50, %v1923_v63  ;;  %v4853_v16 = vadd.f32 %v4817_v50, %v1925_v9  ;;  %v5363_v9 = vld [vmem:[#allocation2_spill] sm:$0xff] }
 0x243   : > { %v1568_v7 = vpop.f32.mrb[16].mxu0  ;;  %v1992_v38 = vadd.f32 %v1991_v42, %v4835_v41 }
 0x244   : > { %v3194_v10 = vadd.f32 %v1568_v7, %v4494_v11  ;;  %v1570_v33 = vpop.f32.mrb[17].mxu0  ;;  %v4847_v53 = vadd.f32 %v4817_v50, %v1924_v44  ;;  %v1926_v17 = vmul.f32 %v4807_v25, %v1789_v34 }
 0x245   : > { %v1993_v57 = vadd.f32 %v1992_v38, %v4841_v28  ;;  %v5361_v33 = vld [vmem:[#allocation30_spill] sm:$0xff] }
 0x246   : > { %v1794_v36 = vadd.f32 %v3194_v10, %v4691_v4  ;;  %v4859_v24 = vadd.f32 %v4817_v50, %v1926_v17  ;;  %v1933_v17 = vmul.f32 %v4807_v25, %v4736_v54 }
 0x247   : > { %v1573_v1 = vpop.f32.mrb[18].mxu0  ;;  %v1994_v32 = vadd.f32 %v1993_v57, %v4847_v53 }
 0x248   : > { %v3195_v11 = vadd.f32 %v1573_v1, %v4500_v60  ;;  %v1575_v51 = vpop.f32.mrb[19].mxu0  ;;  %v1927_v14 = vmul.f32 %v4807_v25, %v1794_v36  ;;  %v5362_v1 = vld [vmem:[#allocation26_spill] sm:$0xff] }
 0x249   : > { %v1995_v37 = vadd.f32 %v1994_v32, %v4853_v16  ;;  %v1935_v32 = vmul.f32 %v4807_v25, %v4745_v19 }
 0x24a   : > { %v1799_v4 = vadd.f32 %v3195_v11, %v4686_v55  ;;  %v4865_v6 = vadd.f32 %v4817_v50, %v1927_v14  ;;  %v1932_v11 = vmul.f32 %v4807_v25, %v5363_v9  ;;  %v1934_v14 = vmul.f32 %v4807_v25, %v4732_v45 }
 0x24b   : > { %v1578_v27 = vpop.f32.mrb[20].mxu0  ;;  %v1996_v8 = vadd.f32 %v1995_v37, %v4859_v24  ;;  %v4914_v45 = vadd.f32 %v4817_v50, %v1935_v32  ;;  %v1937_v37 = vmul.f32 %v4807_v25, %v4754_v62  ;;  %v1945_v9 = vmul.f32 %v4807_v25, %v4782_v3 }
 0x24c   : > { %v3196_v60 = vadd.f32 %v1578_v27, %v4506_v46  ;;  %v1580_v49 = vpop.f32.mrb[21].mxu0  ;;  %v1928_v13 = vmul.f32 %v4807_v25, %v1799_v4  ;;  %v4896_v57 = vadd.f32 %v4817_v50, %v1932_v11  ;;  %v1949_v32 = vmul.f32 %v4807_v25, %v4794_v56 }
 0x24d   : > { %v4902_v49 = vadd.f32 %v4817_v50, %v1933_v17  ;;  %v1947_v17 = vmul.f32 %v4807_v25, %v4788_v40 }
 0x24e   : > { %v1804_v55 = vadd.f32 %v3196_v60, %v4704_v30  ;;  %v4871_v20 = vadd.f32 %v4817_v50, %v1928_v13  ;;  %v1997_v30 = vadd.f32 %v1996_v8, %v4865_v6  ;;  %v4908_v13 = vadd.f32 %v4817_v50, %v1934_v14 }
 0x24f   : > { %v1583_v21 = vpop.f32.mrb[22].mxu0  ;;  %v1939_v8 = vmul.f32 %v4807_v25, %v4762_v35  ;;  %v1948_v14 = vmul.f32 %v4807_v25, %v4785_v12  ;;  %v4998_v12 = vadd.f32 %v4817_v50, %v1949_v32  ;;  %v2128_v32 = vld [vmem:[%s5226_s7 + $0x58] sm:$0xff] }
 0x250   : > { %v1929_v43 = vmul.f32 %v4807_v25, %v1804_v55  ;;  %v3197_v46 = vadd.f32 %v1583_v21, %v4513_v0  ;;  %v1585_v39 = vpop.f32.mrb[23].mxu0  ;;  %v1998_v0 = vadd.f32 %v1997_v30, %v4871_v20  ;;  %v1936_v55 = vmul.f32 %v4807_v25, %v4741_v26 }
 0x251   : > { %v4926_v26 = vadd.f32 %v4817_v50, %v1937_v37  ;;  %v1941_v30 = vmul.f32 %v4807_v25, %v4769_v58  ;;  %v4992_v40 = vadd.f32 %v4817_v50, %v1948_v14 }
 0x252   : > { %v1809_v34 = vadd.f32 %v3197_v46, %v5360_v52  ;;  %v4876_v63 = vadd.f32 %v4817_v50, %v1929_v43  ;;  %v4920_v19 = vadd.f32 %v4817_v50, %v1936_v55  ;;  %v1938_v46 = vmul.f32 %v4807_v25, %v4750_v59 }
 0x253   : > { %v1588_v7 = vpop.f32.mrb[24].mxu0  ;;  %v4938_v59 = vadd.f32 %v4817_v50, %v1939_v8  ;;  %v1950_v55 = vmul.f32 %v4807_v25, %v4791_v48  ;;  %v2117_v48 = vld [vmem:[%s5226_s7] sm:$0xff] }
 0x254   : > { %v1930_v10 = vmul.f32 %v4807_v25, %v1809_v34  ;;  %v3198_v31 = vadd.f32 %v1588_v7, %v5361_v33  ;;  %v1590_v44 = vpop.f32.mrb[25].mxu0  ;;  %v1999_v51 = vadd.f32 %v1998_v0, %v4876_v63  ;;  %v4932_v62 = vadd.f32 %v4817_v50, %v1938_v46 }
 0x255   : > { %v1940_v34 = vmul.f32 %v4807_v25, %v4758_v22  ;;  %v1942_v33 = vmul.f32 %v4807_v25, %v4765_v23  ;;  %v4950_v22 = vadd.f32 %v4817_v50, %v1941_v30  ;;  %v1943_v44 = vmul.f32 %v4807_v25, %v4776_v2 }
 0x256   : > { %v4882_v36 = vadd.f32 %v4817_v50, %v1930_v10  ;;  %v1814_v42 = vadd.f32 %v3198_v31, %v5362_v1  ;;  %v1944_v1 = vmul.f32 %v4807_v25, %v4772_v29  ;;  %v4974_v29 = vadd.f32 %v4817_v50, %v1945_v9 }
 0x257   : > { %v4944_v35 = vadd.f32 %v4817_v50, %v1940_v34  ;;  %v4956_v58 = vadd.f32 %v4817_v50, %v1942_v33  ;;  %v4962_v23 = vadd.f32 %v4817_v50, %v1943_v44  ;;  %v2119_v33 = vld [vmem:[%s5226_s7 + $0x10] sm:$0xff] }
 0x258   : > { %v1931_v38 = vmul.f32 %v4807_v25, %v1814_v42  ;;  %v2000_v4 = vadd.f32 %v1999_v51, %v4882_v36  ;;  %v4968_v2 = vadd.f32 %v4817_v50, %v1944_v1  ;;  %v1946_v51 = vmul.f32 %v4807_v25, %v4779_v5  ;;  %v2118_v25 = vld [vmem:[%s5226_s7 + $0x8] sm:$0xff]  ;;  %v2121_v1 = vld [vmem:[%s5226_s7 + $0x20] sm:$0xff] }
 0x259   : > { %v4986_v5 = vadd.f32 %v4817_v50, %v1947_v17  ;;  %v2125_v17 = vld [vmem:[%s5226_s7 + $0x40] sm:$0xff] }
 0x25a   : > { %v4893_v27 = vadd.f32 %v4817_v50, %v1931_v38  ;;  %v4980_v3 = vadd.f32 %v4817_v50, %v1946_v51  ;;  %v2124_v51 = vld [vmem:[%s5226_s7 + $0x38] sm:$0xff] }
 0x25c   : > { %v2001_v60 = vadd.f32 %v2000_v4, %v4893_v27 }
 0x25e   : > { %v2002_v54 = vadd.f32 %v2001_v60, %v4896_v57 }
 0x260   : > { %v2003_v21 = vadd.f32 %v2002_v54, %v4902_v49 }
 0x262   : > { %v2004_v43 = vadd.f32 %v2003_v21, %v4908_v13 }
 0x264   : > { %v2005_v39 = vadd.f32 %v2004_v43, %v4914_v45  ;;  %v5002_v43 = vadd.f32 %v4817_v50, %v1950_v55  ;;  %v3131_v50 = vpack.c.bf16 %v2118_v25, %v2117_v48  ;;  %v2129_v55 = vld [vmem:[%s5226_s7 + $0x60] sm:$0xff] }
 0x266   : > { %v2006_v52 = vadd.f32 %v2005_v39, %v4920_v19 }
 0x268   : > { %v2007_v7 = vadd.f32 %v2006_v52, %v4926_v26 }
 0x26a   : > { %v2008_v10 = vadd.f32 %v2007_v7, %v4932_v62 }
 0x26c   : > { %v2009_v31 = vadd.f32 %v2008_v10, %v4938_v59 }
 0x26e   : > { %v2010_v0 = vadd.f32 %v2009_v31, %v4944_v35  ;;  %v2120_v31 = vld [vmem:[%s5226_s7 + $0x18] sm:$0xff] }
 0x26f   : > { %v3134_v44 = vpack.c.bf16 %v2120_v31, %v2119_v33 }
 0x270   : > { %v2011_v42 = vadd.f32 %v2010_v0, %v4950_v22  ;;  %v5364_v0 = vmov 0.0  }
 0x272   : > { %v2012_v11 = vadd.f32 %v2011_v42, %v4956_v58  ;;  %v2122_v42 = vld [vmem:[%s5226_s7 + $0x28] sm:$0xff] }
 0x273   : > { %v3137_v9 = vpack.c.bf16 %v2122_v42, %v2121_v1 }
 0x274   : > { %v2013_v38 = vadd.f32 %v2012_v11, %v4962_v23  ;;  %v2123_v11 = vld [vmem:[%s5226_s7 + $0x30] sm:$0xff] }
 0x276   : > { %v2014_v4 = vadd.f32 %v2013_v38, %v4968_v2  ;;  %v3140_v38 = vpack.c.bf16 %v2124_v51, %v2123_v11 }
 0x278   : > { %v2015_v60 = vadd.f32 %v2014_v4, %v4974_v29  ;;  %v2126_v4 = vld [vmem:[%s5226_s7 + $0x48] sm:$0xff] }
 0x279   : > { %v3143_v14 = vpack.c.bf16 %v2126_v4, %v2125_v17 }
 0x27a   : > { %v2016_v54 = vadd.f32 %v2015_v60, %v4980_v3  ;;  %v2127_v60 = vld [vmem:[%s5226_s7 + $0x50] sm:$0xff] }
 0x27c   : > { %v2017_v21 = vadd.f32 %v2016_v54, %v4986_v5  ;;  %v3146_v54 = vpack.c.bf16 %v2128_v32, %v2127_v60 }
 0x27e   : > { %v2018_v37 = vadd.f32 %v2017_v21, %v4992_v40  ;;  %v2130_v21 = vld [vmem:[%s5226_s7 + $0x68] sm:$0xff] }
 0x280   : > { %v2019_v56 = vadd.f32 %v2018_v37, %v4998_v12  ;;  %v3149_v37 = vpack.c.bf16 %v2130_v21, %v2129_v55  ;;  %v2213_v55 = vld [vmem:[%s5075_s11 + $0x18] sm:$0xff] }
 0x282   : > { %v2020_v46 = vadd.f32 %v2019_v56, %v5002_v43  ;;  %v2131_v56 = vld [vmem:[%s5226_s7 + $0x70] sm:$0xff] }
 0x284   : > { %v2021_v39 = vrot.slane %v2020_v46, 4 }
 0x286   : > { %v2022_v8 = vadd.f32 %v2021_v39, %v2020_v46  ;;  %v2132_v46 = vld [vmem:[%s5226_s7 + $0x78] sm:$0xff] }
 0x287   : > { %v3152_v39 = vpack.c.bf16 %v2132_v46, %v2131_v56 }
 0x288   : > { %v2023_v52 = vrot.slane %v2022_v8, 2 }
 0x28a   : > { %v2024_v34 = vadd.f32 %v2023_v52, %v2022_v8  ;;  %v2045_v8 = vld [vmem:[%s5225_s6] sm:$0x1] }
 0x28c   : > { %v2025_v7 = vrot.slane %v2024_v34, 1 }
 0x28e   : > { %v2026_v30 = vadd.f32 %v2025_v7, %v2024_v34 }
 0x290   : > { %v2028_v10 = vmul.f32 0.00390625, %v2026_v30 }
 0x292   : > { %2845 = vmatmul.mubr.f32.vlgmr.msra.gmra.mrb[134].mxu1 %v2028_v10 }
 0x293   : > { %3132 = vmatpush3.bf16.msra.mxu1 %v3131_v50  ;;  %2879 = vmatprep.mubr.msk.f32.mxu1 %vm3352_vm0, %v5364_v0 }
 0x294   : > { %3133 = vmatprep.subr.bf16.mxu1 %v5320_v61 }
 0x297   : > { %3135 = vmatpush3.bf16.msra.mxu1 %v3134_v44  ;;  %v2242_v44 = vlaneseq }
 0x298   : > { %3136 = vmatprep.subr.bf16.mxu1 %v5320_v61 }
 0x299   : > { %v2243_v0 = vshrl.u32 %v2242_v44, 7 }
 0x29b   : > { %3138 = vmatpush3.bf16.msra.mxu1 %v3137_v9  ;;  %v2244_v1 = vsub.s32 0, %v2243_v0  ;;  %v2230_v0 = vld [vmem:[%s5075_s11 + $0xa0] sm:$0xff] }
 0x29c   : > { %3139 = vmatprep.subr.bf16.mxu1 %v5320_v61 }
 0x29f   : > { %3141 = vmatpush3.bf16.msra.mxu1 %v3140_v38 }
 0x2a0   : > { %3142 = vmatprep.subr.bf16.mxu1 %v5320_v61 }
 0x2a3   : > { %3144 = vmatpush3.bf16.msra.mxu1 %v3143_v14 }
 0x2a4   : > { %3145 = vmatprep.subr.bf16.mxu1 %v5320_v61 }
 0x2a7   : > { %3147 = vmatpush3.bf16.msra.mxu1 %v3146_v54  ;;  %v2210_v54 = vld [vmem:[%s5075_s11] sm:$0xff] }
 0x2a8   : > { %3148 = vmatprep.subr.bf16.mxu1 %v5320_v61 }
 0x2ab   : > { %3150 = vmatpush3.bf16.msra.mxu1 %v3149_v37  ;;  %v2217_v37 = vld [vmem:[%s5075_s11 + $0x38] sm:$0xff] }
 0x2ac   : > { %3151 = vmatprep.subr.bf16.mxu1 %v5320_v61  ;;  %v2133_v61 = vld [vmem:[%s5227_s8] sm:$0x1] }
 0x2af   : > { %3153 = vmatpush3.bf16.msra.mxu1 %v3152_v39 }
 0x365   : > { %v2112_v52 = vpop.f32.mrb[134].mxu1 }
 0x366   : > { %v2113_v34 = vadd.f32 %v2112_v52, %v2045_v8  ;;  %v2846_v7 = vpop.f32.mrb[135].mxu1 }
 0x367   : > { %v2223_v7 = vld [vmem:[%s5075_s11 + $0x68] sm:$0xff] }
 0x368   : > { %v2116_v48 = vmax.f32 %v2113_v34, 0.0 }
 0x36a   : > { %2880 = vmatmul.mubr.f32.vlgmr.msra.gmra.mrb[136].mxu1 %v2116_v48 }
 0x43d   : > { %v2200_v25 = vpop.f32.mrb[136].mxu1 }
 0x43e   : > { %v2201_v30 = vadd.f32 %v2200_v25, %v2133_v61  ;;  %v2881_v50 = vpop.f32.mrb[137].mxu1  ;;  %v2226_v25 = vld [vmem:[%s5075_s11 + $0x80] sm:$0xff] }
 0x440   : > { %v2645_v10 = vmul.f32 -1.442695, %v2201_v30 }
 0x442   : > { %3339 = vpow2.f32 %v2645_v10  ;;  %v2229_v10 = vld [vmem:[%s5075_s11 + $0x98] sm:$0xff] }
 0x44c   : > { %v3340_v33 = vpop.eup %3339 }
 0x44d   : > { %v2207_v31 = vadd.f32 1.0, %v3340_v33 }
 0x44f   : > { %3341 = vrcp.f32 %v2207_v31 }
 0x459   : > { %v3342_v42 = vpop.eup %3341 }
 0x45a   : > { %v2245_v9 = vrot.slane %v3342_v42, %v2244_v1 }
 0x45c   : > { %v2246_v11 = vmul.f32 %v2245_v9, %v4825_v47  ;;  %v2247_v51 = vmul.f32 %v2245_v9, %v4820_v18  ;;  %v2248_v38 = vmul.f32 %v2245_v9, %v4828_v15  ;;  %v2249_v17 = vmul.f32 %v2245_v9, %v4835_v41 }
 0x45d   : > { %v2250_v4 = vmul.f32 %v2245_v9, %v4841_v28  ;;  %v2251_v14 = vmul.f32 %v2245_v9, %v4847_v53  ;;  %v2252_v60 = vmul.f32 %v2245_v9, %v4853_v16  ;;  %v2253_v32 = vmul.f32 %v2245_v9, %v4859_v24  ;;  %v2211_v28 = vld [vmem:[%s5075_s11 + $0x8] sm:$0xff]  ;;  %v2212_v53 = vld [vmem:[%s5075_s11 + $0x10] sm:$0xff] }
 0x45e   : > { %v2254_v47 = vmul.f32 %v2245_v9, %v4865_v6  ;;  %v2255_v18 = vmul.f32 %v2245_v9, %v4871_v20  ;;  %v2256_v15 = vmul.f32 %v2245_v9, %v4876_v63  ;;  %v2257_v41 = vmul.f32 %v2245_v9, %v4882_v36  ;;  %v2214_v20 = vld [vmem:[%s5075_s11 + $0x20] sm:$0xff]  ;;  %v2215_v63 = vld [vmem:[%s5075_s11 + $0x28] sm:$0xff]  ;;  %v2216_v36 = vld [vmem:[%s5075_s11 + $0x30] sm:$0xff] }
 0x45f   : > { %v2258_v16 = vmul.f32 %v2245_v9, %v4893_v27  ;;  %v2259_v24 = vmul.f32 %v2245_v9, %v4896_v57  ;;  %v2260_v21 = vmul.f32 %v2245_v9, %v4902_v49  ;;  %v2261_v6 = vmul.f32 %v2245_v9, %v4908_v13  ;;  %v2218_v57 = vld [vmem:[%s5075_s11 + $0x40] sm:$0xff]  ;;  %v2219_v49 = vld [vmem:[%s5075_s11 + $0x48] sm:$0xff]  ;;  %v2220_v13 = vld [vmem:[%s5075_s11 + $0x50] sm:$0xff] }
 0x460   : > { %v2262_v56 = vmul.f32 %v2245_v9, %v4914_v45  ;;  %v2263_v46 = vmul.f32 %v2245_v9, %v4920_v19  ;;  %v2264_v39 = vmul.f32 %v2245_v9, %v4926_v26  ;;  %v2265_v27 = vmul.f32 %v2245_v9, %v4932_v62  ;;  %v2221_v19 = vld [vmem:[%s5075_s11 + $0x58] sm:$0xff]  ;;  %v2222_v26 = vld [vmem:[%s5075_s11 + $0x60] sm:$0xff] }
 0x461   : > { %v2266_v8 = vmul.f32 %v2245_v9, %v4938_v59  ;;  %v2267_v52 = vmul.f32 %v2245_v9, %v4944_v35  ;;  %v2268_v34 = vmul.f32 %v2245_v9, %v4950_v22  ;;  %v2269_v45 = vmul.f32 %v2245_v9, %v4956_v58  ;;  %v2224_v35 = vld [vmem:[%s5075_s11 + $0x70] sm:$0xff]  ;;  %v2225_v22 = vld [vmem:[%s5075_s11 + $0x78] sm:$0xff] }
 0x462   : > { %v2270_v62 = vmul.f32 %v2245_v9, %v4962_v23  ;;  %v2271_v48 = vmul.f32 %v2245_v9, %v4968_v2  ;;  %v2272_v61 = vmul.f32 %v2245_v9, %v4974_v29  ;;  %v2273_v59 = vmul.f32 %v2245_v9, %v4980_v3  ;;  %v2227_v2 = vld [vmem:[%s5075_s11 + $0x88] sm:$0xff]  ;;  %v2228_v29 = vld [vmem:[%s5075_s11 + $0x90] sm:$0xff] }
 0x463   : > { %v2274_v58 = vmul.f32 %v2245_v9, %v4986_v5  ;;  %v2275_v30 = vmul.f32 %v2245_v9, %v4992_v40  ;;  %v2276_v50 = vmul.f32 %v2245_v9, %v4998_v12  ;;  %v2277_v23 = vmul.f32 %v2245_v9, %v5002_v43  ;;  %v2231_v5 = vld [vmem:[%s5075_s11 + $0xa8] sm:$0xff]  ;;  %v2232_v40 = vld [vmem:[%s5075_s11 + $0xb0] sm:$0xff]  ;;  %v2233_v9 = vld [vmem:[%s5075_s11 + $0xb8] sm:$0xff] }
 0x464   : > { %v2278_v3 = vadd.f32 %v2246_v11, %v2210_v54  ;;  %v2279_v33 = vadd.f32 %v2247_v51, %v2211_v28  ;;  %v2280_v31 = vadd.f32 %v2248_v38, %v2212_v53  ;;  %v2281_v44 = vadd.f32 %v2249_v17, %v2213_v55  ;;  %v2234_v11 = vld [vmem:[%s5075_s11 + $0xc0] sm:$0xff]  ;;  %v2235_v54 = vld [vmem:[%s5075_s11 + $0xc8] sm:$0xff]  ;;  %v2236_v17 = vld [vmem:[%s5075_s11 + $0xd0] sm:$0xff] }
 0x465   : > { %v2282_v1 = vadd.f32 %v2250_v4, %v2214_v20  ;;  %v2283_v12 = vadd.f32 %v2251_v14, %v2215_v63  ;;  %v2284_v42 = vadd.f32 %v2252_v60, %v2216_v36  ;;  %v2285_v43 = vadd.f32 %v2253_v32, %v2217_v37  ;;  %v2237_v55 = vld [vmem:[%s5075_s11 + $0xd8] sm:$0xff]  ;;  %v2238_v4 = vld [vmem:[%s5075_s11 + $0xe0] sm:$0xff]  ;;  %v2239_v60 = vld [vmem:[%s5075_s11 + $0xe8] sm:$0xff] }
 0x466   : > { %v2286_v28 = vadd.f32 %v2254_v47, %v2218_v57  ;;  %v2287_v51 = vadd.f32 %v2255_v18, %v2219_v49  ;;  %v2288_v38 = vadd.f32 %v2256_v15, %v2220_v13  ;;  %v2289_v53 = vadd.f32 %v2257_v41, %v2221_v19  ;;  %v2240_v32 = vld [vmem:[%s5075_s11 + $0xf0] sm:$0xff]  ;;  %v2241_v37 = vld [vmem:[%s5075_s11 + $0xf8] sm:$0xff] }
 0x467   : > { %v2290_v20 = vadd.f32 %v2258_v16, %v2222_v26  ;;  %v2291_v14 = vadd.f32 %v2259_v24, %v2223_v7  ;;  %v2292_v63 = vadd.f32 %v2260_v21, %v2224_v35  ;;  %v2293_v36 = vadd.f32 %v2261_v6, %v2225_v22 }
 0x468   : > { %v2294_v47 = vadd.f32 %v2262_v56, %v2226_v25  ;;  %v2295_v57 = vadd.f32 %v2263_v46, %v2227_v2  ;;  %v2296_v18 = vadd.f32 %v2264_v39, %v2228_v29  ;;  %v2297_v49 = vadd.f32 %v2265_v27, %v2229_v10 }
 0x469   : > { %v5141_v13 = vadd.f32 %v2266_v8, %v2230_v0  ;;  %v5143_v15 = vadd.f32 %v2267_v52, %v2231_v5  ;;  %v5145_v41 = vadd.f32 %v2268_v34, %v2232_v40  ;;  %v5147_v19 = vadd.f32 %v2269_v45, %v2233_v9 }
 0x46a   : > { %v5149_v16 = vadd.f32 %v2270_v62, %v2234_v11  ;;  %v5151_v24 = vadd.f32 %v2271_v48, %v2235_v54  ;;  %v5153_v21 = vadd.f32 %v2272_v61, %v2236_v17  ;;  %v5155_v6 = vadd.f32 %v2273_v59, %v2237_v55 }
 0x46b   : > { %v5164_v56 = vadd.f32 %v2274_v58, %v2238_v4  ;;  %v5166_v46 = vadd.f32 %v2275_v30, %v2239_v60  ;;  %v5168_v39 = vadd.f32 %v2276_v50, %v2240_v32  ;;  %v5170_v27 = vadd.f32 %v2277_v23, %v2241_v37 }
 0x46c   : > { %v2310_v8 = vmax.f32 %v2278_v3, 0.0  ;;  %v2311_v52 = vmax.f32 %v2279_v33, 0.0  ;;  %v2312_v34 = vmax.f32 %v2280_v31, 0.0  ;;  %v2313_v45 = vmax.f32 %v2281_v44, 0.0 }
 0x46d   : > { %v2314_v26 = vmax.f32 %v2282_v1, 0.0  ;;  %v2315_v7 = vmax.f32 %v2283_v12, 0.0  ;;  %v2316_v62 = vmax.f32 %v2284_v42, 0.0  ;;  %v2317_v48 = vmax.f32 %v2285_v43, 0.0 }
 0x46e   : > { %v2318_v61 = vmax.f32 %v2286_v28, 0.0  ;;  %v2319_v59 = vmax.f32 %v2287_v51, 0.0  ;;  %v2320_v35 = vmax.f32 %v2288_v38, 0.0  ;;  %v2321_v22 = vmax.f32 %v2289_v53, 0.0  ;;  %2342 = vst [vmem:[%s5162_s13] sm:$0xff] %v2310_v8  ;;  %2343 = vst [vmem:[%s5162_s13 + $0x8] sm:$0xff] %v2311_v52 }
 0x46f   : > { %2344 = vst [vmem:[%s5162_s13 + $0x10] sm:$0xff] %v2312_v34  ;;  %2345 = vst [vmem:[%s5162_s13 + $0x18] sm:$0xff] %v2313_v45  ;;  %v2322_v25 = vmax.f32 %v2290_v20, 0.0  ;;  %v2323_v58 = vmax.f32 %v2291_v14, 0.0  ;;  %v2324_v30 = vmax.f32 %v2292_v63, 0.0  ;;  %v2325_v50 = vmax.f32 %v2293_v36, 0.0 }
 0x470   : > { %2346 = vst [vmem:[%s5162_s13 + $0x20] sm:$0xff] %v2314_v26  ;;  %2347 = vst [vmem:[%s5162_s13 + $0x28] sm:$0xff] %v2315_v7  ;;  %v2326_v23 = vmax.f32 %v2294_v47, 0.0  ;;  %v2327_v2 = vmax.f32 %v2295_v57, 0.0  ;;  %v2328_v29 = vmax.f32 %v2296_v18, 0.0  ;;  %v2329_v10 = vmax.f32 %v2297_v49, 0.0 }
 0x471   : > { %2348 = vst [vmem:[%s5162_s13 + $0x30] sm:$0xff] %v2316_v62  ;;  %2349 = vst [vmem:[%s5162_s13 + $0x38] sm:$0xff] %v2317_v48  ;;  %v2330_v3 = vmax.f32 %v5141_v13, 0.0  ;;  %v2331_v33 = vmax.f32 %v5143_v15, 0.0  ;;  %v2332_v31 = vmax.f32 %v5145_v41, 0.0  ;;  %v2333_v44 = vmax.f32 %v5147_v19, 0.0 }
 0x472   : > { %2350 = vst [vmem:[%s5162_s13 + $0x40] sm:$0xff] %v2318_v61  ;;  %2351 = vst [vmem:[%s5162_s13 + $0x48] sm:$0xff] %v2319_v59  ;;  %v2334_v0 = vmax.f32 %v5149_v16, 0.0  ;;  %v2335_v5 = vmax.f32 %v5151_v24, 0.0  ;;  %v2336_v40 = vmax.f32 %v5153_v21, 0.0  ;;  %v2337_v1 = vmax.f32 %v5155_v6, 0.0 }
 0x473   : > { %2352 = vst [vmem:[%s5162_s13 + $0x50] sm:$0xff] %v2320_v35  ;;  %2353 = vst [vmem:[%s5162_s13 + $0x58] sm:$0xff] %v2321_v22  ;;  %v2338_v12 = vmax.f32 %v5164_v56, 0.0  ;;  %v2339_v42 = vmax.f32 %v5166_v46, 0.0  ;;  %v2340_v43 = vmax.f32 %v5168_v39, 0.0  ;;  %v2341_v9 = vmax.f32 %v5170_v27, 0.0 }
 0x474   : > { %2354 = vst [vmem:[%s5162_s13 + $0x60] sm:$0xff] %v2322_v25  ;;  %2355 = vst [vmem:[%s5162_s13 + $0x68] sm:$0xff] %v2323_v58 }
 0x475   : > { %2356 = vst [vmem:[%s5162_s13 + $0x70] sm:$0xff] %v2324_v30  ;;  %2357 = vst [vmem:[%s5162_s13 + $0x78] sm:$0xff] %v2325_v50 }
 0x476   : > { %2358 = vst [vmem:[%s5162_s13 + $0x80] sm:$0xff] %v2326_v23  ;;  %2359 = vst [vmem:[%s5162_s13 + $0x88] sm:$0xff] %v2327_v2 }
 0x477   : > { %2360 = vst [vmem:[%s5162_s13 + $0x90] sm:$0xff] %v2328_v29  ;;  %2361 = vst [vmem:[%s5162_s13 + $0x98] sm:$0xff] %v2329_v10 }
 0x478   : > { %2362 = vst [vmem:[%s5162_s13 + $0xa0] sm:$0xff] %v2330_v3  ;;  %2363 = vst [vmem:[%s5162_s13 + $0xa8] sm:$0xff] %v2331_v33 }
 0x479   : > { %2364 = vst [vmem:[%s5162_s13 + $0xb0] sm:$0xff] %v2332_v31  ;;  %2365 = vst [vmem:[%s5162_s13 + $0xb8] sm:$0xff] %v2333_v44 }
 0x47a   : > { %2366 = vst [vmem:[%s5162_s13 + $0xc0] sm:$0xff] %v2334_v0  ;;  %2367 = vst [vmem:[%s5162_s13 + $0xc8] sm:$0xff] %v2335_v5 }
 0x47b   : > { %2368 = vst [vmem:[%s5162_s13 + $0xd0] sm:$0xff] %v2336_v40  ;;  %2369 = vst [vmem:[%s5162_s13 + $0xd8] sm:$0xff] %v2337_v1 }
 0x47c   : > { %2370 = vst [vmem:[%s5162_s13 + $0xe0] sm:$0xff] %v2338_v12  ;;  %2371 = vst [vmem:[%s5162_s13 + $0xe8] sm:$0xff] %v2339_v42 }
 0x47d   : > { %2372 = vst [vmem:[%s5162_s13 + $0xf0] sm:$0xff] %v2340_v43  ;;  %2373 = vst [vmem:[%s5162_s13 + $0xf8] sm:$0xff] %v2341_v9 }
 0x47e PF: > { %s19_s30 = sadd.s32 1, %s3349_s30  }
 0x47f   : > { %p16_p4 = scmp.ge.s32.totalorder %s19_s30, 4  }
 0x481   :  { %18 = sbr.rel (!%p16_p4) target bundleno = 1 (0x1), region = 91 }

</bundles_post_ra>
